<compile_context>
chip_gen: v5e
topology: v5e:2x2
jax: 0.10.0
libtpu: 0.0.40
codegen_flags: <defaults>
</compile_context>

<pallas_src>
import jax
import jax.numpy as jnp
from jax import lax
from jax.experimental import pallas as pl
from jax.experimental.pallas import tpu as pltpu

# ---------------- synthetic configuration ----------------
VOCAB = 50
EMB_DIM = 32
HIDDEN_DIM = 32                # bidirectional -> per-direction hidden = 16
H2 = HIDDEN_DIM // 2
LABEL_SIZE = 10                # data.label_alphabet_size
TAG_SIZE = LABEL_SIZE + 2      # hidden2tag output dim = label_alphabet_size + 2
START_IDX = TAG_SIZE - 2       # CRF START_TAG (= -2)
STOP_IDX = TAG_SIZE - 1        # CRF STOP_TAG  (= -1)
BATCH = 2
SEQ = 8


def _full_spec(shape):
    nd = len(shape)
    return pl.BlockSpec(shape, lambda i, _nd=nd: (0,) * _nd)


# ---------------- single fused Pallas kernel ----------------
def fused_kernel(x_ref, mcat_ref, len_ref, wih_ref, whh_ref, bias_ref,
                 wtag_ref, btag_ref, trans_ref,
                 tag_ref, outf_sc, outb_sc):
    S, B, HH = mcat_ref.shape          # HH = 2 * per-direction hidden
    h2 = HH // 2
    T = trans_ref.shape[0]
    start_idx = T - 2
    stop_idx = T - 1

    # ---- 1) hoisted input projection (both directions, all steps, one MXU matmul) ----
    # x_ref row t*B+b = [x[t,b] | x[S-1-t,b]]; wih_ref is the paired/fused (2E, 4*HH) matrix.
    gin = (jnp.dot(x_ref[...], wih_ref[...], preferred_element_type=jnp.float32)
           + bias_ref[...])            # (S*B, 4*HH) = (S*B, 128), lane dense

    whh = whh_ref[...]                 # block-diagonal (HH, 4*HH)

    h_cat = jnp.zeros((B, HH), jnp.float32)   # [h_fwd | h_bwd]
    c_cat = jnp.zeros((B, HH), jnp.float32)

    # ---- 2) fused fwd/bwd recurrence, fully unrolled over SEQ ----
    for t in range(S):
        tb = S - 1 - t                 # time index processed by the backward direction
        g = gin[t * B:(t + 1) * B, :] + jnp.dot(
            h_cat, whh, preferred_element_type=jnp.float32)       # (B, 128)
        sig = jax.nn.sigmoid(g)        # one EUP pass over the full 128-lane tile
        tnh = jnp.tanh(g)
        i_cat = sig[:, 0 * HH:1 * HH]
        f_cat = sig[:, 1 * HH:2 * HH]
        g_cat = tnh[:, 2 * HH:3 * HH]
        o_cat = sig[:, 3 * HH:4 * HH]
        c_new = f_cat * c_cat + i_cat * g_cat
        h_new = o_cat * jnp.tanh(c_new)

        valid = mcat_ref[t] > 0.5      # (B, HH): [mask[t]]*h2 | [mask[tb]]*h2
        h_cat = jnp.where(valid, h_new, h_cat)    # state frozen at padded steps (pack)
        c_cat = jnp.where(valid, c_new, c_cat)
        out_cat = jnp.where(valid, h_cat, 0.0)    # pad_packed zeros at padded steps
        outf_sc[pl.ds(t * B, B), :] = out_cat[:, 0:h2]
        outb_sc[pl.ds(tb * B, B), :] = out_cat[:, h2:HH]

    # ---- 3) hidden2tag projection (stays in VMEM) ----
    wtag = wtag_ref[...]               # (HH, T)
    feats = (jnp.dot(outf_sc[...], wtag[0:h2, :], preferred_element_type=jnp.float32)
             + jnp.dot(outb_sc[...], wtag[h2:HH, :], preferred_element_type=jnp.float32)
             + btag_ref[...])          # (S*B, T)

    # ---- 4) CRF Viterbi forward DP (unrolled, only last-valid partition kept) ----
    trans = trans_ref[...]             # (prev, cur)
    part = feats[0:B, :] + trans[start_idx:start_idx + 1, :]      # (B, T), t = 0
    last_part = part                   # partition at time length-1 (tracked via mask)
    bp_list = []                       # bp_list[t-1] = masked backpointers of step t
    for t in range(1, S):
        feats_t = feats[t * B:(t + 1) * B, :]
        cur_values = (feats_t[:, None, :] + trans[None, :, :]
                      + part[:, :, None])                         # (B, prev, cur)
        new_part = jnp.max(cur_values, axis=1)                    # (B, cur)
        prev_iota = lax.broadcasted_iota(jnp.int32, cur_values.shape, 1)
        is_max = cur_values >= new_part[:, None, :]
        bp = jnp.min(jnp.where(is_max, prev_iota, jnp.int32(T + 1)), axis=1)  # first argmax
        m_t = mcat_ref[t][:, 0:1]      # (B, 1) mask at time t
        valid_t = m_t > 0.5
        bp = jnp.where(valid_t, bp, 0)            # NCRF++: zero bp at padded steps
        part = new_part                           # partition evolves unmasked (as in NCRF++)
        last_part = jnp.where(valid_t, new_part, last_part)
        bp_list.append(bp)

    # ---- 5) transition to STOP + in-kernel backtrace ----
    last_values = last_part[:, :, None] + trans[None, :, :]       # (B, prev, cur)
    lmax = jnp.max(last_values, axis=1)
    liota = lax.broadcasted_iota(jnp.int32, last_values.shape, 1)
    lis = last_values >= lmax[:, None, :]
    last_bp = jnp.min(jnp.where(lis, liota, jnp.int32(T + 1)), axis=1)   # (B, T)
    pointer = last_bp[:, stop_idx:stop_idx + 1]                   # (B, 1) int32

    lengths_m1 = len_ref[...] - 1                                 # (B, 1) int32
    lane_iota = lax.broadcasted_iota(jnp.int32, (B, T), 1)

    tag_ref[S - 1] = pointer
    ptr = pointer
    for idx in range(S - 2, -1, -1):
        bp_idx = bp_list[idx]                                     # (B, T) int32, masked
        onehot = (lane_iota == ptr).astype(jnp.float32)           # vectorized gather
        gathered = jnp.sum(onehot * bp_idx.astype(jnp.float32),
                           axis=1, keepdims=True).astype(jnp.int32)   # (B, 1)
        # NCRF++ scatters `pointer` over all tag columns at position length-1
        ptr = jnp.where(lengths_m1 == idx, pointer, gathered)
        tag_ref[idx] = ptr


def bilstm_crf_fused_pallas(x_pair_2d, mask_cat, lengths_2d,
                            wih_pair, whh_bd, bias_pair, w_tag, b_tag, transitions):
    S, B, _ = mask_cat.shape
    h2 = whh_bd.shape[0] // 2
    args = (x_pair_2d, mask_cat, lengths_2d, wih_pair, whh_bd, bias_pair,
            w_tag, b_tag, transitions)
    return pl.pallas_call(
        fused_kernel,
        grid=(1,),
        out_shape=jax.ShapeDtypeStruct((S, B, 1), jnp.int32),
        in_specs=[_full_spec(a.shape) for a in args],
        out_specs=_full_spec((S, B, 1)),
        scratch_shapes=[pltpu.VMEM((S * B, h2), jnp.float32),
                        pltpu.VMEM((S * B, h2), jnp.float32)],
        compiler_params=pltpu.CompilerParams(dimension_semantics=("arbitrary",)),
    )(*args)


# ---------------- parameter fusion (wrapper-side, tiny one-time rearrangement) ----------------
def fuse_lstm_params(params):
    """Build the paired input-projection matrix, block-diagonal recurrent matrix and
    fused bias with gate-column layout [i_f i_b | f_f f_b | g_f g_b | o_f o_b]."""
    wih_f, whh_f, b_f = params["wih_f"], params["whh_f"], params["b_f"]
    wih_b, whh_b, b_b = params["wih_b"], params["whh_b"], params["b_b"]
    E = wih_f.shape[0]
    h2 = whh_f.shape[0]
    HH = 2 * h2
    G = 4 * HH
    wih_pair = jnp.zeros((2 * E, G), jnp.float32)
    whh_bd = jnp.zeros((HH, G), jnp.float32)
    bias_pair = jnp.zeros((1, G), jnp.float32)
    for gidx in range(4):                      # PyTorch LSTM gate order: i, f, g, o
        src = slice(gidx * h2, (gidx + 1) * h2)
        dst_f = slice(gidx * HH, gidx * HH + h2)
        dst_b = slice(gidx * HH + h2, (gidx + 1) * HH)
        wih_pair = wih_pair.at[0:E, dst_f].set(wih_f[:, src])
        wih_pair = wih_pair.at[E:2 * E, dst_b].set(wih_b[:, src])
        whh_bd = whh_bd.at[0:h2, dst_f].set(whh_f[:, src])
        whh_bd = whh_bd.at[h2:HH, dst_b].set(whh_b[:, src])
        bias_pair = bias_pair.at[:, dst_f].set(b_f[:, src])
        bias_pair = bias_pair.at[:, dst_b].set(b_b[:, src])
    return wih_pair, whh_bd, bias_pair


# ---------------- full forward (inference path) ----------------
def bilstm_crf_forward(params, batch_input, mask_bool):
    B, S = batch_input.shape

    # embedding lookup (+ eval-mode dropout = identity)
    word_embeds = jnp.take(params["emb"], batch_input, axis=0)          # (B, S, E)
    x_sbe = jnp.transpose(word_embeds, (1, 0, 2)).astype(jnp.float32)   # (S, B, E)

    # time-paired input: row t carries x[t] (fwd direction) and x[S-1-t] (bwd direction)
    x_pair = jnp.concatenate([x_sbe, x_sbe[::-1]], axis=-1)             # (S, B, 2E)
    x_pair_2d = x_pair.reshape(S * B, 2 * EMB_DIM)

    mask_sb = jnp.transpose(mask_bool.astype(jnp.float32), (1, 0))      # (S, B)
    m_fwd = jnp.broadcast_to(mask_sb[:, :, None], (S, B, H2))
    m_bwd = jnp.broadcast_to(mask_sb[::-1][:, :, None], (S, B, H2))
    mask_cat = jnp.concatenate([m_fwd, m_bwd], axis=-1)                 # (S, B, 2*H2)

    lengths_2d = jnp.sum(mask_bool.astype(jnp.int32), axis=1)[:, None]  # (B, 1)

    wih_pair, whh_bd, bias_pair = fuse_lstm_params(params)

    tag_sb1 = bilstm_crf_fused_pallas(
        x_pair_2d, mask_cat, lengths_2d, wih_pair, whh_bd, bias_pair,
        params["w_tag"], params["b_tag"], params["transitions"])        # (S, B, 1)

    tag_seq = jnp.transpose(tag_sb1[:, :, 0], (1, 0))                   # (B, S)
    return tag_seq


# ---------------- deterministic parameter init ----------------
def init_params(key):
    ks = jax.random.split(key, 12)
    scale_emb = (3.0 / EMB_DIM) ** 0.5
    k_lstm = 1.0 / (H2 ** 0.5)
    k_lin = 1.0 / (HIDDEN_DIM ** 0.5)

    emb = jax.random.uniform(ks[0], (VOCAB, EMB_DIM), jnp.float32, -scale_emb, scale_emb)

    def u(key, shape, k):
        return jax.random.uniform(key, shape, jnp.float32, -k, k)

    params = dict(
        emb=emb,
        # LSTM weights stored pre-transposed: (in, 4*H2), gate order i,f,g,o
        wih_f=u(ks[1], (EMB_DIM, 4 * H2), k_lstm),
        whh_f=u(ks[2], (H2, 4 * H2), k_lstm),
        b_f=u(ks[3], (1, 4 * H2), k_lstm) + u(ks[4], (1, 4 * H2), k_lstm),   # b_ih + b_hh
        wih_b=u(ks[5], (EMB_DIM, 4 * H2), k_lstm),
        whh_b=u(ks[6], (H2, 4 * H2), k_lstm),
        b_b=u(ks[7], (1, 4 * H2), k_lstm) + u(ks[8], (1, 4 * H2), k_lstm),
        # hidden2tag stored pre-transposed: (hidden, tag)
        w_tag=u(ks[9], (HIDDEN_DIM, TAG_SIZE), k_lin),
        b_tag=u(ks[10], (1, TAG_SIZE), k_lin),
    )
    # CRF transitions: small random values with START/STOP constraints
    trans = jax.random.uniform(ks[11], (TAG_SIZE, TAG_SIZE), jnp.float32, -0.1, 0.1)
    trans = trans.at[:, START_IDX].set(-10000.0)
    trans = trans.at[STOP_IDX, :].set(-10000.0)
    params["transitions"] = trans
    return params


if __name__ == "__main__":
    key = jax.random.PRNGKey(0)
    pkey, ikey = jax.random.split(key)
    params = init_params(pkey)

    # batch_input: word ids, padded; batch_len sorted descending (pack semantics)
    batch_input = jax.random.randint(ikey, (BATCH, SEQ), 0, VOCAB, dtype=jnp.int32)
    batch_len = jnp.array([SEQ, 5], dtype=jnp.int32)
    mask_bool = jnp.arange(SEQ)[None, :] < batch_len[:, None]        # (B, S) bool

    fwd = jax.jit(bilstm_crf_forward)
    tag_seq = fwd(params, batch_input, mask_bool)
    jax.block_until_ready(tag_seq)

    assert tag_seq.shape == (BATCH, SEQ)
    print("KERNEL_OK")
</pallas_src>

<mosaic_0001>
module attributes {stable_mosaic.version = 11 : i64} {
  func.func @fused_kernel(%arg0: i32, %arg1: memref<16x64xf32, #tpu.memory_space<vmem>>, %arg2: memref<8x2x32xf32, #tpu.memory_space<vmem>>, %arg3: memref<2x1xi32, #tpu.memory_space<vmem>>, %arg4: memref<64x128xf32, #tpu.memory_space<vmem>>, %arg5: memref<32x128xf32, #tpu.memory_space<vmem>>, %arg6: memref<1x128xf32, #tpu.memory_space<vmem>>, %arg7: memref<32x12xf32, #tpu.memory_space<vmem>>, %arg8: memref<1x12xf32, #tpu.memory_space<vmem>>, %arg9: memref<12x12xf32, #tpu.memory_space<vmem>>, %arg10: memref<8x2x1xi32, #tpu.memory_space<vmem>>, %arg11: memref<16x16xf32, #tpu.memory_space<vmem>>, %arg12: memref<16x16xf32, #tpu.memory_space<vmem>>) attributes {dimension_semantics = [#tpu.dimension_semantics<arbitrary>], iteration_bounds = array<i64: 1>, scalar_prefetch = 0 : i64, scratch_operands = 2 : i64, tpu.core_type = #tpu.core_type<tc>, window_params = [{pipeline_mode = #tpu.pipeline_mode<synchronous>, transform_indices = @transform_0, window_bounds = array<i64: 16, 64>}, {pipeline_mode = #tpu.pipeline_mode<synchronous>, transform_indices = @transform_1, window_bounds = array<i64: 8, 2, 32>}, {pipeline_mode = #tpu.pipeline_mode<synchronous>, transform_indices = @transform_2, window_bounds = array<i64: 2, 1>}, {pipeline_mode = #tpu.pipeline_mode<synchronous>, transform_indices = @transform_3, window_bounds = array<i64: 64, 128>}, {pipeline_mode = #tpu.pipeline_mode<synchronous>, transform_indices = @transform_4, window_bounds = array<i64: 32, 128>}, {pipeline_mode = #tpu.pipeline_mode<synchronous>, transform_indices = @transform_5, window_bounds = array<i64: 1, 128>}, {pipeline_mode = #tpu.pipeline_mode<synchronous>, transform_indices = @transform_6, window_bounds = array<i64: 32, 12>}, {pipeline_mode = #tpu.pipeline_mode<synchronous>, transform_indices = @transform_7, window_bounds = array<i64: 1, 12>}, {pipeline_mode = #tpu.pipeline_mode<synchronous>, transform_indices = @transform_8, window_bounds = array<i64: 12, 12>}, {pipeline_mode = #tpu.pipeline_mode<synchronous>, transform_indices = @transform_9, window_bounds = array<i64: 8, 2, 1>}]} {
    %c0 = arith.constant 0 : index
    %c0_0 = arith.constant 0 : index
    %0 = vector.load %arg1[%c0, %c0_0] : memref<16x64xf32, #tpu.memory_space<vmem>>, vector<16x64xf32>
    %c0_1 = arith.constant 0 : index
    %c0_2 = arith.constant 0 : index
    %1 = vector.load %arg4[%c0_1, %c0_2] : memref<64x128xf32, #tpu.memory_space<vmem>>, vector<64x128xf32>
    %cst = arith.constant dense<0.000000e+00> : vector<16x128xf32>
    %2 = tpu.matmul %0, %1, %cst {dimension_numbers = #tpu.dot_dimension_numbers<[1], [0], [0], [1], [0, 0, 1, 1], [], []>} : vector<16x64xf32>, vector<64x128xf32>, vector<16x128xf32> -> vector<16x128xf32>
    %c0_3 = arith.constant 0 : index
    %c0_4 = arith.constant 0 : index
    %3 = vector.load %arg6[%c0_3, %c0_4] : memref<1x128xf32, #tpu.memory_space<vmem>>, vector<1x128xf32>
    %4 = vector.broadcast %3 : vector<1x128xf32> to vector<16x128xf32>
    %5 = arith.addf %2, %4 : vector<16x128xf32>
    %c0_5 = arith.constant 0 : index
    %c0_6 = arith.constant 0 : index
    %6 = vector.load %arg5[%c0_5, %c0_6] : memref<32x128xf32, #tpu.memory_space<vmem>>, vector<32x128xf32>
    %cst_7 = arith.constant 0.000000e+00 : f32
    %7 = vector.broadcast %cst_7 : f32 to vector<2x32xf32>
    %cst_8 = arith.constant 0.000000e+00 : f32
    %8 = vector.broadcast %cst_8 : f32 to vector<2x32xf32>
    %9 = vector.extract_strided_slice %5 {offsets = [0, 0], sizes = [2, 128], strides = [1, 1]} : vector<16x128xf32> to vector<2x128xf32>
    %cst_9 = arith.constant dense<0.000000e+00> : vector<2x128xf32>
    %10 = tpu.matmul %7, %6, %cst_9 {dimension_numbers = #tpu.dot_dimension_numbers<[1], [0], [0], [1], [0, 0, 1, 1], [], []>} : vector<2x32xf32>, vector<32x128xf32>, vector<2x128xf32> -> vector<2x128xf32>
    %11 = arith.addf %9, %10 : vector<2x128xf32>
    %12 = arith.negf %11 : vector<2x128xf32>
    %13 = math.exp %12 : vector<2x128xf32>
    %cst_10 = arith.constant 1.000000e+00 : f32
    %14 = vector.broadcast %cst_10 : f32 to vector<2x128xf32>
    %15 = arith.addf %14, %13 : vector<2x128xf32>
    %16 = arith.divf %14, %15 : vector<2x128xf32>
    %17 = math.tanh %11 : vector<2x128xf32>
    %18 = vector.extract_strided_slice %16 {offsets = [0, 0], sizes = [2, 32], strides = [1, 1]} : vector<2x128xf32> to vector<2x32xf32>
    %19 = vector.extract_strided_slice %16 {offsets = [0, 32], sizes = [2, 32], strides = [1, 1]} : vector<2x128xf32> to vector<2x32xf32>
    %20 = vector.extract_strided_slice %17 {offsets = [0, 64], sizes = [2, 32], strides = [1, 1]} : vector<2x128xf32> to vector<2x32xf32>
    %21 = vector.extract_strided_slice %16 {offsets = [0, 96], sizes = [2, 32], strides = [1, 1]} : vector<2x128xf32> to vector<2x32xf32>
    %22 = arith.mulf %19, %8 : vector<2x32xf32>
    %23 = arith.mulf %18, %20 : vector<2x32xf32>
    %24 = arith.addf %22, %23 : vector<2x32xf32>
    %25 = math.tanh %24 : vector<2x32xf32>
    %26 = arith.mulf %21, %25 : vector<2x32xf32>
    %c0_11 = arith.constant 0 : index
    %c0_12 = arith.constant 0 : index
    %c0_13 = arith.constant 0 : index
    %27 = vector.load %arg2[%c0_11, %c0_12, %c0_13] : memref<8x2x32xf32, #tpu.memory_space<vmem>>, vector<1x2x32xf32>
    %28 = vector.shape_cast %27 : vector<1x2x32xf32> to vector<2x32xf32>
    %cst_14 = arith.constant 5.000000e-01 : f32
    %29 = vector.broadcast %cst_14 : f32 to vector<2x32xf32>
    %30 = arith.cmpf ogt, %28, %29 : vector<2x32xf32>
    %31 = arith.select %30, %26, %7 : vector<2x32xi1>, vector<2x32xf32>
    %32 = arith.select %30, %24, %8 : vector<2x32xi1>, vector<2x32xf32>
    %cst_15 = arith.constant 0.000000e+00 : f32
    %33 = vector.broadcast %cst_15 : f32 to vector<2x32xf32>
    %34 = arith.select %30, %31, %33 : vector<2x32xi1>, vector<2x32xf32>
    %35 = vector.extract_strided_slice %34 {offsets = [0, 0], sizes = [2, 16], strides = [1, 1]} : vector<2x32xf32> to vector<2x16xf32>
    %c0_16 = arith.constant 0 : index
    %c0_17 = arith.constant 0 : index
    %36 = vector.load %arg11[%c0_16, %c0_17] : memref<16x16xf32, #tpu.memory_space<vmem>>, vector<2x16xf32>
    tpu.vector_store %arg11[%c0_16, %c0_17], %35 {strides = array<i32>} : memref<16x16xf32, #tpu.memory_space<vmem>>, vector<2x16xf32>,
    %37 = vector.extract_strided_slice %34 {offsets = [0, 16], sizes = [2, 16], strides = [1, 1]} : vector<2x32xf32> to vector<2x16xf32>
    %c14 = arith.constant 14 : index
    %c0_18 = arith.constant 0 : index
    %38 = vector.load %arg12[%c14, %c0_18] : memref<16x16xf32, #tpu.memory_space<vmem>>, vector<2x16xf32>
    tpu.vector_store %arg12[%c14, %c0_18], %37 {strides = array<i32>} : memref<16x16xf32, #tpu.memory_space<vmem>>, vector<2x16xf32>,
    %39 = vector.extract_strided_slice %5 {offsets = [2, 0], sizes = [2, 128], strides = [1, 1]} : vector<16x128xf32> to vector<2x128xf32>
    %cst_19 = arith.constant dense<0.000000e+00> : vector<2x128xf32>
    %40 = tpu.matmul %31, %6, %cst_19 {dimension_numbers = #tpu.dot_dimension_numbers<[1], [0], [0], [1], [0, 0, 1, 1], [], []>} : vector<2x32xf32>, vector<32x128xf32>, vector<2x128xf32> -> vector<2x128xf32>
    %41 = arith.addf %39, %40 : vector<2x128xf32>
    %42 = arith.negf %41 : vector<2x128xf32>
    %43 = math.exp %42 : vector<2x128xf32>
    %cst_20 = arith.constant 1.000000e+00 : f32
    %44 = vector.broadcast %cst_20 : f32 to vector<2x128xf32>
    %45 = arith.addf %44, %43 : vector<2x128xf32>
    %46 = arith.divf %44, %45 : vector<2x128xf32>
    %47 = math.tanh %41 : vector<2x128xf32>
    %48 = vector.extract_strided_slice %46 {offsets = [0, 0], sizes = [2, 32], strides = [1, 1]} : vector<2x128xf32> to vector<2x32xf32>
    %49 = vector.extract_strided_slice %46 {offsets = [0, 32], sizes = [2, 32], strides = [1, 1]} : vector<2x128xf32> to vector<2x32xf32>
    %50 = vector.extract_strided_slice %47 {offsets = [0, 64], sizes = [2, 32], strides = [1, 1]} : vector<2x128xf32> to vector<2x32xf32>
    %51 = vector.extract_strided_slice %46 {offsets = [0, 96], sizes = [2, 32], strides = [1, 1]} : vector<2x128xf32> to vector<2x32xf32>
    %52 = arith.mulf %49, %32 : vector<2x32xf32>
    %53 = arith.mulf %48, %50 : vector<2x32xf32>
    %54 = arith.addf %52, %53 : vector<2x32xf32>
    %55 = math.tanh %54 : vector<2x32xf32>
    %56 = arith.mulf %51, %55 : vector<2x32xf32>
    %c1 = arith.constant 1 : index
    %c0_21 = arith.constant 0 : index
    %c0_22 = arith.constant 0 : index
    %57 = vector.load %arg2[%c1, %c0_21, %c0_22] : memref<8x2x32xf32, #tpu.memory_space<vmem>>, vector<1x2x32xf32>
    %58 = vector.shape_cast %57 : vector<1x2x32xf32> to vector<2x32xf32>
    %cst_23 = arith.constant 5.000000e-01 : f32
    %59 = vector.broadcast %cst_23 : f32 to vector<2x32xf32>
    %60 = arith.cmpf ogt, %58, %59 : vector<2x32xf32>
    %61 = arith.select %60, %56, %31 : vector<2x32xi1>, vector<2x32xf32>
    %62 = arith.select %60, %54, %32 : vector<2x32xi1>, vector<2x32xf32>
    %cst_24 = arith.constant 0.000000e+00 : f32
    %63 = vector.broadcast %cst_24 : f32 to vector<2x32xf32>
    %64 = arith.select %60, %61, %63 : vector<2x32xi1>, vector<2x32xf32>
    %65 = vector.extract_strided_slice %64 {offsets = [0, 0], sizes = [2, 16], strides = [1, 1]} : vector<2x32xf32> to vector<2x16xf32>
    %c2 = arith.constant 2 : index
    %c0_25 = arith.constant 0 : index
    %66 = vector.load %arg11[%c2, %c0_25] : memref<16x16xf32, #tpu.memory_space<vmem>>, vector<2x16xf32>
    tpu.vector_store %arg11[%c2, %c0_25], %65 {strides = array<i32>} : memref<16x16xf32, #tpu.memory_space<vmem>>, vector<2x16xf32>,
    %67 = vector.extract_strided_slice %64 {offsets = [0, 16], sizes = [2, 16], strides = [1, 1]} : vector<2x32xf32> to vector<2x16xf32>
    %c12 = arith.constant 12 : index
    %c0_26 = arith.constant 0 : index
    %68 = vector.load %arg12[%c12, %c0_26] : memref<16x16xf32, #tpu.memory_space<vmem>>, vector<2x16xf32>
    tpu.vector_store %arg12[%c12, %c0_26], %67 {strides = array<i32>} : memref<16x16xf32, #tpu.memory_space<vmem>>, vector<2x16xf32>,
    %69 = vector.extract_strided_slice %5 {offsets = [4, 0], sizes = [2, 128], strides = [1, 1]} : vector<16x128xf32> to vector<2x128xf32>
    %cst_27 = arith.constant dense<0.000000e+00> : vector<2x128xf32>
    %70 = tpu.matmul %61, %6, %cst_27 {dimension_numbers = #tpu.dot_dimension_numbers<[1], [0], [0], [1], [0, 0, 1, 1], [], []>} : vector<2x32xf32>, vector<32x128xf32>, vector<2x128xf32> -> vector<2x128xf32>
    %71 = arith.addf %69, %70 : vector<2x128xf32>
    %72 = arith.negf %71 : vector<2x128xf32>
    %73 = math.exp %72 : vector<2x128xf32>
    %cst_28 = arith.constant 1.000000e+00 : f32
    %74 = vector.broadcast %cst_28 : f32 to vector<2x128xf32>
    %75 = arith.addf %74, %73 : vector<2x128xf32>
    %76 = arith.divf %74, %75 : vector<2x128xf32>
    %77 = math.tanh %71 : vector<2x128xf32>
    %78 = vector.extract_strided_slice %76 {offsets = [0, 0], sizes = [2, 32], strides = [1, 1]} : vector<2x128xf32> to vector<2x32xf32>
    %79 = vector.extract_strided_slice %76 {offsets = [0, 32], sizes = [2, 32], strides = [1, 1]} : vector<2x128xf32> to vector<2x32xf32>
    %80 = vector.extract_strided_slice %77 {offsets = [0, 64], sizes = [2, 32], strides = [1, 1]} : vector<2x128xf32> to vector<2x32xf32>
    %81 = vector.extract_strided_slice %76 {offsets = [0, 96], sizes = [2, 32], strides = [1, 1]} : vector<2x128xf32> to vector<2x32xf32>
    %82 = arith.mulf %79, %62 : vector<2x32xf32>
    %83 = arith.mulf %78, %80 : vector<2x32xf32>
    %84 = arith.addf %82, %83 : vector<2x32xf32>
    %85 = math.tanh %84 : vector<2x32xf32>
    %86 = arith.mulf %81, %85 : vector<2x32xf32>
    %c2_29 = arith.constant 2 : index
    %c0_30 = arith.constant 0 : index
    %c0_31 = arith.constant 0 : index
    %87 = vector.load %arg2[%c2_29, %c0_30, %c0_31] : memref<8x2x32xf32, #tpu.memory_space<vmem>>, vector<1x2x32xf32>
    %88 = vector.shape_cast %87 : vector<1x2x32xf32> to vector<2x32xf32>
    %cst_32 = arith.constant 5.000000e-01 : f32
    %89 = vector.broadcast %cst_32 : f32 to vector<2x32xf32>
    %90 = arith.cmpf ogt, %88, %89 : vector<2x32xf32>
    %91 = arith.select %90, %86, %61 : vector<2x32xi1>, vector<2x32xf32>
    %92 = arith.select %90, %84, %62 : vector<2x32xi1>, vector<2x32xf32>
    %cst_33 = arith.constant 0.000000e+00 : f32
    %93 = vector.broadcast %cst_33 : f32 to vector<2x32xf32>
    %94 = arith.select %90, %91, %93 : vector<2x32xi1>, vector<2x32xf32>
    %95 = vector.extract_strided_slice %94 {offsets = [0, 0], sizes = [2, 16], strides = [1, 1]} : vector<2x32xf32> to vector<2x16xf32>
    %c4 = arith.constant 4 : index
    %c0_34 = arith.constant 0 : index
    %96 = vector.load %arg11[%c4, %c0_34] : memref<16x16xf32, #tpu.memory_space<vmem>>, vector<2x16xf32>
    tpu.vector_store %arg11[%c4, %c0_34], %95 {strides = array<i32>} : memref<16x16xf32, #tpu.memory_space<vmem>>, vector<2x16xf32>,
    %97 = vector.extract_strided_slice %94 {offsets = [0, 16], sizes = [2, 16], strides = [1, 1]} : vector<2x32xf32> to vector<2x16xf32>
    %c10 = arith.constant 10 : index
    %c0_35 = arith.constant 0 : index
    %98 = vector.load %arg12[%c10, %c0_35] : memref<16x16xf32, #tpu.memory_space<vmem>>, vector<2x16xf32>
    tpu.vector_store %arg12[%c10, %c0_35], %97 {strides = array<i32>} : memref<16x16xf32, #tpu.memory_space<vmem>>, vector<2x16xf32>,
    %99 = vector.extract_strided_slice %5 {offsets = [6, 0], sizes = [2, 128], strides = [1, 1]} : vector<16x128xf32> to vector<2x128xf32>
    %cst_36 = arith.constant dense<0.000000e+00> : vector<2x128xf32>
    %100 = tpu.matmul %91, %6, %cst_36 {dimension_numbers = #tpu.dot_dimension_numbers<[1], [0], [0], [1], [0, 0, 1, 1], [], []>} : vector<2x32xf32>, vector<32x128xf32>, vector<2x128xf32> -> vector<2x128xf32>
    %101 = arith.addf %99, %100 : vector<2x128xf32>
    %102 = arith.negf %101 : vector<2x128xf32>
    %103 = math.exp %102 : vector<2x128xf32>
    %cst_37 = arith.constant 1.000000e+00 : f32
    %104 = vector.broadcast %cst_37 : f32 to vector<2x128xf32>
    %105 = arith.addf %104, %103 : vector<2x128xf32>
    %106 = arith.divf %104, %105 : vector<2x128xf32>
    %107 = math.tanh %101 : vector<2x128xf32>
    %108 = vector.extract_strided_slice %106 {offsets = [0, 0], sizes = [2, 32], strides = [1, 1]} : vector<2x128xf32> to vector<2x32xf32>
    %109 = vector.extract_strided_slice %106 {offsets = [0, 32], sizes = [2, 32], strides = [1, 1]} : vector<2x128xf32> to vector<2x32xf32>
    %110 = vector.extract_strided_slice %107 {offsets = [0, 64], sizes = [2, 32], strides = [1, 1]} : vector<2x128xf32> to vector<2x32xf32>
    %111 = vector.extract_strided_slice %106 {offsets = [0, 96], sizes = [2, 32], strides = [1, 1]} : vector<2x128xf32> to vector<2x32xf32>
    %112 = arith.mulf %109, %92 : vector<2x32xf32>
    %113 = arith.mulf %108, %110 : vector<2x32xf32>
    %114 = arith.addf %112, %113 : vector<2x32xf32>
    %115 = math.tanh %114 : vector<2x32xf32>
    %116 = arith.mulf %111, %115 : vector<2x32xf32>
    %c3 = arith.constant 3 : index
    %c0_38 = arith.constant 0 : index
    %c0_39 = arith.constant 0 : index
    %117 = vector.load %arg2[%c3, %c0_38, %c0_39] : memref<8x2x32xf32, #tpu.memory_space<vmem>>, vector<1x2x32xf32>
    %118 = vector.shape_cast %117 : vector<1x2x32xf32> to vector<2x32xf32>
    %cst_40 = arith.constant 5.000000e-01 : f32
    %119 = vector.broadcast %cst_40 : f32 to vector<2x32xf32>
    %120 = arith.cmpf ogt, %118, %119 : vector<2x32xf32>
    %121 = arith.select %120, %116, %91 : vector<2x32xi1>, vector<2x32xf32>
    %122 = arith.select %120, %114, %92 : vector<2x32xi1>, vector<2x32xf32>
    %cst_41 = arith.constant 0.000000e+00 : f32
    %123 = vector.broadcast %cst_41 : f32 to vector<2x32xf32>
    %124 = arith.select %120, %121, %123 : vector<2x32xi1>, vector<2x32xf32>
    %125 = vector.extract_strided_slice %124 {offsets = [0, 0], sizes = [2, 16], strides = [1, 1]} : vector<2x32xf32> to vector<2x16xf32>
    %c6 = arith.constant 6 : index
    %c0_42 = arith.constant 0 : index
    %126 = vector.load %arg11[%c6, %c0_42] : memref<16x16xf32, #tpu.memory_space<vmem>>, vector<2x16xf32>
    tpu.vector_store %arg11[%c6, %c0_42], %125 {strides = array<i32>} : memref<16x16xf32, #tpu.memory_space<vmem>>, vector<2x16xf32>,
    %127 = vector.extract_strided_slice %124 {offsets = [0, 16], sizes = [2, 16], strides = [1, 1]} : vector<2x32xf32> to vector<2x16xf32>
    %c8 = arith.constant 8 : index
    %c0_43 = arith.constant 0 : index
    %128 = vector.load %arg12[%c8, %c0_43] : memref<16x16xf32, #tpu.memory_space<vmem>>, vector<2x16xf32>
    tpu.vector_store %arg12[%c8, %c0_43], %127 {strides = array<i32>} : memref<16x16xf32, #tpu.memory_space<vmem>>, vector<2x16xf32>,
    %129 = vector.extract_strided_slice %5 {offsets = [8, 0], sizes = [2, 128], strides = [1, 1]} : vector<16x128xf32> to vector<2x128xf32>
    %cst_44 = arith.constant dense<0.000000e+00> : vector<2x128xf32>
    %130 = tpu.matmul %121, %6, %cst_44 {dimension_numbers = #tpu.dot_dimension_numbers<[1], [0], [0], [1], [0, 0, 1, 1], [], []>} : vector<2x32xf32>, vector<32x128xf32>, vector<2x128xf32> -> vector<2x128xf32>
    %131 = arith.addf %129, %130 : vector<2x128xf32>
    %132 = arith.negf %131 : vector<2x128xf32>
    %133 = math.exp %132 : vector<2x128xf32>
    %cst_45 = arith.constant 1.000000e+00 : f32
    %134 = vector.broadcast %cst_45 : f32 to vector<2x128xf32>
    %135 = arith.addf %134, %133 : vector<2x128xf32>
    %136 = arith.divf %134, %135 : vector<2x128xf32>
    %137 = math.tanh %131 : vector<2x128xf32>
    %138 = vector.extract_strided_slice %136 {offsets = [0, 0], sizes = [2, 32], strides = [1, 1]} : vector<2x128xf32> to vector<2x32xf32>
    %139 = vector.extract_strided_slice %136 {offsets = [0, 32], sizes = [2, 32], strides = [1, 1]} : vector<2x128xf32> to vector<2x32xf32>
    %140 = vector.extract_strided_slice %137 {offsets = [0, 64], sizes = [2, 32], strides = [1, 1]} : vector<2x128xf32> to vector<2x32xf32>
    %141 = vector.extract_strided_slice %136 {offsets = [0, 96], sizes = [2, 32], strides = [1, 1]} : vector<2x128xf32> to vector<2x32xf32>
    %142 = arith.mulf %139, %122 : vector<2x32xf32>
    %143 = arith.mulf %138, %140 : vector<2x32xf32>
    %144 = arith.addf %142, %143 : vector<2x32xf32>
    %145 = math.tanh %144 : vector<2x32xf32>
    %146 = arith.mulf %141, %145 : vector<2x32xf32>
    %c4_46 = arith.constant 4 : index
    %c0_47 = arith.constant 0 : index
    %c0_48 = arith.constant 0 : index
    %147 = vector.load %arg2[%c4_46, %c0_47, %c0_48] : memref<8x2x32xf32, #tpu.memory_space<vmem>>, vector<1x2x32xf32>
    %148 = vector.shape_cast %147 : vector<1x2x32xf32> to vector<2x32xf32>
    %cst_49 = arith.constant 5.000000e-01 : f32
    %149 = vector.broadcast %cst_49 : f32 to vector<2x32xf32>
    %150 = arith.cmpf ogt, %148, %149 : vector<2x32xf32>
    %151 = arith.select %150, %146, %121 : vector<2x32xi1>, vector<2x32xf32>
    %152 = arith.select %150, %144, %122 : vector<2x32xi1>, vector<2x32xf32>
    %cst_50 = arith.constant 0.000000e+00 : f32
    %153 = vector.broadcast %cst_50 : f32 to vector<2x32xf32>
    %154 = arith.select %150, %151, %153 : vector<2x32xi1>, vector<2x32xf32>
    %155 = vector.extract_strided_slice %154 {offsets = [0, 0], sizes = [2, 16], strides = [1, 1]} : vector<2x32xf32> to vector<2x16xf32>
    %c8_51 = arith.constant 8 : index
    %c0_52 = arith.constant 0 : index
    %156 = vector.load %arg11[%c8_51, %c0_52] : memref<16x16xf32, #tpu.memory_space<vmem>>, vector<2x16xf32>
    tpu.vector_store %arg11[%c8_51, %c0_52], %155 {strides = array<i32>} : memref<16x16xf32, #tpu.memory_space<vmem>>, vector<2x16xf32>,
    %157 = vector.extract_strided_slice %154 {offsets = [0, 16], sizes = [2, 16], strides = [1, 1]} : vector<2x32xf32> to vector<2x16xf32>
    %c6_53 = arith.constant 6 : index
    %c0_54 = arith.constant 0 : index
    %158 = vector.load %arg12[%c6_53, %c0_54] : memref<16x16xf32, #tpu.memory_space<vmem>>, vector<2x16xf32>
    tpu.vector_store %arg12[%c6_53, %c0_54], %157 {strides = array<i32>} : memref<16x16xf32, #tpu.memory_space<vmem>>, vector<2x16xf32>,
    %159 = vector.extract_strided_slice %5 {offsets = [10, 0], sizes = [2, 128], strides = [1, 1]} : vector<16x128xf32> to vector<2x128xf32>
    %cst_55 = arith.constant dense<0.000000e+00> : vector<2x128xf32>
    %160 = tpu.matmul %151, %6, %cst_55 {dimension_numbers = #tpu.dot_dimension_numbers<[1], [0], [0], [1], [0, 0, 1, 1], [], []>} : vector<2x32xf32>, vector<32x128xf32>, vector<2x128xf32> -> vector<2x128xf32>
    %161 = arith.addf %159, %160 : vector<2x128xf32>
    %162 = arith.negf %161 : vector<2x128xf32>
    %163 = math.exp %162 : vector<2x128xf32>
    %cst_56 = arith.constant 1.000000e+00 : f32
    %164 = vector.broadcast %cst_56 : f32 to vector<2x128xf32>
    %165 = arith.addf %164, %163 : vector<2x128xf32>
    %166 = arith.divf %164, %165 : vector<2x128xf32>
    %167 = math.tanh %161 : vector<2x128xf32>
    %168 = vector.extract_strided_slice %166 {offsets = [0, 0], sizes = [2, 32], strides = [1, 1]} : vector<2x128xf32> to vector<2x32xf32>
    %169 = vector.extract_strided_slice %166 {offsets = [0, 32], sizes = [2, 32], strides = [1, 1]} : vector<2x128xf32> to vector<2x32xf32>
    %170 = vector.extract_strided_slice %167 {offsets = [0, 64], sizes = [2, 32], strides = [1, 1]} : vector<2x128xf32> to vector<2x32xf32>
    %171 = vector.extract_strided_slice %166 {offsets = [0, 96], sizes = [2, 32], strides = [1, 1]} : vector<2x128xf32> to vector<2x32xf32>
    %172 = arith.mulf %169, %152 : vector<2x32xf32>
    %173 = arith.mulf %168, %170 : vector<2x32xf32>
    %174 = arith.addf %172, %173 : vector<2x32xf32>
    %175 = math.tanh %174 : vector<2x32xf32>
    %176 = arith.mulf %171, %175 : vector<2x32xf32>
    %c5 = arith.constant 5 : index
    %c0_57 = arith.constant 0 : index
    %c0_58 = arith.constant 0 : index
    %177 = vector.load %arg2[%c5, %c0_57, %c0_58] : memref<8x2x32xf32, #tpu.memory_space<vmem>>, vector<1x2x32xf32>
    %178 = vector.shape_cast %177 : vector<1x2x32xf32> to vector<2x32xf32>
    %cst_59 = arith.constant 5.000000e-01 : f32
    %179 = vector.broadcast %cst_59 : f32 to vector<2x32xf32>
    %180 = arith.cmpf ogt, %178, %179 : vector<2x32xf32>
    %181 = arith.select %180, %176, %151 : vector<2x32xi1>, vector<2x32xf32>
    %182 = arith.select %180, %174, %152 : vector<2x32xi1>, vector<2x32xf32>
    %cst_60 = arith.constant 0.000000e+00 : f32
    %183 = vector.broadcast %cst_60 : f32 to vector<2x32xf32>
    %184 = arith.select %180, %181, %183 : vector<2x32xi1>, vector<2x32xf32>
    %185 = vector.extract_strided_slice %184 {offsets = [0, 0], sizes = [2, 16], strides = [1, 1]} : vector<2x32xf32> to vector<2x16xf32>
    %c10_61 = arith.constant 10 : index
    %c0_62 = arith.constant 0 : index
    %186 = vector.load %arg11[%c10_61, %c0_62] : memref<16x16xf32, #tpu.memory_space<vmem>>, vector<2x16xf32>
    tpu.vector_store %arg11[%c10_61, %c0_62], %185 {strides = array<i32>} : memref<16x16xf32, #tpu.memory_space<vmem>>, vector<2x16xf32>,
    %187 = vector.extract_strided_slice %184 {offsets = [0, 16], sizes = [2, 16], strides = [1, 1]} : vector<2x32xf32> to vector<2x16xf32>
    %c4_63 = arith.constant 4 : index
    %c0_64 = arith.constant 0 : index
    %188 = vector.load %arg12[%c4_63, %c0_64] : memref<16x16xf32, #tpu.memory_space<vmem>>, vector<2x16xf32>
    tpu.vector_store %arg12[%c4_63, %c0_64], %187 {strides = array<i32>} : memref<16x16xf32, #tpu.memory_space<vmem>>, vector<2x16xf32>,
    %189 = vector.extract_strided_slice %5 {offsets = [12, 0], sizes = [2, 128], strides = [1, 1]} : vector<16x128xf32> to vector<2x128xf32>
    %cst_65 = arith.constant dense<0.000000e+00> : vector<2x128xf32>
    %190 = tpu.matmul %181, %6, %cst_65 {dimension_numbers = #tpu.dot_dimension_numbers<[1], [0], [0], [1], [0, 0, 1, 1], [], []>} : vector<2x32xf32>, vector<32x128xf32>, vector<2x128xf32> -> vector<2x128xf32>
    %191 = arith.addf %189, %190 : vector<2x128xf32>
    %192 = arith.negf %191 : vector<2x128xf32>
    %193 = math.exp %192 : vector<2x128xf32>
    %cst_66 = arith.constant 1.000000e+00 : f32
    %194 = vector.broadcast %cst_66 : f32 to vector<2x128xf32>
    %195 = arith.addf %194, %193 : vector<2x128xf32>
    %196 = arith.divf %194, %195 : vector<2x128xf32>
    %197 = math.tanh %191 : vector<2x128xf32>
    %198 = vector.extract_strided_slice %196 {offsets = [0, 0], sizes = [2, 32], strides = [1, 1]} : vector<2x128xf32> to vector<2x32xf32>
    %199 = vector.extract_strided_slice %196 {offsets = [0, 32], sizes = [2, 32], strides = [1, 1]} : vector<2x128xf32> to vector<2x32xf32>
    %200 = vector.extract_strided_slice %197 {offsets = [0, 64], sizes = [2, 32], strides = [1, 1]} : vector<2x128xf32> to vector<2x32xf32>
    %201 = vector.extract_strided_slice %196 {offsets = [0, 96], sizes = [2, 32], strides = [1, 1]} : vector<2x128xf32> to vector<2x32xf32>
    %202 = arith.mulf %199, %182 : vector<2x32xf32>
    %203 = arith.mulf %198, %200 : vector<2x32xf32>
    %204 = arith.addf %202, %203 : vector<2x32xf32>
    %205 = math.tanh %204 : vector<2x32xf32>
    %206 = arith.mulf %201, %205 : vector<2x32xf32>
    %c6_67 = arith.constant 6 : index
    %c0_68 = arith.constant 0 : index
    %c0_69 = arith.constant 0 : index
    %207 = vector.load %arg2[%c6_67, %c0_68, %c0_69] : memref<8x2x32xf32, #tpu.memory_space<vmem>>, vector<1x2x32xf32>
    %208 = vector.shape_cast %207 : vector<1x2x32xf32> to vector<2x32xf32>
    %cst_70 = arith.constant 5.000000e-01 : f32
    %209 = vector.broadcast %cst_70 : f32 to vector<2x32xf32>
    %210 = arith.cmpf ogt, %208, %209 : vector<2x32xf32>
    %211 = arith.select %210, %206, %181 : vector<2x32xi1>, vector<2x32xf32>
    %212 = arith.select %210, %204, %182 : vector<2x32xi1>, vector<2x32xf32>
    %cst_71 = arith.constant 0.000000e+00 : f32
    %213 = vector.broadcast %cst_71 : f32 to vector<2x32xf32>
    %214 = arith.select %210, %211, %213 : vector<2x32xi1>, vector<2x32xf32>
    %215 = vector.extract_strided_slice %214 {offsets = [0, 0], sizes = [2, 16], strides = [1, 1]} : vector<2x32xf32> to vector<2x16xf32>
    %c12_72 = arith.constant 12 : index
    %c0_73 = arith.constant 0 : index
    %216 = vector.load %arg11[%c12_72, %c0_73] : memref<16x16xf32, #tpu.memory_space<vmem>>, vector<2x16xf32>
    tpu.vector_store %arg11[%c12_72, %c0_73], %215 {strides = array<i32>} : memref<16x16xf32, #tpu.memory_space<vmem>>, vector<2x16xf32>,
    %217 = vector.extract_strided_slice %214 {offsets = [0, 16], sizes = [2, 16], strides = [1, 1]} : vector<2x32xf32> to vector<2x16xf32>
    %c2_74 = arith.constant 2 : index
    %c0_75 = arith.constant 0 : index
    %218 = vector.load %arg12[%c2_74, %c0_75] : memref<16x16xf32, #tpu.memory_space<vmem>>, vector<2x16xf32>
    tpu.vector_store %arg12[%c2_74, %c0_75], %217 {strides = array<i32>} : memref<16x16xf32, #tpu.memory_space<vmem>>, vector<2x16xf32>,
    %219 = vector.extract_strided_slice %5 {offsets = [14, 0], sizes = [2, 128], strides = [1, 1]} : vector<16x128xf32> to vector<2x128xf32>
    %cst_76 = arith.constant dense<0.000000e+00> : vector<2x128xf32>
    %220 = tpu.matmul %211, %6, %cst_76 {dimension_numbers = #tpu.dot_dimension_numbers<[1], [0], [0], [1], [0, 0, 1, 1], [], []>} : vector<2x32xf32>, vector<32x128xf32>, vector<2x128xf32> -> vector<2x128xf32>
    %221 = arith.addf %219, %220 : vector<2x128xf32>
    %222 = arith.negf %221 : vector<2x128xf32>
    %223 = math.exp %222 : vector<2x128xf32>
    %cst_77 = arith.constant 1.000000e+00 : f32
    %224 = vector.broadcast %cst_77 : f32 to vector<2x128xf32>
    %225 = arith.addf %224, %223 : vector<2x128xf32>
    %226 = arith.divf %224, %225 : vector<2x128xf32>
    %227 = math.tanh %221 : vector<2x128xf32>
    %228 = vector.extract_strided_slice %226 {offsets = [0, 0], sizes = [2, 32], strides = [1, 1]} : vector<2x128xf32> to vector<2x32xf32>
    %229 = vector.extract_strided_slice %226 {offsets = [0, 32], sizes = [2, 32], strides = [1, 1]} : vector<2x128xf32> to vector<2x32xf32>
    %230 = vector.extract_strided_slice %227 {offsets = [0, 64], sizes = [2, 32], strides = [1, 1]} : vector<2x128xf32> to vector<2x32xf32>
    %231 = vector.extract_strided_slice %226 {offsets = [0, 96], sizes = [2, 32], strides = [1, 1]} : vector<2x128xf32> to vector<2x32xf32>
    %232 = arith.mulf %229, %212 : vector<2x32xf32>
    %233 = arith.mulf %228, %230 : vector<2x32xf32>
    %234 = arith.addf %232, %233 : vector<2x32xf32>
    %235 = math.tanh %234 : vector<2x32xf32>
    %236 = arith.mulf %231, %235 : vector<2x32xf32>
    %c7 = arith.constant 7 : index
    %c0_78 = arith.constant 0 : index
    %c0_79 = arith.constant 0 : index
    %237 = vector.load %arg2[%c7, %c0_78, %c0_79] : memref<8x2x32xf32, #tpu.memory_space<vmem>>, vector<1x2x32xf32>
    %238 = vector.shape_cast %237 : vector<1x2x32xf32> to vector<2x32xf32>
    %cst_80 = arith.constant 5.000000e-01 : f32
    %239 = vector.broadcast %cst_80 : f32 to vector<2x32xf32>
    %240 = arith.cmpf ogt, %238, %239 : vector<2x32xf32>
    %241 = arith.select %240, %236, %211 : vector<2x32xi1>, vector<2x32xf32>
    %cst_81 = arith.constant 0.000000e+00 : f32
    %242 = vector.broadcast %cst_81 : f32 to vector<2x32xf32>
    %243 = arith.select %240, %241, %242 : vector<2x32xi1>, vector<2x32xf32>
    %244 = vector.extract_strided_slice %243 {offsets = [0, 0], sizes = [2, 16], strides = [1, 1]} : vector<2x32xf32> to vector<2x16xf32>
    %c14_82 = arith.constant 14 : index
    %c0_83 = arith.constant 0 : index
    %245 = vector.load %arg11[%c14_82, %c0_83] : memref<16x16xf32, #tpu.memory_space<vmem>>, vector<2x16xf32>
    tpu.vector_store %arg11[%c14_82, %c0_83], %244 {strides = array<i32>} : memref<16x16xf32, #tpu.memory_space<vmem>>, vector<2x16xf32>,
    %246 = vector.extract_strided_slice %243 {offsets = [0, 16], sizes = [2, 16], strides = [1, 1]} : vector<2x32xf32> to vector<2x16xf32>
    %c0_84 = arith.constant 0 : index
    %c0_85 = arith.constant 0 : index
    %247 = vector.load %arg12[%c0_84, %c0_85] : memref<16x16xf32, #tpu.memory_space<vmem>>, vector<2x16xf32>
    tpu.vector_store %arg12[%c0_84, %c0_85], %246 {strides = array<i32>} : memref<16x16xf32, #tpu.memory_space<vmem>>, vector<2x16xf32>,
    %c0_86 = arith.constant 0 : index
    %c0_87 = arith.constant 0 : index
    %248 = vector.load %arg7[%c0_86, %c0_87] : memref<32x12xf32, #tpu.memory_space<vmem>>, vector<32x12xf32>
    %c0_88 = arith.constant 0 : index
    %c0_89 = arith.constant 0 : index
    %249 = vector.load %arg11[%c0_88, %c0_89] : memref<16x16xf32, #tpu.memory_space<vmem>>, vector<16x16xf32>
    %250 = vector.extract_strided_slice %248 {offsets = [0, 0], sizes = [16, 12], strides = [1, 1]} : vector<32x12xf32> to vector<16x12xf32>
    %cst_90 = arith.constant dense<0.000000e+00> : vector<16x12xf32>
    %251 = tpu.matmul %249, %250, %cst_90 {dimension_numbers = #tpu.dot_dimension_numbers<[1], [0], [0], [1], [0, 0, 1, 1], [], []>} : vector<16x16xf32>, vector<16x12xf32>, vector<16x12xf32> -> vector<16x12xf32>
    %c0_91 = arith.constant 0 : index
    %c0_92 = arith.constant 0 : index
    %252 = vector.load %arg12[%c0_91, %c0_92] : memref<16x16xf32, #tpu.memory_space<vmem>>, vector<16x16xf32>
    %253 = vector.extract_strided_slice %248 {offsets = [16, 0], sizes = [16, 12], strides = [1, 1]} : vector<32x12xf32> to vector<16x12xf32>
    %cst_93 = arith.constant dense<0.000000e+00> : vector<16x12xf32>
    %254 = tpu.matmul %252, %253, %cst_93 {dimension_numbers = #tpu.dot_dimension_numbers<[1], [0], [0], [1], [0, 0, 1, 1], [], []>} : vector<16x16xf32>, vector<16x12xf32>, vector<16x12xf32> -> vector<16x12xf32>
    %255 = arith.addf %251, %254 : vector<16x12xf32>
    %c0_94 = arith.constant 0 : index
    %c0_95 = arith.constant 0 : index
    %256 = vector.load %arg8[%c0_94, %c0_95] : memref<1x12xf32, #tpu.memory_space<vmem>>, vector<1x12xf32>
    %257 = vector.broadcast %256 : vector<1x12xf32> to vector<16x12xf32>
    %258 = arith.addf %255, %257 : vector<16x12xf32>
    %c0_96 = arith.constant 0 : index
    %c0_97 = arith.constant 0 : index
    %259 = vector.load %arg9[%c0_96, %c0_97] : memref<12x12xf32, #tpu.memory_space<vmem>>, vector<12x12xf32>
    %260 = vector.extract_strided_slice %258 {offsets = [0, 0], sizes = [2, 12], strides = [1, 1]} : vector<16x12xf32> to vector<2x12xf32>
    %261 = vector.extract_strided_slice %259 {offsets = [10, 0], sizes = [1, 12], strides = [1, 1]} : vector<12x12xf32> to vector<1x12xf32>
    %262 = vector.broadcast %261 : vector<1x12xf32> to vector<2x12xf32>
    %263 = arith.addf %260, %262 : vector<2x12xf32>
    %264 = vector.extract_strided_slice %258 {offsets = [2, 0], sizes = [2, 12], strides = [1, 1]} : vector<16x12xf32> to vector<2x12xf32>
    %265 = vector.shape_cast %264 : vector<2x12xf32> to vector<2x1x12xf32>
    %266 = vector.shape_cast %259 : vector<12x12xf32> to vector<1x12x12xf32>
    %267 = vector.broadcast %265 : vector<2x1x12xf32> to vector<2x12x12xf32>
    %268 = vector.broadcast %266 : vector<1x12x12xf32> to vector<2x12x12xf32>
    %269 = arith.addf %267, %268 : vector<2x12x12xf32>
    %270 = vector.shape_cast %263 : vector<2x12xf32> to vector<2x12x1xf32>
    %271 = vector.broadcast %270 : vector<2x12x1xf32> to vector<2x12x12xf32>
    %272 = arith.addf %269, %271 : vector<2x12x12xf32>
    %cst_98 = arith.constant dense<0xFF800000> : vector<2x12xf32>
    %273 = vector.multi_reduction <maximumf>, %272, %cst_98 [1] : vector<2x12x12xf32> to vector<2x12xf32>
    %274 = tpu.iota {dimensions = array<i32: 1>} : vector<2x12x12xi32>
    %275 = vector.shape_cast %273 : vector<2x12xf32> to vector<2x1x12xf32>
    %276 = vector.broadcast %275 : vector<2x1x12xf32> to vector<2x12x12xf32>
    %277 = arith.cmpf oge, %272, %276 : vector<2x12x12xf32>
    %c13_i32 = arith.constant 13 : i32
    %278 = vector.broadcast %c13_i32 : i32 to vector<2x12x12xi32>
    %279 = arith.select %277, %274, %278 : vector<2x12x12xi1>, vector<2x12x12xi32>
    %cst_99 = arith.constant dense<2147483647> : vector<2x12xi32>
    %280 = vector.multi_reduction <minsi>, %279, %cst_99 [1] : vector<2x12x12xi32> to vector<2x12xi32>
    %c1_100 = arith.constant 1 : index
    %c0_101 = arith.constant 0 : index
    %c0_102 = arith.constant 0 : index
    %281 = vector.load %arg2[%c1_100, %c0_101, %c0_102] : memref<8x2x32xf32, #tpu.memory_space<vmem>>, vector<1x2x32xf32>
    %282 = vector.shape_cast %281 : vector<1x2x32xf32> to vector<2x32xf32>
    %283 = vector.extract_strided_slice %282 {offsets = [0, 0], sizes = [2, 1], strides = [1, 1]} : vector<2x32xf32> to vector<2x1xf32>
    %cst_103 = arith.constant 5.000000e-01 : f32
    %284 = vector.broadcast %cst_103 : f32 to vector<2x1xf32>
    %285 = arith.cmpf ogt, %283, %284 : vector<2x1xf32>
    %c0_i32 = arith.constant 0 : i32
    %286 = vector.shape_cast %285 : vector<2x1xi1> to vector<2x1xi1>
    %287 = vector.broadcast %286 : vector<2x1xi1> to vector<2x12xi1>
    %288 = vector.broadcast %c0_i32 : i32 to vector<2x12xi32>
    %289 = arith.select %287, %280, %288 : vector<2x12xi1>, vector<2x12xi32>
    %290 = vector.shape_cast %285 : vector<2x1xi1> to vector<2x1xi1>
    %291 = vector.broadcast %290 : vector<2x1xi1> to vector<2x12xi1>
    %292 = arith.select %291, %273, %263 : vector<2x12xi1>, vector<2x12xf32>
    %293 = vector.extract_strided_slice %258 {offsets = [4, 0], sizes = [2, 12], strides = [1, 1]} : vector<16x12xf32> to vector<2x12xf32>
    %294 = vector.shape_cast %293 : vector<2x12xf32> to vector<2x1x12xf32>
    %295 = vector.shape_cast %259 : vector<12x12xf32> to vector<1x12x12xf32>
    %296 = vector.broadcast %294 : vector<2x1x12xf32> to vector<2x12x12xf32>
    %297 = vector.broadcast %295 : vector<1x12x12xf32> to vector<2x12x12xf32>
    %298 = arith.addf %296, %297 : vector<2x12x12xf32>
    %299 = vector.shape_cast %273 : vector<2x12xf32> to vector<2x12x1xf32>
    %300 = vector.broadcast %299 : vector<2x12x1xf32> to vector<2x12x12xf32>
    %301 = arith.addf %298, %300 : vector<2x12x12xf32>
    %cst_104 = arith.constant dense<0xFF800000> : vector<2x12xf32>
    %302 = vector.multi_reduction <maximumf>, %301, %cst_104 [1] : vector<2x12x12xf32> to vector<2x12xf32>
    %303 = tpu.iota {dimensions = array<i32: 1>} : vector<2x12x12xi32>
    %304 = vector.shape_cast %302 : vector<2x12xf32> to vector<2x1x12xf32>
    %305 = vector.broadcast %304 : vector<2x1x12xf32> to vector<2x12x12xf32>
    %306 = arith.cmpf oge, %301, %305 : vector<2x12x12xf32>
    %c13_i32_105 = arith.constant 13 : i32
    %307 = vector.broadcast %c13_i32_105 : i32 to vector<2x12x12xi32>
    %308 = arith.select %306, %303, %307 : vector<2x12x12xi1>, vector<2x12x12xi32>
    %cst_106 = arith.constant dense<2147483647> : vector<2x12xi32>
    %309 = vector.multi_reduction <minsi>, %308, %cst_106 [1] : vector<2x12x12xi32> to vector<2x12xi32>
    %c2_107 = arith.constant 2 : index
    %c0_108 = arith.constant 0 : index
    %c0_109 = arith.constant 0 : index
    %310 = vector.load %arg2[%c2_107, %c0_108, %c0_109] : memref<8x2x32xf32, #tpu.memory_space<vmem>>, vector<1x2x32xf32>
    %311 = vector.shape_cast %310 : vector<1x2x32xf32> to vector<2x32xf32>
    %312 = vector.extract_strided_slice %311 {offsets = [0, 0], sizes = [2, 1], strides = [1, 1]} : vector<2x32xf32> to vector<2x1xf32>
    %cst_110 = arith.constant 5.000000e-01 : f32
    %313 = vector.broadcast %cst_110 : f32 to vector<2x1xf32>
    %314 = arith.cmpf ogt, %312, %313 : vector<2x1xf32>
    %c0_i32_111 = arith.constant 0 : i32
    %315 = vector.shape_cast %314 : vector<2x1xi1> to vector<2x1xi1>
    %316 = vector.broadcast %315 : vector<2x1xi1> to vector<2x12xi1>
    %317 = vector.broadcast %c0_i32_111 : i32 to vector<2x12xi32>
    %318 = arith.select %316, %309, %317 : vector<2x12xi1>, vector<2x12xi32>
    %319 = vector.shape_cast %314 : vector<2x1xi1> to vector<2x1xi1>
    %320 = vector.broadcast %319 : vector<2x1xi1> to vector<2x12xi1>
    %321 = arith.select %320, %302, %292 : vector<2x12xi1>, vector<2x12xf32>
    %322 = vector.extract_strided_slice %258 {offsets = [6, 0], sizes = [2, 12], strides = [1, 1]} : vector<16x12xf32> to vector<2x12xf32>
    %323 = vector.shape_cast %322 : vector<2x12xf32> to vector<2x1x12xf32>
    %324 = vector.shape_cast %259 : vector<12x12xf32> to vector<1x12x12xf32>
    %325 = vector.broadcast %323 : vector<2x1x12xf32> to vector<2x12x12xf32>
    %326 = vector.broadcast %324 : vector<1x12x12xf32> to vector<2x12x12xf32>
    %327 = arith.addf %325, %326 : vector<2x12x12xf32>
    %328 = vector.shape_cast %302 : vector<2x12xf32> to vector<2x12x1xf32>
    %329 = vector.broadcast %328 : vector<2x12x1xf32> to vector<2x12x12xf32>
    %330 = arith.addf %327, %329 : vector<2x12x12xf32>
    %cst_112 = arith.constant dense<0xFF800000> : vector<2x12xf32>
    %331 = vector.multi_reduction <maximumf>, %330, %cst_112 [1] : vector<2x12x12xf32> to vector<2x12xf32>
    %332 = tpu.iota {dimensions = array<i32: 1>} : vector<2x12x12xi32>
    %333 = vector.shape_cast %331 : vector<2x12xf32> to vector<2x1x12xf32>
    %334 = vector.broadcast %333 : vector<2x1x12xf32> to vector<2x12x12xf32>
    %335 = arith.cmpf oge, %330, %334 : vector<2x12x12xf32>
    %c13_i32_113 = arith.constant 13 : i32
    %336 = vector.broadcast %c13_i32_113 : i32 to vector<2x12x12xi32>
    %337 = arith.select %335, %332, %336 : vector<2x12x12xi1>, vector<2x12x12xi32>
    %cst_114 = arith.constant dense<2147483647> : vector<2x12xi32>
    %338 = vector.multi_reduction <minsi>, %337, %cst_114 [1] : vector<2x12x12xi32> to vector<2x12xi32>
    %c3_115 = arith.constant 3 : index
    %c0_116 = arith.constant 0 : index
    %c0_117 = arith.constant 0 : index
    %339 = vector.load %arg2[%c3_115, %c0_116, %c0_117] : memref<8x2x32xf32, #tpu.memory_space<vmem>>, vector<1x2x32xf32>
    %340 = vector.shape_cast %339 : vector<1x2x32xf32> to vector<2x32xf32>
    %341 = vector.extract_strided_slice %340 {offsets = [0, 0], sizes = [2, 1], strides = [1, 1]} : vector<2x32xf32> to vector<2x1xf32>
    %cst_118 = arith.constant 5.000000e-01 : f32
    %342 = vector.broadcast %cst_118 : f32 to vector<2x1xf32>
    %343 = arith.cmpf ogt, %341, %342 : vector<2x1xf32>
    %c0_i32_119 = arith.constant 0 : i32
    %344 = vector.shape_cast %343 : vector<2x1xi1> to vector<2x1xi1>
    %345 = vector.broadcast %344 : vector<2x1xi1> to vector<2x12xi1>
    %346 = vector.broadcast %c0_i32_119 : i32 to vector<2x12xi32>
    %347 = arith.select %345, %338, %346 : vector<2x12xi1>, vector<2x12xi32>
    %348 = vector.shape_cast %343 : vector<2x1xi1> to vector<2x1xi1>
    %349 = vector.broadcast %348 : vector<2x1xi1> to vector<2x12xi1>
    %350 = arith.select %349, %331, %321 : vector<2x12xi1>, vector<2x12xf32>
    %351 = vector.extract_strided_slice %258 {offsets = [8, 0], sizes = [2, 12], strides = [1, 1]} : vector<16x12xf32> to vector<2x12xf32>
    %352 = vector.shape_cast %351 : vector<2x12xf32> to vector<2x1x12xf32>
    %353 = vector.shape_cast %259 : vector<12x12xf32> to vector<1x12x12xf32>
    %354 = vector.broadcast %352 : vector<2x1x12xf32> to vector<2x12x12xf32>
    %355 = vector.broadcast %353 : vector<1x12x12xf32> to vector<2x12x12xf32>
    %356 = arith.addf %354, %355 : vector<2x12x12xf32>
    %357 = vector.shape_cast %331 : vector<2x12xf32> to vector<2x12x1xf32>
    %358 = vector.broadcast %357 : vector<2x12x1xf32> to vector<2x12x12xf32>
    %359 = arith.addf %356, %358 : vector<2x12x12xf32>
    %cst_120 = arith.constant dense<0xFF800000> : vector<2x12xf32>
    %360 = vector.multi_reduction <maximumf>, %359, %cst_120 [1] : vector<2x12x12xf32> to vector<2x12xf32>
    %361 = tpu.iota {dimensions = array<i32: 1>} : vector<2x12x12xi32>
    %362 = vector.shape_cast %360 : vector<2x12xf32> to vector<2x1x12xf32>
    %363 = vector.broadcast %362 : vector<2x1x12xf32> to vector<2x12x12xf32>
    %364 = arith.cmpf oge, %359, %363 : vector<2x12x12xf32>
    %c13_i32_121 = arith.constant 13 : i32
    %365 = vector.broadcast %c13_i32_121 : i32 to vector<2x12x12xi32>
    %366 = arith.select %364, %361, %365 : vector<2x12x12xi1>, vector<2x12x12xi32>
    %cst_122 = arith.constant dense<2147483647> : vector<2x12xi32>
    %367 = vector.multi_reduction <minsi>, %366, %cst_122 [1] : vector<2x12x12xi32> to vector<2x12xi32>
    %c4_123 = arith.constant 4 : index
    %c0_124 = arith.constant 0 : index
    %c0_125 = arith.constant 0 : index
    %368 = vector.load %arg2[%c4_123, %c0_124, %c0_125] : memref<8x2x32xf32, #tpu.memory_space<vmem>>, vector<1x2x32xf32>
    %369 = vector.shape_cast %368 : vector<1x2x32xf32> to vector<2x32xf32>
    %370 = vector.extract_strided_slice %369 {offsets = [0, 0], sizes = [2, 1], strides = [1, 1]} : vector<2x32xf32> to vector<2x1xf32>
    %cst_126 = arith.constant 5.000000e-01 : f32
    %371 = vector.broadcast %cst_126 : f32 to vector<2x1xf32>
    %372 = arith.cmpf ogt, %370, %371 : vector<2x1xf32>
    %c0_i32_127 = arith.constant 0 : i32
    %373 = vector.shape_cast %372 : vector<2x1xi1> to vector<2x1xi1>
    %374 = vector.broadcast %373 : vector<2x1xi1> to vector<2x12xi1>
    %375 = vector.broadcast %c0_i32_127 : i32 to vector<2x12xi32>
    %376 = arith.select %374, %367, %375 : vector<2x12xi1>, vector<2x12xi32>
    %377 = vector.shape_cast %372 : vector<2x1xi1> to vector<2x1xi1>
    %378 = vector.broadcast %377 : vector<2x1xi1> to vector<2x12xi1>
    %379 = arith.select %378, %360, %350 : vector<2x12xi1>, vector<2x12xf32>
    %380 = vector.extract_strided_slice %258 {offsets = [10, 0], sizes = [2, 12], strides = [1, 1]} : vector<16x12xf32> to vector<2x12xf32>
    %381 = vector.shape_cast %380 : vector<2x12xf32> to vector<2x1x12xf32>
    %382 = vector.shape_cast %259 : vector<12x12xf32> to vector<1x12x12xf32>
    %383 = vector.broadcast %381 : vector<2x1x12xf32> to vector<2x12x12xf32>
    %384 = vector.broadcast %382 : vector<1x12x12xf32> to vector<2x12x12xf32>
    %385 = arith.addf %383, %384 : vector<2x12x12xf32>
    %386 = vector.shape_cast %360 : vector<2x12xf32> to vector<2x12x1xf32>
    %387 = vector.broadcast %386 : vector<2x12x1xf32> to vector<2x12x12xf32>
    %388 = arith.addf %385, %387 : vector<2x12x12xf32>
    %cst_128 = arith.constant dense<0xFF800000> : vector<2x12xf32>
    %389 = vector.multi_reduction <maximumf>, %388, %cst_128 [1] : vector<2x12x12xf32> to vector<2x12xf32>
    %390 = tpu.iota {dimensions = array<i32: 1>} : vector<2x12x12xi32>
    %391 = vector.shape_cast %389 : vector<2x12xf32> to vector<2x1x12xf32>
    %392 = vector.broadcast %391 : vector<2x1x12xf32> to vector<2x12x12xf32>
    %393 = arith.cmpf oge, %388, %392 : vector<2x12x12xf32>
    %c13_i32_129 = arith.constant 13 : i32
    %394 = vector.broadcast %c13_i32_129 : i32 to vector<2x12x12xi32>
    %395 = arith.select %393, %390, %394 : vector<2x12x12xi1>, vector<2x12x12xi32>
    %cst_130 = arith.constant dense<2147483647> : vector<2x12xi32>
    %396 = vector.multi_reduction <minsi>, %395, %cst_130 [1] : vector<2x12x12xi32> to vector<2x12xi32>
    %c5_131 = arith.constant 5 : index
    %c0_132 = arith.constant 0 : index
    %c0_133 = arith.constant 0 : index
    %397 = vector.load %arg2[%c5_131, %c0_132, %c0_133] : memref<8x2x32xf32, #tpu.memory_space<vmem>>, vector<1x2x32xf32>
    %398 = vector.shape_cast %397 : vector<1x2x32xf32> to vector<2x32xf32>
    %399 = vector.extract_strided_slice %398 {offsets = [0, 0], sizes = [2, 1], strides = [1, 1]} : vector<2x32xf32> to vector<2x1xf32>
    %cst_134 = arith.constant 5.000000e-01 : f32
    %400 = vector.broadcast %cst_134 : f32 to vector<2x1xf32>
    %401 = arith.cmpf ogt, %399, %400 : vector<2x1xf32>
    %c0_i32_135 = arith.constant 0 : i32
    %402 = vector.shape_cast %401 : vector<2x1xi1> to vector<2x1xi1>
    %403 = vector.broadcast %402 : vector<2x1xi1> to vector<2x12xi1>
    %404 = vector.broadcast %c0_i32_135 : i32 to vector<2x12xi32>
    %405 = arith.select %403, %396, %404 : vector<2x12xi1>, vector<2x12xi32>
    %406 = vector.shape_cast %401 : vector<2x1xi1> to vector<2x1xi1>
    %407 = vector.broadcast %406 : vector<2x1xi1> to vector<2x12xi1>
    %408 = arith.select %407, %389, %379 : vector<2x12xi1>, vector<2x12xf32>
    %409 = vector.extract_strided_slice %258 {offsets = [12, 0], sizes = [2, 12], strides = [1, 1]} : vector<16x12xf32> to vector<2x12xf32>
    %410 = vector.shape_cast %409 : vector<2x12xf32> to vector<2x1x12xf32>
    %411 = vector.shape_cast %259 : vector<12x12xf32> to vector<1x12x12xf32>
    %412 = vector.broadcast %410 : vector<2x1x12xf32> to vector<2x12x12xf32>
    %413 = vector.broadcast %411 : vector<1x12x12xf32> to vector<2x12x12xf32>
    %414 = arith.addf %412, %413 : vector<2x12x12xf32>
    %415 = vector.shape_cast %389 : vector<2x12xf32> to vector<2x12x1xf32>
    %416 = vector.broadcast %415 : vector<2x12x1xf32> to vector<2x12x12xf32>
    %417 = arith.addf %414, %416 : vector<2x12x12xf32>
    %cst_136 = arith.constant dense<0xFF800000> : vector<2x12xf32>
    %418 = vector.multi_reduction <maximumf>, %417, %cst_136 [1] : vector<2x12x12xf32> to vector<2x12xf32>
    %419 = tpu.iota {dimensions = array<i32: 1>} : vector<2x12x12xi32>
    %420 = vector.shape_cast %418 : vector<2x12xf32> to vector<2x1x12xf32>
    %421 = vector.broadcast %420 : vector<2x1x12xf32> to vector<2x12x12xf32>
    %422 = arith.cmpf oge, %417, %421 : vector<2x12x12xf32>
    %c13_i32_137 = arith.constant 13 : i32
    %423 = vector.broadcast %c13_i32_137 : i32 to vector<2x12x12xi32>
    %424 = arith.select %422, %419, %423 : vector<2x12x12xi1>, vector<2x12x12xi32>
    %cst_138 = arith.constant dense<2147483647> : vector<2x12xi32>
    %425 = vector.multi_reduction <minsi>, %424, %cst_138 [1] : vector<2x12x12xi32> to vector<2x12xi32>
    %c6_139 = arith.constant 6 : index
    %c0_140 = arith.constant 0 : index
    %c0_141 = arith.constant 0 : index
    %426 = vector.load %arg2[%c6_139, %c0_140, %c0_141] : memref<8x2x32xf32, #tpu.memory_space<vmem>>, vector<1x2x32xf32>
    %427 = vector.shape_cast %426 : vector<1x2x32xf32> to vector<2x32xf32>
    %428 = vector.extract_strided_slice %427 {offsets = [0, 0], sizes = [2, 1], strides = [1, 1]} : vector<2x32xf32> to vector<2x1xf32>
    %cst_142 = arith.constant 5.000000e-01 : f32
    %429 = vector.broadcast %cst_142 : f32 to vector<2x1xf32>
    %430 = arith.cmpf ogt, %428, %429 : vector<2x1xf32>
    %c0_i32_143 = arith.constant 0 : i32
    %431 = vector.shape_cast %430 : vector<2x1xi1> to vector<2x1xi1>
    %432 = vector.broadcast %431 : vector<2x1xi1> to vector<2x12xi1>
    %433 = vector.broadcast %c0_i32_143 : i32 to vector<2x12xi32>
    %434 = arith.select %432, %425, %433 : vector<2x12xi1>, vector<2x12xi32>
    %435 = vector.shape_cast %430 : vector<2x1xi1> to vector<2x1xi1>
    %436 = vector.broadcast %435 : vector<2x1xi1> to vector<2x12xi1>
    %437 = arith.select %436, %418, %408 : vector<2x12xi1>, vector<2x12xf32>
    %438 = vector.extract_strided_slice %258 {offsets = [14, 0], sizes = [2, 12], strides = [1, 1]} : vector<16x12xf32> to vector<2x12xf32>
    %439 = vector.shape_cast %438 : vector<2x12xf32> to vector<2x1x12xf32>
    %440 = vector.shape_cast %259 : vector<12x12xf32> to vector<1x12x12xf32>
    %441 = vector.broadcast %439 : vector<2x1x12xf32> to vector<2x12x12xf32>
    %442 = vector.broadcast %440 : vector<1x12x12xf32> to vector<2x12x12xf32>
    %443 = arith.addf %441, %442 : vector<2x12x12xf32>
    %444 = vector.shape_cast %418 : vector<2x12xf32> to vector<2x12x1xf32>
    %445 = vector.broadcast %444 : vector<2x12x1xf32> to vector<2x12x12xf32>
    %446 = arith.addf %443, %445 : vector<2x12x12xf32>
    %cst_144 = arith.constant dense<0xFF800000> : vector<2x12xf32>
    %447 = vector.multi_reduction <maximumf>, %446, %cst_144 [1] : vector<2x12x12xf32> to vector<2x12xf32>
    %448 = tpu.iota {dimensions = array<i32: 1>} : vector<2x12x12xi32>
    %449 = vector.shape_cast %447 : vector<2x12xf32> to vector<2x1x12xf32>
    %450 = vector.broadcast %449 : vector<2x1x12xf32> to vector<2x12x12xf32>
    %451 = arith.cmpf oge, %446, %450 : vector<2x12x12xf32>
    %c13_i32_145 = arith.constant 13 : i32
    %452 = vector.broadcast %c13_i32_145 : i32 to vector<2x12x12xi32>
    %453 = arith.select %451, %448, %452 : vector<2x12x12xi1>, vector<2x12x12xi32>
    %cst_146 = arith.constant dense<2147483647> : vector<2x12xi32>
    %454 = vector.multi_reduction <minsi>, %453, %cst_146 [1] : vector<2x12x12xi32> to vector<2x12xi32>
    %c7_147 = arith.constant 7 : index
    %c0_148 = arith.constant 0 : index
    %c0_149 = arith.constant 0 : index
    %455 = vector.load %arg2[%c7_147, %c0_148, %c0_149] : memref<8x2x32xf32, #tpu.memory_space<vmem>>, vector<1x2x32xf32>
    %456 = vector.shape_cast %455 : vector<1x2x32xf32> to vector<2x32xf32>
    %457 = vector.extract_strided_slice %456 {offsets = [0, 0], sizes = [2, 1], strides = [1, 1]} : vector<2x32xf32> to vector<2x1xf32>
    %cst_150 = arith.constant 5.000000e-01 : f32
    %458 = vector.broadcast %cst_150 : f32 to vector<2x1xf32>
    %459 = arith.cmpf ogt, %457, %458 : vector<2x1xf32>
    %c0_i32_151 = arith.constant 0 : i32
    %460 = vector.shape_cast %459 : vector<2x1xi1> to vector<2x1xi1>
    %461 = vector.broadcast %460 : vector<2x1xi1> to vector<2x12xi1>
    %462 = vector.broadcast %c0_i32_151 : i32 to vector<2x12xi32>
    %463 = arith.select %461, %454, %462 : vector<2x12xi1>, vector<2x12xi32>
    %464 = vector.shape_cast %459 : vector<2x1xi1> to vector<2x1xi1>
    %465 = vector.broadcast %464 : vector<2x1xi1> to vector<2x12xi1>
    %466 = arith.select %465, %447, %437 : vector<2x12xi1>, vector<2x12xf32>
    %467 = vector.shape_cast %466 : vector<2x12xf32> to vector<2x12x1xf32>
    %468 = vector.shape_cast %259 : vector<12x12xf32> to vector<1x12x12xf32>
    %469 = vector.broadcast %467 : vector<2x12x1xf32> to vector<2x12x12xf32>
    %470 = vector.broadcast %468 : vector<1x12x12xf32> to vector<2x12x12xf32>
    %471 = arith.addf %469, %470 : vector<2x12x12xf32>
    %cst_152 = arith.constant dense<0xFF800000> : vector<2x12xf32>
    %472 = vector.multi_reduction <maximumf>, %471, %cst_152 [1] : vector<2x12x12xf32> to vector<2x12xf32>
    %473 = tpu.iota {dimensions = array<i32: 1>} : vector<2x12x12xi32>
    %474 = vector.shape_cast %472 : vector<2x12xf32> to vector<2x1x12xf32>
    %475 = vector.broadcast %474 : vector<2x1x12xf32> to vector<2x12x12xf32>
    %476 = arith.cmpf oge, %471, %475 : vector<2x12x12xf32>
    %c13_i32_153 = arith.constant 13 : i32
    %477 = vector.broadcast %c13_i32_153 : i32 to vector<2x12x12xi32>
    %478 = arith.select %476, %473, %477 : vector<2x12x12xi1>, vector<2x12x12xi32>
    %cst_154 = arith.constant dense<2147483647> : vector<2x12xi32>
    %479 = vector.multi_reduction <minsi>, %478, %cst_154 [1] : vector<2x12x12xi32> to vector<2x12xi32>
    %480 = vector.extract_strided_slice %479 {offsets = [0, 11], sizes = [2, 1], strides = [1, 1]} : vector<2x12xi32> to vector<2x1xi32>
    %c0_155 = arith.constant 0 : index
    %c0_156 = arith.constant 0 : index
    %481 = vector.load %arg3[%c0_155, %c0_156] : memref<2x1xi32, #tpu.memory_space<vmem>>, vector<2x1xi32>
    %c1_i32 = arith.constant 1 : i32
    %482 = vector.broadcast %c1_i32 : i32 to vector<2x1xi32>
    %483 = arith.subi %481, %482 : vector<2x1xi32>
    %484 = tpu.iota {dimensions = array<i32: 1>} : vector<2x12xi32>
    %c7_157 = arith.constant 7 : index
    %c0_158 = arith.constant 0 : index
    %c0_159 = arith.constant 0 : index
    %485 = vector.load %arg10[%c7_157, %c0_158, %c0_159] : memref<8x2x1xi32, #tpu.memory_space<vmem>>, vector<1x2x1xi32>
    %486 = vector.shape_cast %485 : vector<1x2x1xi32> to vector<2x1xi32>
    %487 = vector.shape_cast %480 : vector<2x1xi32> to vector<1x2x1xi32>
    tpu.vector_store %arg10[%c7_157, %c0_158, %c0_159], %487 {strides = array<i32>} : memref<8x2x1xi32, #tpu.memory_space<vmem>>, vector<1x2x1xi32>,
    %488 = vector.broadcast %480 : vector<2x1xi32> to vector<2x12xi32>
    %489 = arith.cmpi eq, %484, %488 : vector<2x12xi32>
    %490 = arith.extui %489 : vector<2x12xi1> to vector<2x12xi32>
    %491 = arith.sitofp %490 : vector<2x12xi32> to vector<2x12xf32>
    %492 = arith.sitofp %463 : vector<2x12xi32> to vector<2x12xf32>
    %493 = arith.mulf %491, %492 : vector<2x12xf32>
    %cst_160 = arith.constant dense<0.000000e+00> : vector<2xf32>
    %494 = vector.multi_reduction <add>, %493, %cst_160 [1] : vector<2x12xf32> to vector<2xf32>
    %495 = vector.shape_cast %494 : vector<2xf32> to vector<2x1xf32>
    %496 = arith.fptosi %495 : vector<2x1xf32> to vector<2x1xi32>
    %c6_i32 = arith.constant 6 : i32
    %497 = vector.broadcast %c6_i32 : i32 to vector<2x1xi32>
    %498 = arith.cmpi eq, %483, %497 : vector<2x1xi32>
    %499 = arith.select %498, %480, %496 : vector<2x1xi1>, vector<2x1xi32>
    %c6_161 = arith.constant 6 : index
    %c0_162 = arith.constant 0 : index
    %c0_163 = arith.constant 0 : index
    %500 = vector.load %arg10[%c6_161, %c0_162, %c0_163] : memref<8x2x1xi32, #tpu.memory_space<vmem>>, vector<1x2x1xi32>
    %501 = vector.shape_cast %500 : vector<1x2x1xi32> to vector<2x1xi32>
    %502 = vector.shape_cast %499 : vector<2x1xi32> to vector<1x2x1xi32>
    tpu.vector_store %arg10[%c6_161, %c0_162, %c0_163], %502 {strides = array<i32>} : memref<8x2x1xi32, #tpu.memory_space<vmem>>, vector<1x2x1xi32>,
    %503 = vector.broadcast %499 : vector<2x1xi32> to vector<2x12xi32>
    %504 = arith.cmpi eq, %484, %503 : vector<2x12xi32>
    %505 = arith.extui %504 : vector<2x12xi1> to vector<2x12xi32>
    %506 = arith.sitofp %505 : vector<2x12xi32> to vector<2x12xf32>
    %507 = arith.sitofp %434 : vector<2x12xi32> to vector<2x12xf32>
    %508 = arith.mulf %506, %507 : vector<2x12xf32>
    %cst_164 = arith.constant dense<0.000000e+00> : vector<2xf32>
    %509 = vector.multi_reduction <add>, %508, %cst_164 [1] : vector<2x12xf32> to vector<2xf32>
    %510 = vector.shape_cast %509 : vector<2xf32> to vector<2x1xf32>
    %511 = arith.fptosi %510 : vector<2x1xf32> to vector<2x1xi32>
    %c5_i32 = arith.constant 5 : i32
    %512 = vector.broadcast %c5_i32 : i32 to vector<2x1xi32>
    %513 = arith.cmpi eq, %483, %512 : vector<2x1xi32>
    %514 = arith.select %513, %480, %511 : vector<2x1xi1>, vector<2x1xi32>
    %c5_165 = arith.constant 5 : index
    %c0_166 = arith.constant 0 : index
    %c0_167 = arith.constant 0 : index
    %515 = vector.load %arg10[%c5_165, %c0_166, %c0_167] : memref<8x2x1xi32, #tpu.memory_space<vmem>>, vector<1x2x1xi32>
    %516 = vector.shape_cast %515 : vector<1x2x1xi32> to vector<2x1xi32>
    %517 = vector.shape_cast %514 : vector<2x1xi32> to vector<1x2x1xi32>
    tpu.vector_store %arg10[%c5_165, %c0_166, %c0_167], %517 {strides = array<i32>} : memref<8x2x1xi32, #tpu.memory_space<vmem>>, vector<1x2x1xi32>,
    %518 = vector.broadcast %514 : vector<2x1xi32> to vector<2x12xi32>
    %519 = arith.cmpi eq, %484, %518 : vector<2x12xi32>
    %520 = arith.extui %519 : vector<2x12xi1> to vector<2x12xi32>
    %521 = arith.sitofp %520 : vector<2x12xi32> to vector<2x12xf32>
    %522 = arith.sitofp %405 : vector<2x12xi32> to vector<2x12xf32>
    %523 = arith.mulf %521, %522 : vector<2x12xf32>
    %cst_168 = arith.constant dense<0.000000e+00> : vector<2xf32>
    %524 = vector.multi_reduction <add>, %523, %cst_168 [1] : vector<2x12xf32> to vector<2xf32>
    %525 = vector.shape_cast %524 : vector<2xf32> to vector<2x1xf32>
    %526 = arith.fptosi %525 : vector<2x1xf32> to vector<2x1xi32>
    %c4_i32 = arith.constant 4 : i32
    %527 = vector.broadcast %c4_i32 : i32 to vector<2x1xi32>
    %528 = arith.cmpi eq, %483, %527 : vector<2x1xi32>
    %529 = arith.select %528, %480, %526 : vector<2x1xi1>, vector<2x1xi32>
    %c4_169 = arith.constant 4 : index
    %c0_170 = arith.constant 0 : index
    %c0_171 = arith.constant 0 : index
    %530 = vector.load %arg10[%c4_169, %c0_170, %c0_171] : memref<8x2x1xi32, #tpu.memory_space<vmem>>, vector<1x2x1xi32>
    %531 = vector.shape_cast %530 : vector<1x2x1xi32> to vector<2x1xi32>
    %532 = vector.shape_cast %529 : vector<2x1xi32> to vector<1x2x1xi32>
    tpu.vector_store %arg10[%c4_169, %c0_170, %c0_171], %532 {strides = array<i32>} : memref<8x2x1xi32, #tpu.memory_space<vmem>>, vector<1x2x1xi32>,
    %533 = vector.broadcast %529 : vector<2x1xi32> to vector<2x12xi32>
    %534 = arith.cmpi eq, %484, %533 : vector<2x12xi32>
    %535 = arith.extui %534 : vector<2x12xi1> to vector<2x12xi32>
    %536 = arith.sitofp %535 : vector<2x12xi32> to vector<2x12xf32>
    %537 = arith.sitofp %376 : vector<2x12xi32> to vector<2x12xf32>
    %538 = arith.mulf %536, %537 : vector<2x12xf32>
    %cst_172 = arith.constant dense<0.000000e+00> : vector<2xf32>
    %539 = vector.multi_reduction <add>, %538, %cst_172 [1] : vector<2x12xf32> to vector<2xf32>
    %540 = vector.shape_cast %539 : vector<2xf32> to vector<2x1xf32>
    %541 = arith.fptosi %540 : vector<2x1xf32> to vector<2x1xi32>
    %c3_i32 = arith.constant 3 : i32
    %542 = vector.broadcast %c3_i32 : i32 to vector<2x1xi32>
    %543 = arith.cmpi eq, %483, %542 : vector<2x1xi32>
    %544 = arith.select %543, %480, %541 : vector<2x1xi1>, vector<2x1xi32>
    %c3_173 = arith.constant 3 : index
    %c0_174 = arith.constant 0 : index
    %c0_175 = arith.constant 0 : index
    %545 = vector.load %arg10[%c3_173, %c0_174, %c0_175] : memref<8x2x1xi32, #tpu.memory_space<vmem>>, vector<1x2x1xi32>
    %546 = vector.shape_cast %545 : vector<1x2x1xi32> to vector<2x1xi32>
    %547 = vector.shape_cast %544 : vector<2x1xi32> to vector<1x2x1xi32>
    tpu.vector_store %arg10[%c3_173, %c0_174, %c0_175], %547 {strides = array<i32>} : memref<8x2x1xi32, #tpu.memory_space<vmem>>, vector<1x2x1xi32>,
    %548 = vector.broadcast %544 : vector<2x1xi32> to vector<2x12xi32>
    %549 = arith.cmpi eq, %484, %548 : vector<2x12xi32>
    %550 = arith.extui %549 : vector<2x12xi1> to vector<2x12xi32>
    %551 = arith.sitofp %550 : vector<2x12xi32> to vector<2x12xf32>
    %552 = arith.sitofp %347 : vector<2x12xi32> to vector<2x12xf32>
    %553 = arith.mulf %551, %552 : vector<2x12xf32>
    %cst_176 = arith.constant dense<0.000000e+00> : vector<2xf32>
    %554 = vector.multi_reduction <add>, %553, %cst_176 [1] : vector<2x12xf32> to vector<2xf32>
    %555 = vector.shape_cast %554 : vector<2xf32> to vector<2x1xf32>
    %556 = arith.fptosi %555 : vector<2x1xf32> to vector<2x1xi32>
    %c2_i32 = arith.constant 2 : i32
    %557 = vector.broadcast %c2_i32 : i32 to vector<2x1xi32>
    %558 = arith.cmpi eq, %483, %557 : vector<2x1xi32>
    %559 = arith.select %558, %480, %556 : vector<2x1xi1>, vector<2x1xi32>
    %c2_177 = arith.constant 2 : index
    %c0_178 = arith.constant 0 : index
    %c0_179 = arith.constant 0 : index
    %560 = vector.load %arg10[%c2_177, %c0_178, %c0_179] : memref<8x2x1xi32, #tpu.memory_space<vmem>>, vector<1x2x1xi32>
    %561 = vector.shape_cast %560 : vector<1x2x1xi32> to vector<2x1xi32>
    %562 = vector.shape_cast %559 : vector<2x1xi32> to vector<1x2x1xi32>
    tpu.vector_store %arg10[%c2_177, %c0_178, %c0_179], %562 {strides = array<i32>} : memref<8x2x1xi32, #tpu.memory_space<vmem>>, vector<1x2x1xi32>,
    %563 = vector.broadcast %559 : vector<2x1xi32> to vector<2x12xi32>
    %564 = arith.cmpi eq, %484, %563 : vector<2x12xi32>
    %565 = arith.extui %564 : vector<2x12xi1> to vector<2x12xi32>
    %566 = arith.sitofp %565 : vector<2x12xi32> to vector<2x12xf32>
    %567 = arith.sitofp %318 : vector<2x12xi32> to vector<2x12xf32>
    %568 = arith.mulf %566, %567 : vector<2x12xf32>
    %cst_180 = arith.constant dense<0.000000e+00> : vector<2xf32>
    %569 = vector.multi_reduction <add>, %568, %cst_180 [1] : vector<2x12xf32> to vector<2xf32>
    %570 = vector.shape_cast %569 : vector<2xf32> to vector<2x1xf32>
    %571 = arith.fptosi %570 : vector<2x1xf32> to vector<2x1xi32>
    %c1_i32_181 = arith.constant 1 : i32
    %572 = vector.broadcast %c1_i32_181 : i32 to vector<2x1xi32>
    %573 = arith.cmpi eq, %483, %572 : vector<2x1xi32>
    %574 = arith.select %573, %480, %571 : vector<2x1xi1>, vector<2x1xi32>
    %c1_182 = arith.constant 1 : index
    %c0_183 = arith.constant 0 : index
    %c0_184 = arith.constant 0 : index
    %575 = vector.load %arg10[%c1_182, %c0_183, %c0_184] : memref<8x2x1xi32, #tpu.memory_space<vmem>>, vector<1x2x1xi32>
    %576 = vector.shape_cast %575 : vector<1x2x1xi32> to vector<2x1xi32>
    %577 = vector.shape_cast %574 : vector<2x1xi32> to vector<1x2x1xi32>
    tpu.vector_store %arg10[%c1_182, %c0_183, %c0_184], %577 {strides = array<i32>} : memref<8x2x1xi32, #tpu.memory_space<vmem>>, vector<1x2x1xi32>,
    %578 = vector.broadcast %574 : vector<2x1xi32> to vector<2x12xi32>
    %579 = arith.cmpi eq, %484, %578 : vector<2x12xi32>
    %580 = arith.extui %579 : vector<2x12xi1> to vector<2x12xi32>
    %581 = arith.sitofp %580 : vector<2x12xi32> to vector<2x12xf32>
    %582 = arith.sitofp %289 : vector<2x12xi32> to vector<2x12xf32>
    %583 = arith.mulf %581, %582 : vector<2x12xf32>
    %cst_185 = arith.constant dense<0.000000e+00> : vector<2xf32>
    %584 = vector.multi_reduction <add>, %583, %cst_185 [1] : vector<2x12xf32> to vector<2xf32>
    %585 = vector.shape_cast %584 : vector<2xf32> to vector<2x1xf32>
    %586 = arith.fptosi %585 : vector<2x1xf32> to vector<2x1xi32>
    %c0_i32_186 = arith.constant 0 : i32
    %587 = vector.broadcast %c0_i32_186 : i32 to vector<2x1xi32>
    %588 = arith.cmpi eq, %483, %587 : vector<2x1xi32>
    %589 = arith.select %588, %480, %586 : vector<2x1xi1>, vector<2x1xi32>
    %c0_187 = arith.constant 0 : index
    %c0_188 = arith.constant 0 : index
    %c0_189 = arith.constant 0 : index
    %590 = vector.load %arg10[%c0_187, %c0_188, %c0_189] : memref<8x2x1xi32, #tpu.memory_space<vmem>>, vector<1x2x1xi32>
    %591 = vector.shape_cast %590 : vector<1x2x1xi32> to vector<2x1xi32>
    %592 = vector.shape_cast %589 : vector<2x1xi32> to vector<1x2x1xi32>
    tpu.vector_store %arg10[%c0_187, %c0_188, %c0_189], %592 {strides = array<i32>} : memref<8x2x1xi32, #tpu.memory_space<vmem>>, vector<1x2x1xi32>,
    return
  }
  func.func @transform_0(%arg0: i32) -> (i32, i32) {
    %c0_i32 = arith.constant 0 : i32
    %c0_i32_0 = arith.constant 0 : i32
    %c0_i32_1 = arith.constant 0 : i32
    return %c0_i32, %c0_i32_0 : i32, i32
  }
  func.func @transform_1(%arg0: i32) -> (i32, i32, i32) {
    %c0_i32 = arith.constant 0 : i32
    %c0_i32_0 = arith.constant 0 : i32
    %c0_i32_1 = arith.constant 0 : i32
    %c0_i32_2 = arith.constant 0 : i32
    return %c0_i32, %c0_i32_0, %c0_i32_1 : i32, i32, i32
  }
  func.func @transform_2(%arg0: i32) -> (i32, i32) {
    %c0_i32 = arith.constant 0 : i32
    %c0_i32_0 = arith.constant 0 : i32
    %c0_i32_1 = arith.constant 0 : i32
    return %c0_i32, %c0_i32_0 : i32, i32
  }
  func.func @transform_3(%arg0: i32) -> (i32, i32) {
    %c0_i32 = arith.constant 0 : i32
    %c0_i32_0 = arith.constant 0 : i32
    %c0_i32_1 = arith.constant 0 : i32
    return %c0_i32, %c0_i32_0 : i32, i32
  }
  func.func @transform_4(%arg0: i32) -> (i32, i32) {
    %c0_i32 = arith.constant 0 : i32
    %c0_i32_0 = arith.constant 0 : i32
    %c0_i32_1 = arith.constant 0 : i32
    return %c0_i32, %c0_i32_0 : i32, i32
  }
  func.func @transform_5(%arg0: i32) -> (i32, i32) {
    %c0_i32 = arith.constant 0 : i32
    %c0_i32_0 = arith.constant 0 : i32
    %c0_i32_1 = arith.constant 0 : i32
    return %c0_i32, %c0_i32_0 : i32, i32
  }
  func.func @transform_6(%arg0: i32) -> (i32, i32) {
    %c0_i32 = arith.constant 0 : i32
    %c0_i32_0 = arith.constant 0 : i32
    %c0_i32_1 = arith.constant 0 : i32
    return %c0_i32, %c0_i32_0 : i32, i32
  }
  func.func @transform_7(%arg0: i32) -> (i32, i32) {
    %c0_i32 = arith.constant 0 : i32
    %c0_i32_0 = arith.constant 0 : i32
    %c0_i32_1 = arith.constant 0 : i32
    return %c0_i32, %c0_i32_0 : i32, i32
  }
  func.func @transform_8(%arg0: i32) -> (i32, i32) {
    %c0_i32 = arith.constant 0 : i32
    %c0_i32_0 = arith.constant 0 : i32
    %c0_i32_1 = arith.constant 0 : i32
    return %c0_i32, %c0_i32_0 : i32, i32
  }
  func.func @transform_9(%arg0: i32) -> (i32, i32, i32) {
    %c0_i32 = arith.constant 0 : i32
    %c0_i32_0 = arith.constant 0 : i32
    %c0_i32_1 = arith.constant 0 : i32
    %c0_i32_2 = arith.constant 0 : i32
    return %c0_i32, %c0_i32_0, %c0_i32_1 : i32, i32, i32
  }
}

</mosaic_0001>

<bundles_post_ra>
// kernel: bilstm_crf_forward.1
= control target key start
LH: loop header
LB: loop body
LE: loop exit
PB: predicated region body
PF: predicated region fallthrough
CT: control target
= control target key end

     0   :  { %v2035_v11 = vmov 0.0   ;;  %vm46_vm0 = vcmask 523264   ;;  %s2036_s14 = smov 64   ;;  %s2038_s15 = smov 96   ;;  %vm154_vm6 = vcmask 123904   ;;  %vm80_vm7 = vcmask 261120   ;;  %s2760_s3 = inlined_call_operand.vmem [shape: f32[64,128], index: 3, kind: input, shape index: {}]   ;;  %s2761_s4 = inlined_call_operand.vmem [shape: f32[32,128], index: 4, kind: input, shape index: {}]   ;;  %s2762_s5 = inlined_call_operand.vmem [shape: f32[1,128], index: 5, kind: input, shape index: {}]   ;;  %s2763_s0 = inlined_call_operand.vmem [shape: f32[16,64], index: 0, kind: input, shape index: {}]   ;;  %s2764_s1 = inlined_call_operand.vmem [shape: f32[8,2,32], index: 1, kind: input, shape index: {}]   ;;  %s2765_s6 = inlined_call_operand.vmem [shape: f32[32,12], index: 6, kind: input, shape index: {}]   ;;  %s2766_s7 = inlined_call_operand.vmem [shape: f32[1,12], index: 7, kind: input, shape index: {}]   ;;  %s2767_s8 = inlined_call_operand.vmem [shape: f32[12,12], index: 8, kind: input, shape index: {}]   ;;  %s2768_s9 = inlined_call_operand.vmem [shape: s32[8,2,1], index: 9, kind: output, shape index: {}]   ;;  %s2769_s2 = inlined_call_operand.vmem [shape: s32[2,1], index: 2, kind: input, shape index: {}]  }
   0x1   :  { %v41_v0 = vld [vmem:[%s2760_s3 + $0x38] sm:$0xff]  ;;  %v40_v1 = vld [vmem:[%s2760_s3 + $0x30] sm:$0xff]  ;;  %v39_v2 = vld [vmem:[%s2760_s3 + $0x28] sm:$0xff] }
   0x2   :  { %61 = vmatpush.msra.mxu0 %v41_v0  ;;  %v2105_v3 = vld [vmem:[%s2761_s4 + $0x18] sm:$0xff]  ;;  %v2110_v4 = vld [vmem:[%s2761_s4 + $0x10] sm:$0xff]  ;;  %v38_v5 = vld [vmem:[%s2760_s3 + $0x20] sm:$0xff] }
   0x3   :  { %96 = vmatpush.msra.mxu1 %v2105_v3  ;;  %v2119_v6 = vld [vmem:[%s2761_s4 + $0x8] sm:$0xff]  ;;  %175 = vmatpush.msra.mxu2 %v2105_v3  ;;  %v37_v7 = vld [vmem:[%s2760_s3 + $0x18] sm:$0xff]  ;;  %v2130_v8 = vld [vmem:[%s2761_s4] sm:$0xff] }
   0x4   :  { %62 = vmatpush.msra.mxu0 %v40_v1  ;;  %266 = vmatpush.msra.mxu3 %v2105_v3  ;;  %v36_v9 = vld [vmem:[%s2760_s3 + $0x10] sm:$0xff]  ;;  %v35_v10 = vld [vmem:[%s2760_s3 + $0x8] sm:$0xff]  ;;  %v34_v12 = vld [vmem:[%s2760_s3] sm:$0xff]  ;;  %s2039_s3 = smov 112  }
   0x5   :  { %97 = vmatpush.msra.mxu1 %v2110_v4  ;;  %176 = vmatpush.msra.mxu2 %v2110_v4  ;;  %v32_v13 = vld [vmem:[%s2763_s0] sm:$0xff] }
   0x6   :  { %63 = vmatpush.msra.mxu0 %v39_v2  ;;  %267 = vmatpush.msra.mxu3 %v2110_v4  ;;  %v2173_v14 = vld [vmem:[%s2762_s5] ss:$0 sm:$0xff]  ;;  %s2037_s5 = smov 32  }
   0x7   :  { %98 = vmatpush.msra.mxu1 %v2119_v6  ;;  %177 = vmatpush.msra.mxu2 %v2119_v6  ;;  %v142_v39 = vld [vmem:[%s2764_s1] sm:$0x3] }
   0x8   :  { %64 = vmatpush.msra.mxu0 %v38_v5  ;;  %268 = vmatpush.msra.mxu3 %v2119_v6  ;;  %vm143_vm5 = vcmp.gt.f32.partialorder %v142_v39, 0.5 }
   0x9   :  { %99 = vmatpush.msra.mxu1 %v2130_v8  ;;  %178 = vmatpush.msra.mxu2 %v2130_v8 }
   0xa   :  { %65 = vmatpush.msra.mxu0 %v37_v7  ;;  %100 = vmatmul.f32.vlgmr.msra.gmra.mxu1 %v2035_v11 }
   0xb   :  { %269 = vmatpush.msra.mxu3 %v2130_v8  ;;  %357 = vmatpush.msrb.mxu1 %v2105_v3 }
   0xc   :  { %66 = vmatpush.msra.mxu0 %v36_v9  ;;  %448 = vmatpush.msrb.mxu2 %v2105_v3 }
   0xd   :  { %533 = vmatpush.msrb.mxu3 %v2105_v3  ;;  %358 = vmatpush.msrb.mxu1 %v2110_v4 }
   0xe   :  { %67 = vmatpush.msra.mxu0 %v35_v10  ;;  %449 = vmatpush.msrb.mxu2 %v2110_v4 }
   0xf   :  { %534 = vmatpush.msrb.mxu3 %v2110_v4  ;;  %359 = vmatpush.msrb.mxu1 %v2119_v6 }
  0x10   :  { %68 = vmatpush.msra.mxu0 %v34_v12  ;;  %450 = vmatpush.msrb.mxu2 %v2119_v6  ;;  %v1833_v12 = vld [vmem:[%s2764_s1 + $0x2] sm:$0x3] }
  0x11   :  { %1828 = vmatmul.msk.f32.vlgmr.msra.gmra.mxu0 %vm46_vm0, %v32_v13  ;;  %535 = vmatpush.msrb.mxu3 %v2119_v6  ;;  %vm231_vm12 = vcmp.gt.f32.partialorder %v1833_v12, 0.5 }
  0x12   :  { %360 = vmatpush.msrb.mxu1 %v2130_v8  ;;  %451 = vmatpush.msrb.mxu2 %v2130_v8 }
  0x13   :  { %536 = vmatpush.msrb.mxu3 %v2130_v8 }
  0x14   :  { %624 = vmatpush.msra.mxu1 %v2105_v3 }
  0x16   :  { %625 = vmatpush.msra.mxu1 %v2110_v4 }
  0x18   :  { %626 = vmatpush.msra.mxu1 %v2119_v6 }
  0x1a   :  { %627 = vmatpush.msra.mxu1 %v2130_v8 }
  0x87   :  { %v101_v16 = vpop.f32.mrf.mxu1 }
  0x8e   :  { %v70_v15 = vpop.f32.mrf.mxu0 }
  0x8f   :  { %v2176_v17 = vadd.f32 %v2173_v14, %v70_v15 }
  0x91   :  { %v104_v18 = vadd.f32 %v101_v16, %v2176_v17 }
  0x93   :  { %1969 = vtanh.f32 %v104_v18  ;;  %v1830_v20 = vmul.f32 -1.442695, %v104_v18 }
  0x95   :  { %1971 = vpow2.f32 %v1830_v20 }
  0x99   :  { %v1970_v19 = vpop.eup %1969 }
  0x9a   :  { %127 = vrot.lane.b32.xlu0 %v1970_v19, %s2036_s14 }
  0x9b   :  { %v1972_v21 = vpop.eup %1971 }
  0x9c   :  { %v108_v22 = vadd.f32 1.0, %v1972_v21 }
  0x9e   :  { %1973 = vrcp.f32 %v108_v22  ;;  %v120_v28 = vand.u32 2147483648, %v108_v22  ;;  %vm114_vm2 = vweird.f32 %v108_v22  ;;  %v118_v29 = vand.u32 2147483647, %v108_v22 }
  0xa0   :  { %v121_v31 = vor.u32 1.1754944e-38, %v120_v28  ;;  %vm119_vm4 = vcmp.eq.f32.partialorder %v118_v29, 8.507059e+37 }
  0xa4   :  { %v1974_v23 = vpop.eup %1973 }
  0xa5   :  { %v110_v24 = vmul.f32 %v1974_v23, %v108_v22  ;;  %vm115_vm1 = vweird.f32 %v1974_v23 }
  0xa6   :  { %vm116_vm3 = vmor %vm114_vm2, %vm115_vm1 }
  0xa7   :  { %v111_v25 = vsub.f32 1.0, %v110_v24 }
  0xa9   :  { %v112_v26 = vmul.f32 %v1974_v23, %v111_v25 }
  0xab   :  { %v113_v27 = vadd.f32 %v1974_v23, %v112_v26 }
  0xad   :  { %v117_v30 = vsel %vm116_vm3, %v1974_v23, %v113_v27 }
  0xae   :  { %v122_v33 = vsel %vm119_vm4, %v121_v31, %v117_v30 }
  0xaf   :  { %v125_v35 = vmul.f32 0.0, %v122_v33 }
 0x10c   :  { %v128_v32 = vpop.permute.xlu0 %127 }
 0x10d   :  { %v130_v34 = vmul.f32 %v128_v32, %v122_v33 }
 0x10f   :  { %132 = vrot.lane.b32.xlu0 %v130_v34, %s2037_s5 }
 0x181   :  { %v133_v36 = vpop.permute.xlu0 %132 }
 0x182   :  { %v135_v37 = vadd.f32 %v133_v36, %v125_v35 }
 0x184   :  { %1975 = vtanh.f32 %v135_v37  ;;  %150 = vrot.lane.b32.xlu2 %v135_v37, %s2038_s15 }
 0x18a   :  { %v1976_v38 = vpop.eup %1975 }
 0x18b   :  { %138 = vrot.lane.b32.xlu1 %v1976_v38, %s2036_s14 }
 0x1de   :  { %v151_v40 = vpop.permute.xlu2 %150 }
 0x1df   :  { %v153_v41 = vsel %vm143_vm5, %v151_v40, 0.0 }
 0x1e0   :  { %v208_v42 = vrot.slane %v153_v41, 6 }
 0x1e2   :  { %209 = vrot.lane.b32.xlu0 %v208_v42, %s2037_s5 }
 0x1fd   :  { %v139_v43 = vpop.permute.xlu1 %138 }
 0x1fe   :  { %v141_v44 = vmul.f32 %v139_v43, %v122_v33 }
 0x200   :  { %145 = vrot.lane.b32.xlu1 %v141_v44, %s2037_s5 }
 0x254   :  { %v210_v2 = vpop.permute.xlu0 %209 }
 0x272   :  { %v146_v45 = vpop.permute.xlu1 %145 }
 0x273   :  { %v2188_v46 = vsel %vm143_vm5, %v146_v45, 0.0 }
 0x274   :  { %155 = vst.msk [vmem:[#allocation2] sm:$0x3] %vm154_vm6, %v2188_v46  ;;  %1831 = vmatmul.msk.f32.vlgmr.msra.gmra.mxu2 %vm80_vm7, %v2188_v46 }
 0x275   :  { %715 = vmatpush.msra.mxu2 %v2105_v3 }
 0x277   :  { %716 = vmatpush.msra.mxu2 %v2110_v4 }
 0x279   :  { %717 = vmatpush.msra.mxu2 %v2119_v6 }
 0x27b   :  { %718 = vmatpush.msra.mxu2 %v2130_v8 }
 0x2f7   :  { %v180_v47 = vpop.f32.mrf.mxu2 }
 0x2f8   :  { %v184_v48 = vrot.slane %v180_v47, 6 }
 0x2fa   :  { %v186_v49 = vadd.f32 %v184_v48, %v2176_v17 }
 0x2fc   :  { %1977 = vtanh.f32 %v186_v49  ;;  %v1832_v51 = vmul.f32 -1.442695, %v186_v49 }
 0x2fe   :  { %1979 = vpow2.f32 %v1832_v51 }
 0x302   :  { %v1978_v50 = vpop.eup %1977 }
 0x303   :  { %214 = vrot.lane.b32.xlu2 %v1978_v50, %s2036_s14  ;;  %v1836_v50 = vld [vmem:[%s2764_s1 + $0x4] sm:$0x3] }
 0x304   :  { %v1980_v52 = vpop.eup %1979  ;;  %vm322_vm2 = vcmp.gt.f32.partialorder %v1836_v50, 0.5 }
 0x305   :  { %v190_v53 = vadd.f32 1.0, %v1980_v52 }
 0x307   :  { %1981 = vrcp.f32 %v190_v53  ;;  %v202_v59 = vand.u32 2147483648, %v190_v53  ;;  %vm196_vm9 = vweird.f32 %v190_v53  ;;  %v200_v60 = vand.u32 2147483647, %v190_v53 }
 0x309   :  { %v203_v62 = vor.u32 1.1754944e-38, %v202_v59  ;;  %vm201_vm11 = vcmp.eq.f32.partialorder %v200_v60, 8.507059e+37 }
 0x30d   :  { %v1982_v54 = vpop.eup %1981 }
 0x30e   :  { %v192_v55 = vmul.f32 %v1982_v54, %v190_v53  ;;  %vm197_vm8 = vweird.f32 %v1982_v54 }
 0x30f   :  { %vm198_vm10 = vmor %vm196_vm9, %vm197_vm8 }
 0x310   :  { %v193_v56 = vsub.f32 1.0, %v192_v55 }
 0x312   :  { %v194_v57 = vmul.f32 %v1982_v54, %v193_v56 }
 0x314   :  { %v195_v58 = vadd.f32 %v1982_v54, %v194_v57 }
 0x316   :  { %v199_v61 = vsel %vm198_vm10, %v1982_v54, %v195_v58 }
 0x317   :  { %v204_v0 = vsel %vm201_vm11, %v203_v62, %v199_v61 }
 0x318   :  { %v212_v3 = vmul.f32 %v210_v2, %v204_v0 }
 0x35d   :  { %v215_v63 = vpop.permute.xlu2 %214 }
 0x35e   :  { %v217_v1 = vmul.f32 %v215_v63, %v204_v0 }
 0x360   :  { %219 = vrot.lane.b32.xlu1 %v217_v1, %s2037_s5 }
 0x3d2   :  { %v220_v4 = vpop.permute.xlu1 %219 }
 0x3d3   :  { %v222_v5 = vadd.f32 %v220_v4, %v212_v3 }
 0x3d5   :  { %1983 = vtanh.f32 %v222_v5  ;;  %v239_v6 = vrot.slane %v222_v5, 2 }
 0x3d7   :  { %240 = vrot.lane.b32.xlu1 %v239_v6, %s2038_s15 }
 0x3db   :  { %v1984_v7 = vpop.eup %1983 }
 0x3dc   :  { %225 = vrot.lane.b32.xlu2 %v1984_v7, %s2036_s14 }
 0x436   :  { %v226_v8 = vpop.permute.xlu2 %225 }
 0x437   :  { %v228_v9 = vmul.f32 %v226_v8, %v204_v0 }
 0x439   :  { %v233_v10 = vrot.slane %v228_v9, 2 }
 0x43b   :  { %234 = vrot.lane.b32.xlu0 %v233_v10, %s2037_s5 }
 0x449   :  { %v241_v13 = vpop.permute.xlu1 %240 }
 0x44a   :  { %v243_v15 = vsel %vm231_vm12, %v241_v13, %v153_v41 }
 0x44b   :  { %v299_v16 = vrot.slane %v243_v15, 4 }
 0x44d   :  { %300 = vrot.lane.b32.xlu0 %v299_v16, %s2037_s5 }
 0x4ad   :  { %v235_v18 = vpop.permute.xlu0 %234 }
 0x4ae   :  { %v2208_v19 = vsel %vm231_vm12, %v235_v18, 0.0  ;;  %v237_v20 = vsel %vm231_vm12, %v235_v18, %v2188_v46 }
 0x4af   :  { %245 = vst.msk [vmem:[#allocation2 + $0x2] sm:$0x3] %vm154_vm6, %v2208_v19  ;;  %1834 = vmatmul.msk.f32.vlgmr.msra.gmra.mxu3 %vm80_vm7, %v237_v20 }
 0x4bf   :  { %v301_v40 = vpop.permute.xlu0 %300 }
 0x532   :  { %v271_v21 = vpop.f32.mrf.mxu3 }
 0x533   :  { %v275_v22 = vrot.slane %v271_v21, 4 }
 0x535   :  { %v277_v23 = vadd.f32 %v275_v22, %v2176_v17 }
 0x537   :  { %1985 = vtanh.f32 %v277_v23  ;;  %v1835_v25 = vmul.f32 -1.442695, %v277_v23 }
 0x539   :  { %1987 = vpow2.f32 %v1835_v25 }
 0x53d   :  { %v1986_v24 = vpop.eup %1985 }
 0x53e   :  { %305 = vrot.lane.b32.xlu2 %v1986_v24, %s2036_s14  ;;  %v1839_v24 = vld [vmem:[%s2764_s1 + $0x6] sm:$0x3] }
 0x53f   :  { %v1988_v26 = vpop.eup %1987  ;;  %vm413_vm9 = vcmp.gt.f32.partialorder %v1839_v24, 0.5 }
 0x540   :  { %v281_v27 = vadd.f32 1.0, %v1988_v26 }
 0x542   :  { %1989 = vrcp.f32 %v281_v27  ;;  %v293_v33 = vand.u32 2147483648, %v281_v27  ;;  %vm287_vm14 = vweird.f32 %v281_v27  ;;  %v291_v34 = vand.u32 2147483647, %v281_v27 }
 0x544   :  { %v294_v36 = vor.u32 1.1754944e-38, %v293_v33  ;;  %vm292_vm1 = vcmp.eq.f32.partialorder %v291_v34, 8.507059e+37 }
 0x548   :  { %v1990_v28 = vpop.eup %1989 }
 0x549   :  { %v283_v29 = vmul.f32 %v1990_v28, %v281_v27  ;;  %vm288_vm13 = vweird.f32 %v1990_v28  ;;  %v33_v27 = vld [vmem:[%s2763_s0 + $0x8] sm:$0xff] }
 0x54a   :  { %vm289_vm15 = vmor %vm287_vm14, %vm288_vm13  ;;  %1829 = vmatmul.msk.f32.gmra.mxu0 %vm46_vm0, %v33_v27  ;;  %vm792_vm0 = vcmask 130048  }
 0x54b   :  { %v284_v30 = vsub.f32 1.0, %v283_v29  ;;  %v784_v29 = vld [vmem:[%s2765_s6] sm:$0xff] }
 0x54d   :  { %v285_v31 = vmul.f32 %v1990_v28, %v284_v30 }
 0x54f   :  { %v286_v32 = vadd.f32 %v1990_v28, %v285_v31 }
 0x551   :  { %v290_v35 = vsel %vm289_vm15, %v1990_v28, %v286_v32  ;;  %v785_v28 = vld [vmem:[%s2765_s6 + $0x8] sm:$0xff] }
 0x552   :  { %v295_v38 = vsel %vm292_vm1, %v294_v36, %v290_v35  ;;  %842 = vmatpush.msrb.mxu0 %v785_v28 }
 0x553   :  { %v303_v41 = vmul.f32 %v301_v40, %v295_v38 }
 0x554   :  { %843 = vmatpush.msrb.mxu0 %v784_v29 }
 0x598   :  { %v306_v37 = vpop.permute.xlu2 %305 }
 0x599   :  { %v308_v39 = vmul.f32 %v306_v37, %v295_v38 }
 0x59b   :  { %310 = vrot.lane.b32.xlu1 %v308_v39, %s2037_s5 }
 0x5c7   :  { %v73_v34 = vpop.f32.mrf.mxu0 }
 0x5c8   :  { %v2259_v35 = vadd.f32 %v2173_v14, %v73_v34 }
 0x60d   :  { %v311_v42 = vpop.permute.xlu1 %310 }
 0x60e   :  { %v313_v43 = vadd.f32 %v311_v42, %v303_v41 }
 0x610   :  { %1991 = vtanh.f32 %v313_v43  ;;  %v330_v44 = vrot.slane %v313_v43, 4 }
 0x612   :  { %331 = vrot.lane.b32.xlu1 %v330_v44, %s2038_s15 }
 0x616   :  { %v1992_v45 = vpop.eup %1991 }
 0x617   :  { %316 = vrot.lane.b32.xlu2 %v1992_v45, %s2036_s14 }
 0x671   :  { %v317_v47 = vpop.permute.xlu2 %316 }
 0x672   :  { %v319_v48 = vmul.f32 %v317_v47, %v295_v38 }
 0x674   :  { %v324_v49 = vrot.slane %v319_v48, 4 }
 0x676   :  { %325 = vrot.lane.b32.xlu0 %v324_v49, %s2037_s5 }
 0x684   :  { %v332_v51 = vpop.permute.xlu1 %331 }
 0x685   :  { %v334_v52 = vsel %vm322_vm2, %v332_v51, %v243_v15 }
 0x686   :  { %v390_v53 = vrot.slane %v334_v52, 2 }
 0x688   :  { %391 = vrot.lane.b32.xlu0 %v390_v53, %s2037_s5 }
 0x6e8   :  { %v326_v54 = vpop.permute.xlu0 %325 }
 0x6e9   :  { %v328_v55 = vsel %vm322_vm2, %v326_v54, %v237_v20  ;;  %v2224_v56 = vsel %vm322_vm2, %v326_v54, 0.0 }
 0x6ea   :  { %336 = vst.msk [vmem:[#allocation2 + $0x4] sm:$0x3] %vm154_vm6, %v2224_v56  ;;  %1837 = vmatmul.msk.f32.vlgmr.msrb.gmra.mxu1 %vm80_vm7, %v328_v55 }
 0x6eb   :  { %1892 = vmatpush.msrb.mxu1 %v785_v28 }
 0x6ed   :  { %1893 = vmatpush.msrb.mxu1 %v784_v29 }
 0x6fa   :  { %v392_v12 = vpop.permute.xlu0 %391 }
 0x767   :  { %v362_v57 = vpop.f32.mrf.mxu1 }
 0x768   :  { %v366_v58 = vrot.slane %v362_v57, 2 }
 0x76a   :  { %v368_v59 = vadd.f32 %v366_v58, %v2176_v17 }
 0x76c   :  { %1993 = vtanh.f32 %v368_v59  ;;  %v1838_v61 = vmul.f32 -1.442695, %v368_v59 }
 0x76e   :  { %1995 = vpow2.f32 %v1838_v61 }
 0x772   :  { %v1994_v60 = vpop.eup %1993 }
 0x773   :  { %396 = vrot.lane.b32.xlu2 %v1994_v60, %s2036_s14 }
 0x774   :  { %v1996_v62 = vpop.eup %1995 }
 0x775   :  { %v372_v63 = vadd.f32 1.0, %v1996_v62  ;;  %v1842_v62 = vld [vmem:[%s2764_s1 + $0x8] sm:$0x3] }
 0x776   :  { %vm500_vm14 = vcmp.gt.f32.partialorder %v1842_v62, 0.5 }
 0x777   :  { %1997 = vrcp.f32 %v372_v63  ;;  %v384_v5 = vand.u32 2147483648, %v372_v63  ;;  %vm378_vm4 = vweird.f32 %v372_v63  ;;  %v382_v6 = vand.u32 2147483647, %v372_v63 }
 0x779   :  { %v385_v7 = vor.u32 1.1754944e-38, %v384_v5  ;;  %vm383_vm8 = vcmp.eq.f32.partialorder %v382_v6, 8.507059e+37 }
 0x77d   :  { %v1998_v0 = vpop.eup %1997 }
 0x77e   :  { %v374_v1 = vmul.f32 %v1998_v0, %v372_v63  ;;  %vm379_vm3 = vweird.f32 %v1998_v0 }
 0x77f   :  { %vm380_vm5 = vmor %vm378_vm4, %vm379_vm3 }
 0x780   :  { %v375_v2 = vsub.f32 1.0, %v374_v1 }
 0x782   :  { %v376_v3 = vmul.f32 %v1998_v0, %v375_v2 }
 0x784   :  { %v377_v4 = vadd.f32 %v1998_v0, %v376_v3 }
 0x786   :  { %v381_v17 = vsel %vm380_vm5, %v1998_v0, %v377_v4 }
 0x787   :  { %v386_v9 = vsel %vm383_vm8, %v385_v7, %v381_v17 }
 0x788   :  { %v394_v13 = vmul.f32 %v392_v12, %v386_v9 }
 0x7cd   :  { %v397_v8 = vpop.permute.xlu2 %396 }
 0x7ce   :  { %v399_v10 = vmul.f32 %v397_v8, %v386_v9 }
 0x7d0   :  { %401 = vrot.lane.b32.xlu1 %v399_v10, %s2037_s5 }
 0x842   :  { %v402_v15 = vpop.permute.xlu1 %401 }
 0x843   :  { %v404_v16 = vadd.f32 %v402_v15, %v394_v13 }
 0x845   :  { %1999 = vtanh.f32 %v404_v16  ;;  %v421_v18 = vrot.slane %v404_v16, 6 }
 0x847   :  { %422 = vrot.lane.b32.xlu1 %v421_v18, %s2038_s15 }
 0x84b   :  { %v2000_v20 = vpop.eup %1999 }
 0x84c   :  { %407 = vrot.lane.b32.xlu2 %v2000_v20, %s2036_s14 }
 0x8a6   :  { %v408_v21 = vpop.permute.xlu2 %407 }
 0x8a7   :  { %v410_v22 = vmul.f32 %v408_v21, %v386_v9 }
 0x8a9   :  { %v415_v23 = vrot.slane %v410_v22, 6 }
 0x8ab   :  { %416 = vrot.lane.b32.xlu0 %v415_v23, %s2037_s5 }
 0x8b9   :  { %v423_v25 = vpop.permute.xlu1 %422 }
 0x8ba   :  { %v2238_v26 = vsel %vm413_vm9, %v423_v25, %v334_v52 }
 0x8bb   :  { %478 = vrot.lane.b32.xlu0 %v2238_v26, %s2037_s5 }
 0x91d   :  { %v417_v30 = vpop.permute.xlu0 %416 }
 0x91e   :  { %v419_v31 = vsel %vm413_vm9, %v417_v30, %v328_v55  ;;  %v2252_v32 = vsel %vm413_vm9, %v417_v30, 0.0 }
 0x91f   :  { %427 = vst.msk [vmem:[#allocation2 + $0x6] sm:$0x3] %vm154_vm6, %v2252_v32  ;;  %1840 = vmatmul.msk.f32.vlgmr.msrb.gmra.mxu2 %vm80_vm7, %v419_v31 }
 0x926   :  { %v788_v33 = vld [vmem:[#allocation2] sm:$0xff] }
 0x927   :  { %1854 = vmatmul.msk.f32.vlgmr.msrb.gmra.mxu0 %vm792_vm0, %v788_v33 }
 0x92d   :  { %v479_v54 = vpop.permute.xlu0 %478 }
 0x9a2   :  { %v453_v36 = vpop.f32.mrf.mxu2 }
 0x9a3   :  { %v456_v37 = vadd.f32 %v453_v36, %v2259_v35 }
 0x9a5   :  { %2001 = vtanh.f32 %v456_v37  ;;  %v1841_v39 = vmul.f32 -1.442695, %v456_v37 }
 0x9a7   :  { %2003 = vpow2.f32 %v1841_v39 }
 0x9ab   :  { %v2002_v38 = vpop.eup %2001 }
 0x9ac   :  { %483 = vrot.lane.b32.xlu2 %v2002_v38, %s2036_s14  ;;  %v1845_v38 = vld [vmem:[%s2764_s1 + $0xa] sm:$0x3] }
 0x9ad   :  { %v2004_v40 = vpop.eup %2003  ;;  %vm589_vm4 = vcmp.gt.f32.partialorder %v1845_v38, 0.5 }
 0x9ae   :  { %v460_v41 = vadd.f32 1.0, %v2004_v40 }
 0x9b0   :  { %2005 = vrcp.f32 %v460_v41  ;;  %v472_v14 = vand.u32 2147483648, %v460_v41  ;;  %vm466_vm11 = vweird.f32 %v460_v41  ;;  %v470_v48 = vand.u32 2147483647, %v460_v41 }
 0x9b2   :  { %v473_v50 = vor.u32 1.1754944e-38, %v472_v14  ;;  %vm471_vm13 = vcmp.eq.f32.partialorder %v470_v48, 8.507059e+37 }
 0x9b6   :  { %v2006_v42 = vpop.eup %2005 }
 0x9b7   :  { %v462_v43 = vmul.f32 %v2006_v42, %v460_v41  ;;  %vm467_vm10 = vweird.f32 %v2006_v42 }
 0x9b8   :  { %vm468_vm12 = vmor %vm466_vm11, %vm467_vm10 }
 0x9b9   :  { %v463_v44 = vsub.f32 1.0, %v462_v43 }
 0x9bb   :  { %v464_v45 = vmul.f32 %v2006_v42, %v463_v44 }
 0x9bd   :  { %v465_v47 = vadd.f32 %v2006_v42, %v464_v45 }
 0x9bf   :  { %v469_v49 = vsel %vm468_vm12, %v2006_v42, %v465_v47 }
 0x9c0   :  { %v474_v52 = vsel %vm471_vm13, %v473_v50, %v469_v49 }
 0x9c1   :  { %v481_v55 = vmul.f32 %v479_v54, %v474_v52 }
 0xa06   :  { %v484_v51 = vpop.permute.xlu2 %483 }
 0xa07   :  { %v486_v53 = vmul.f32 %v484_v51, %v474_v52 }
 0xa09   :  { %488 = vrot.lane.b32.xlu1 %v486_v53, %s2037_s5 }
 0xa7b   :  { %v489_v57 = vpop.permute.xlu1 %488 }
 0xa7c   :  { %v491_v58 = vadd.f32 %v489_v57, %v481_v55 }
 0xa7e   :  { %2007 = vtanh.f32 %v491_v58  ;;  %507 = vrot.lane.b32.xlu1 %v491_v58, %s2038_s15 }
 0xa84   :  { %v2008_v59 = vpop.eup %2007 }
 0xa85   :  { %494 = vrot.lane.b32.xlu2 %v2008_v59, %s2036_s14 }
 0xadf   :  { %v495_v60 = vpop.permute.xlu2 %494 }
 0xae0   :  { %v497_v61 = vmul.f32 %v495_v60, %v474_v52 }
 0xae2   :  { %502 = vrot.lane.b32.xlu0 %v497_v61, %s2037_s5 }
 0xaf0   :  { %v508_v63 = vpop.permute.xlu1 %507 }
 0xaf1   :  { %v510_v0 = vsel %vm500_vm14, %v508_v63, %v2238_v26 }
 0xaf2   :  { %v566_v1 = vrot.slane %v510_v0, 6 }
 0xaf4   :  { %567 = vrot.lane.b32.xlu0 %v566_v1, %s2037_s5 }
 0xb54   :  { %v503_v2 = vpop.permute.xlu0 %502 }
 0xb55   :  { %v505_v3 = vsel %vm500_vm14, %v503_v2, %v419_v31  ;;  %v2272_v4 = vsel %vm500_vm14, %v503_v2, 0.0 }
 0xb56   :  { %1843 = vmatmul.msk.f32.vlgmr.msrb.gmra.mxu3 %vm80_vm7, %v505_v3  ;;  %512 = vst.msk [vmem:[#allocation2 + $0x8] sm:$0x3] %vm154_vm6, %v2272_v4 }
 0xb66   :  { %v568_v27 = vpop.permute.xlu0 %567 }
 0xbd9   :  { %v538_v5 = vpop.f32.mrf.mxu3 }
 0xbda   :  { %v542_v6 = vrot.slane %v538_v5, 6 }
 0xbdc   :  { %v544_v17 = vadd.f32 %v542_v6, %v2259_v35 }
 0xbde   :  { %2009 = vtanh.f32 %v544_v17  ;;  %v1844_v8 = vmul.f32 -1.442695, %v544_v17 }
 0xbe0   :  { %2011 = vpow2.f32 %v1844_v8 }
 0xbe4   :  { %v2010_v7 = vpop.eup %2009 }
 0xbe5   :  { %572 = vrot.lane.b32.xlu2 %v2010_v7, %s2036_s14 }
 0xbe6   :  { %v2012_v9 = vpop.eup %2011 }
 0xbe7   :  { %v548_v10 = vadd.f32 1.0, %v2012_v9 }
 0xbe9   :  { %2013 = vrcp.f32 %v548_v10  ;;  %v560_v20 = vand.u32 2147483648, %v548_v10  ;;  %vm554_vm1 = vweird.f32 %v548_v10  ;;  %v558_v21 = vand.u32 2147483647, %v548_v10 }
 0xbeb   :  { %v561_v23 = vor.u32 1.1754944e-38, %v560_v20  ;;  %vm559_vm3 = vcmp.eq.f32.partialorder %v558_v21, 8.507059e+37 }
 0xbef   :  { %v2014_v12 = vpop.eup %2013 }
 0xbf0   :  { %v550_v13 = vmul.f32 %v2014_v12, %v548_v10  ;;  %vm555_vm15 = vweird.f32 %v2014_v12  ;;  %v1848_v10 = vld [vmem:[%s2764_s1 + $0xc] sm:$0x3] }
 0xbf1   :  { %vm556_vm2 = vmor %vm554_vm1, %vm555_vm15  ;;  %vm680_vm11 = vcmp.gt.f32.partialorder %v1848_v10, 0.5  ;;  %vm905_vm1 = vcmask 97280  }
 0xbf2   :  { %v551_v15 = vsub.f32 1.0, %v550_v13 }
 0xbf4   :  { %v552_v16 = vmul.f32 %v2014_v12, %v551_v15 }
 0xbf6   :  { %v553_v18 = vadd.f32 %v2014_v12, %v552_v16 }
 0xbf8   :  { %v557_v22 = vsel %vm556_vm2, %v2014_v12, %v553_v18  ;;  %vm907_vm2 = vcmask 93184  }
 0xbf9   :  { %v562_v25 = vsel %vm559_vm3, %v561_v23, %v557_v22  ;;  %vm969_vm3 = vcmask 1041409  }
 0xbfa   :  { %v570_v28 = vmul.f32 %v568_v27, %v562_v25 }
 0xc3f   :  { %v573_v24 = vpop.permute.xlu2 %572 }
 0xc40   :  { %v575_v26 = vmul.f32 %v573_v24, %v562_v25 }
 0xc42   :  { %577 = vrot.lane.b32.xlu1 %v575_v26, %s2037_s5 }
 0xcb4   :  { %v578_v29 = vpop.permute.xlu1 %577 }
 0xcb5   :  { %v580_v30 = vadd.f32 %v578_v29, %v570_v28 }
 0xcb7   :  { %2015 = vtanh.f32 %v580_v30  ;;  %v597_v31 = vrot.slane %v580_v30, 2 }
 0xcb9   :  { %598 = vrot.lane.b32.xlu1 %v597_v31, %s2038_s15 }
 0xcbd   :  { %v2016_v33 = vpop.eup %2015 }
 0xcbe   :  { %583 = vrot.lane.b32.xlu2 %v2016_v33, %s2036_s14 }
 0xd18   :  { %v584_v34 = vpop.permute.xlu2 %583 }
 0xd19   :  { %v586_v36 = vmul.f32 %v584_v34, %v562_v25 }
 0xd1b   :  { %v591_v37 = vrot.slane %v586_v36, 2 }
 0xd1d   :  { %592 = vrot.lane.b32.xlu0 %v591_v37, %s2037_s5 }
 0xd2b   :  { %v599_v39 = vpop.permute.xlu1 %598 }
 0xd2c   :  { %v601_v40 = vsel %vm589_vm4, %v599_v39, %v510_v0 }
 0xd2d   :  { %v657_v41 = vrot.slane %v601_v40, 4 }
 0xd2f   :  { %658 = vrot.lane.b32.xlu0 %v657_v41, %s2037_s5 }
 0xd8f   :  { %v593_v42 = vpop.permute.xlu0 %592 }
 0xd90   :  { %v595_v43 = vsel %vm589_vm4, %v593_v42, %v505_v3  ;;  %v2287_v44 = vsel %vm589_vm4, %v593_v42, 0.0 }
 0xd91   :  { %1846 = vmatmul.msk.f32.vlgmr.msra.gmra.mxu1 %vm80_vm7, %v595_v43  ;;  %603 = vst.msk [vmem:[#allocation2 + $0xa] sm:$0x3] %vm154_vm6, %v2287_v44 }
 0xda1   :  { %v659_v1 = vpop.permute.xlu0 %658 }
 0xe0e   :  { %v629_v45 = vpop.f32.mrf.mxu1 }
 0xe0f   :  { %v633_v47 = vrot.slane %v629_v45, 4 }
 0xe11   :  { %v635_v14 = vadd.f32 %v633_v47, %v2259_v35 }
 0xe13   :  { %2017 = vtanh.f32 %v635_v14  ;;  %v1847_v49 = vmul.f32 -1.442695, %v635_v14 }
 0xe15   :  { %2019 = vpow2.f32 %v1847_v49 }
 0xe19   :  { %v2018_v48 = vpop.eup %2017 }
 0xe1a   :  { %663 = vrot.lane.b32.xlu2 %v2018_v48, %s2036_s14 }
 0xe1b   :  { %v2020_v50 = vpop.eup %2019 }
 0xe1c   :  { %v639_v51 = vadd.f32 1.0, %v2020_v50 }
 0xe1e   :  { %2021 = vrcp.f32 %v639_v51  ;;  %v651_v58 = vand.u32 2147483648, %v639_v51  ;;  %vm645_vm8 = vweird.f32 %v639_v51  ;;  %v649_v59 = vand.u32 2147483647, %v639_v51 }
 0xe20   :  { %v652_v61 = vor.u32 1.1754944e-38, %v651_v58  ;;  %vm650_vm10 = vcmp.eq.f32.partialorder %v649_v59, 8.507059e+37 }
 0xe24   :  { %v2022_v52 = vpop.eup %2021 }
 0xe25   :  { %v641_v53 = vmul.f32 %v2022_v52, %v639_v51  ;;  %vm646_vm5 = vweird.f32 %v2022_v52  ;;  %v1851_v51 = vld [vmem:[%s2764_s1 + $0xe] sm:$0x3] }
 0xe26   :  { %vm647_vm9 = vmor %vm645_vm8, %vm646_vm5  ;;  %vm771_vm15 = vcmp.gt.f32.partialorder %v1851_v51, 0.5 }
 0xe27   :  { %v642_v54 = vsub.f32 1.0, %v641_v53 }
 0xe29   :  { %v643_v55 = vmul.f32 %v2022_v52, %v642_v54 }
 0xe2b   :  { %v644_v57 = vadd.f32 %v2022_v52, %v643_v55  ;;  %v787_v55 = vld [vmem:[%s2765_s6 + $0x18] sm:$0xff] }
 0xe2c   :  { %813 = vmatpush.msra.mxu3 %v787_v55 }
 0xe2d   :  { %v648_v60 = vsel %vm647_vm9, %v2022_v52, %v644_v57  ;;  %v786_v57 = vld [vmem:[%s2765_s6 + $0x10] sm:$0xff] }
 0xe2e   :  { %v653_v63 = vsel %vm650_vm10, %v652_v61, %v648_v60  ;;  %814 = vmatpush.msra.mxu3 %v786_v57  ;;  %v876_v60 = vlaneseq }
 0xe2f   :  { %v661_v2 = vmul.f32 %v659_v1, %v653_v63  ;;  %v845_v1 = vpop.f32.mrf.mxu0 }
 0xe30   :  { %v2332_v61 = vshrl.u32 %v876_v60, 7 }
 0xe32   :  { %1939 = vset.pattern.permute.xlu1 %v2332_v61  ;;  %1937 = vset.pattern.permute.xlu2 %v2332_v61 }
 0xe74   :  { %v664_v62 = vpop.permute.xlu2 %663 }
 0xe75   :  { %v666_v0 = vmul.f32 %v664_v62, %v653_v63  ;;  %v2337_v62 = vadd.s32 8, %v2332_v61 }
 0xe77   :  { %668 = vrot.lane.b32.xlu1 %v666_v0, %s2037_s5  ;;  %1938 = vset.pattern.permute.xlu0 %v2337_v62  ;;  %v2348_v0 = vld [vmem:[%s2766_s7] ss:$0 sm:$0xff] }
 0xee9   :  { %v669_v3 = vpop.permute.xlu1 %668 }
 0xeea   :  { %v671_v5 = vadd.f32 %v669_v3, %v661_v2 }
 0xeec   :  { %2023 = vtanh.f32 %v671_v5  ;;  %v688_v6 = vrot.slane %v671_v5, 4 }
 0xeee   :  { %689 = vrot.lane.b32.xlu1 %v688_v6, %s2038_s15 }
 0xef2   :  { %v2024_v17 = vpop.eup %2023 }
 0xef3   :  { %674 = vrot.lane.b32.xlu2 %v2024_v17, %s2036_s14 }
 0xf4d   :  { %v675_v7 = vpop.permute.xlu2 %674 }
 0xf4e   :  { %v677_v8 = vmul.f32 %v675_v7, %v653_v63  ;;  %v2343_v63 = vld [vmem:[%s2767_s8 + $0x8] sm:$0xf] }
 0xf4f   :  { %v859_v5 = vperm.slane %v2343_v63, 2 }
 0xf50   :  { %v682_v9 = vrot.slane %v677_v8, 4 }
 0xf52   :  { %683 = vrot.lane.b32.xlu0 %v682_v9, %s2037_s5 }
 0xf60   :  { %v690_v12 = vpop.permute.xlu1 %689 }
 0xf61   :  { %v692_v13 = vsel %vm680_vm11, %v690_v12, %v601_v40 }
 0xf62   :  { %v748_v15 = vrot.slane %v692_v13, 2 }
 0xf64   :  { %749 = vrot.lane.b32.xlu0 %v748_v15, %s2037_s5 }
 0xfc4   :  { %v684_v16 = vpop.permute.xlu0 %683 }
 0xfc5   :  { %v686_v18 = vsel %vm680_vm11, %v684_v16, %v595_v43  ;;  %v693_v20 = vsel %vm680_vm11, %v684_v16, 0.0 }
 0xfc6   :  { %1849 = vmatmul.msk.f32.vlgmr.msra.gmra.mxu2 %vm80_vm7, %v686_v18  ;;  %694 = vst.msk [vmem:[#allocation2 + $0xc] sm:$0x3] %vm154_vm6, %v693_v20  ;;  %v2373_v18 = vld [vmem:[%s2767_s8] sm:$0xff] }
 0xfd6   :  { %v750_v41 = vpop.permute.xlu0 %749 }
0x1049   :  { %v720_v21 = vpop.f32.mrf.mxu2 }
0x104a   :  { %v724_v22 = vrot.slane %v720_v21, 2 }
0x104c   :  { %v726_v23 = vadd.f32 %v724_v22, %v2259_v35 }
0x104e   :  { %2025 = vtanh.f32 %v726_v23  ;;  %v1850_v25 = vmul.f32 -1.442695, %v726_v23 }
0x1050   :  { %2027 = vpow2.f32 %v1850_v25 }
0x1054   :  { %v2026_v24 = vpop.eup %2025 }
0x1055   :  { %754 = vrot.lane.b32.xlu2 %v2026_v24, %s2036_s14 }
0x1056   :  { %v2028_v26 = vpop.eup %2027 }
0x1057   :  { %v730_v27 = vadd.f32 1.0, %v2028_v26 }
0x1059   :  { %2029 = vrcp.f32 %v730_v27  ;;  %v742_v34 = vand.u32 2147483648, %v730_v27  ;;  %vm736_vm12 = vweird.f32 %v730_v27  ;;  %v740_v36 = vand.u32 2147483647, %v730_v27 }
0x105b   :  { %v743_v37 = vor.u32 1.1754944e-38, %v742_v34  ;;  %vm741_vm14 = vcmp.eq.f32.partialorder %v740_v36, 8.507059e+37 }
0x105f   :  { %v2030_v28 = vpop.eup %2029 }
0x1060   :  { %v732_v29 = vmul.f32 %v2030_v28, %v730_v27  ;;  %vm737_vm7 = vweird.f32 %v2030_v28 }
0x1061   :  { %vm738_vm13 = vmor %vm736_vm12, %vm737_vm7 }
0x1062   :  { %v733_v30 = vsub.f32 1.0, %v732_v29 }
0x1064   :  { %v734_v31 = vmul.f32 %v2030_v28, %v733_v30 }
0x1066   :  { %v735_v33 = vadd.f32 %v2030_v28, %v734_v31 }
0x1068   :  { %v739_v35 = vsel %vm738_vm13, %v2030_v28, %v735_v33 }
0x1069   :  { %v744_v39 = vsel %vm741_vm14, %v743_v37, %v739_v35 }
0x106a   :  { %v752_v42 = vmul.f32 %v750_v41, %v744_v39 }
0x10af   :  { %v755_v38 = vpop.permute.xlu2 %754 }
0x10b0   :  { %v757_v40 = vmul.f32 %v755_v38, %v744_v39 }
0x10b2   :  { %759 = vrot.lane.b32.xlu1 %v757_v40, %s2037_s5 }
0x10ba   :  { %514 = vrot.lane.b32.xlu1 %v2272_v4, %s2039_s3 }
0x1124   :  { %v760_v43 = vpop.permute.xlu1 %759 }
0x1125   :  { %v762_v45 = vadd.f32 %v760_v43, %v752_v42 }
0x1127   :  { %2031 = vtanh.f32 %v762_v45 }
0x112c   :  { %v515_v47 = vpop.permute.xlu1 %514 }
0x112d   :  { %v2032_v14 = vpop.eup %2031  ;;  %517 = vst.msk [vmem:[#allocation3 + $0x6] sm:$0x3] %vm154_vm6, %v515_v47 }
0x112e   :  { %765 = vrot.lane.b32.xlu2 %v2032_v14, %s2036_s14 }
0x1136   :  { %605 = vrot.lane.b32.xlu2 %v2287_v44, %s2039_s3 }
0x1188   :  { %v766_v48 = vpop.permute.xlu2 %765 }
0x1189   :  { %v768_v49 = vmul.f32 %v766_v48, %v744_v39 }
0x118b   :  { %v773_v50 = vrot.slane %v768_v49, 6 }
0x118d   :  { %774 = vrot.lane.b32.xlu0 %v773_v50, %s2037_s5 }
0x1190   :  { %v606_v4 = vpop.permute.xlu2 %605 }
0x1191   :  { %608 = vst.msk [vmem:[#allocation3 + $0x4] sm:$0x3] %vm154_vm6, %v606_v4 }
0x1195   :  { %696 = vrot.lane.b32.xlu0 %v693_v20, %s2039_s3 }
0x11ff   :  { %v775_v52 = vpop.permute.xlu0 %774 }
0x1200   :  { %v777_v53 = vsel %vm771_vm15, %v775_v52, 0.0 }
0x1201   :  { %778 = vst.msk [vmem:[#allocation2 + $0xe] sm:$0x3] %vm154_vm6, %v777_v53  ;;  %780 = vrot.lane.b32.xlu1 %v777_v53, %s2039_s3 }
0x1207   :  { %v697_v44 = vpop.permute.xlu0 %696 }
0x1208   :  { %699 = vst.msk [vmem:[#allocation3 + $0x2] sm:$0x3] %vm154_vm6, %v697_v44  ;;  %v789_v54 = vld [vmem:[#allocation2 + $0x8] sm:$0xff] }
0x1209   :  { %1855 = vmatmul.msk.f32.vlgmr.msrb.gmra.mxu1 %vm792_vm0, %v789_v54 }
0x1273   :  { %v781_v58 = vpop.permute.xlu1 %780 }
0x1274   :  { %783 = vst.msk [vmem:[#allocation3] sm:$0x3] %vm154_vm6, %v781_v58 }
0x127b   :  { %v790_v59 = vld [vmem:[#allocation3] sm:$0xff] }
0x127c   :  { %1852 = vmatmul.msk.f32.vlgmr.msra.gmra.mxu3 %vm792_vm0, %v790_v59 }
0x12ff   :  { %v816_v2 = vpop.f32.mrf.mxu3 }
0x1300   :  { %v846_v3 = vadd.f32 %v845_v1, %v816_v2 }
0x1302   :  { %v855_v6 = vadd.f32 %v2348_v0, %v846_v3 }
0x1304   :  { %862 = vst [vmem:[#allocation1] sm:$0xff] %v855_v6  ;;  %v2352_v17 = vadd.f32 %v859_v5, %v855_v6 }
0x1306   :  { %v888_v7 = vperm.slane %v2352_v17, 1  ;;  %v875_v8 = vperm.slane %v2352_v17, 0 }
0x1308   :  { %893 = vperm.xlu1 %1939, %v888_v7   ;;  %886 = vperm.xlu0 %1938, %v875_v8  }
0x1309   :  { %880 = vperm.xlu2 %1937, %v875_v8  }
0x130b   :  { %v864_v9 = vld [vmem:[#allocation1 + $0x2] ss:$9 sm:$0xff] }
0x130c   :  { %v866_v10 = vld [vmem:[#allocation1 + $0x3] ss:$9 sm:$0xff]  ;;  %v867_v15 = vperm.slane %v864_v9, 0 }
0x130d   :  { %977 = vst [vmem:[#allocation1] sm:$0xff] %v855_v6  ;;  %v868_v16 = vperm.slane %v866_v10, 0 }
0x130e   :  { %v871_v20 = vadd.f32 %v867_v15, %v2373_v18 }
0x130f   :  { %v874_v21 = vadd.f32 %v868_v16, %v2343_v63  ;;  %v873_v23 = vadd.f32 %v868_v16, %v2373_v18 }
0x1310   :  { %157 = vrot.lane.b32.xlu1 %v2188_v46, %s2039_s3  ;;  %338 = vrot.lane.b32.xlu0 %v2224_v56, %s2039_s3 }
0x1311   :  { %1940 = vset.pattern.permute.xlu2 %v2337_v62 }
0x1314   :  { %v2361_v12 = vld [vmem:[#allocation1 + $0x4] ss:$9 sm:$0xff] }
0x1315   :  { %v2363_v13 = vld [vmem:[#allocation1 + $0x5] ss:$9 sm:$0xff] }
0x1316   :  { %1084 = vst [vmem:[#allocation1] sm:$0xff] %v855_v6 }
0x1318   :  { %429 = vrot.lane.b32.xlu1 %v2252_v32, %s2039_s3 }
0x1319   :  { %899 = vperm.xlu2 %1940, %v888_v7  }
0x1321   :  { %247 = vrot.lane.b32.xlu2 %v2208_v19, %s2039_s3  ;;  %v872_v19 = vadd.f32 %v867_v15, %v2343_v63 }
0x1322   :  { %1941 = vset.pattern.permute.xlu2 %v2332_v61 }
0x1363   :  { %v881_v46 = vpop.permute.xlu2 %880 }
0x1364   :  { %v901_v32 = vadd.f32 %v881_v46, %v871_v20 }
0x1366   :  { %v906_v29 = vsel %vm905_vm1, %v901_v32, -inf }
0x1373   :  { %v900_v56 = vpop.permute.xlu2 %899 }
0x1374   :  { %v904_v22 = vadd.f32 %v900_v56, %v874_v21 }
0x1376   :  { %v917_v30 = vsel %vm907_vm2, %v904_v22, -inf }
0x137a   :  { %v894_v24 = vpop.permute.xlu1 %893  ;;  %v887_v25 = vpop.permute.xlu0 %886 }
0x137b   :  { %v903_v26 = vadd.f32 %v894_v24, %v873_v23  ;;  %v902_v27 = vadd.f32 %v887_v25, %v872_v19  ;;  %v248_v28 = vpop.permute.xlu2 %247  ;;  %v982_v23 = vperm.slane %v2361_v12, 0  ;;  %v983_v19 = vperm.slane %v2363_v13, 0 }
0x137c   :  { %250 = vst.msk [vmem:[#allocation3 + $0xc] sm:$0x3] %vm154_vm6, %v248_v28 }
0x137d   :  { %v916_v31 = vsel %vm905_vm1, %v903_v26, -inf  ;;  %v908_v33 = vsel %vm907_vm2, %v902_v27, -inf  ;;  %v986_v24 = vadd.f32 %v982_v23, %v2373_v18  ;;  %v987_v28 = vadd.f32 %v982_v23, %v2343_v63 }
0x137e   :  { %v918_v34 = vmax.f32 %v916_v31, %v917_v30  ;;  %v909_v36 = vmax.f32 %v906_v29, %v908_v33  ;;  %v988_v31 = vadd.f32 %v983_v19, %v2373_v18 }
0x1380   :  { %v919_v35 = vrot.slane %v918_v34, 4  ;;  %v910_v37 = vrot.slane %v909_v36, 4 }
0x1382   :  { %v920_v38 = vmax.f32 %v918_v34, %v919_v35  ;;  %v911_v39 = vmax.f32 %v909_v36, %v910_v37  ;;  %v158_v40 = vpop.permute.xlu1 %157  ;;  %v339_v41 = vpop.permute.xlu0 %338 }
0x1383   :  { %160 = vst.msk [vmem:[#allocation3 + $0xe] sm:$0x3] %vm154_vm6, %v158_v40 }
0x1384   :  { %v921_v42 = vrot.slane %v920_v38, 2  ;;  %v912_v43 = vrot.slane %v911_v39, 2  ;;  %341 = vst.msk [vmem:[#allocation3 + $0xa] sm:$0x3] %vm154_vm6, %v339_v41 }
0x1386   :  { %v922_v45 = vmax.f32 %v920_v38, %v921_v42  ;;  %v913_v47 = vmax.f32 %v911_v39, %v912_v43 }
0x1388   :  { %v923_v14 = vrot.slane %v922_v45, 1  ;;  %v914_v48 = vrot.slane %v913_v47, 1 }
0x138a   :  { %v924_v49 = vmax.f32 %v922_v45, %v923_v14  ;;  %v915_v50 = vmax.f32 %v913_v47, %v914_v48  ;;  %v430_v4 = vpop.permute.xlu1 %429 }
0x138b   :  { %432 = vst.msk [vmem:[#allocation3 + $0x8] sm:$0x3] %vm154_vm6, %v430_v4 }
0x138c   :  { %vm930_vm4 = vcmp.ge.f32.partialorder %v903_v26, %v924_v49  ;;  %vm931_vm5 = vcmp.ge.f32.partialorder %v904_v22, %v924_v49  ;;  %vm928_vm8 = vcmp.ge.f32.partialorder %v901_v32, %v915_v50  ;;  %vm929_vm9 = vcmp.ge.f32.partialorder %v902_v27, %v915_v50  ;;  %1000 = vperm.xlu0 %1938, %v915_v50  }
0x138d   :  { %v934_v51 = vsel %vm930_vm4, %v2332_v61, 13  ;;  %v935_v52 = vsel %vm931_vm5, %v2337_v62, 13  ;;  %v932_v53 = vsel %vm928_vm8, %v2332_v61, 13  ;;  %v933_v44 = vsel %vm929_vm9, %v2337_v62, 13  ;;  %994 = vperm.xlu2 %1941, %v915_v50   ;;  %1006 = vperm.xlu1 %1939, %v924_v49  }
0x138e   :  { %v949_v54 = vsel %vm905_vm1, %v934_v51, 2147483647  ;;  %v950_v55 = vsel %vm907_vm2, %v935_v52, 2147483647  ;;  %v936_v57 = vsel %vm905_vm1, %v932_v53, 2147483647  ;;  %v2395_v58 = vsel %vm969_vm3, %v924_v49, %v915_v50 }
0x138f   :  { %vm951_vm6 = vcmp.lt.s32.totalorder %v949_v54, %v950_v55  ;;  %v937_v59 = vsel %vm907_vm2, %v933_v44, 2147483647  ;;  %v989_v26 = vadd.f32 %v983_v19, %v2343_v63 }
0x1390   :  { %v952_v1 = vsel %vm951_vm6, %v949_v54, %v950_v55  ;;  %vm938_vm10 = vcmp.lt.s32.totalorder %v936_v57, %v937_v59 }
0x1391   :  { %v953_v2 = vrot.slane %v952_v1, 4  ;;  %v939_v3 = vsel %vm938_vm10, %v936_v57, %v937_v59 }
0x1392   :  { %v940_v5 = vrot.slane %v939_v3, 4  ;;  %v791_v6 = vld [vmem:[#allocation3 + $0x8] sm:$0xff] }
0x1393   :  { %vm954_vm11 = vcmp.lt.s32.totalorder %v952_v1, %v953_v2  ;;  %1853 = vmatmul.msk.f32.gmra.mxu3 %vm792_vm0, %v791_v6 }
0x1394   :  { %v955_v7 = vsel %vm954_vm11, %v952_v1, %v953_v2  ;;  %vm941_vm7 = vcmp.lt.s32.totalorder %v939_v3, %v940_v5  ;;  %1943 = vset.pattern.permute.xlu0 %v2332_v61 }
0x1395   :  { %v956_v8 = vrot.slane %v955_v7, 2  ;;  %v942_v9 = vsel %vm941_vm7, %v939_v3, %v940_v5  ;;  %1942 = vset.pattern.permute.xlu2 %v2337_v62  ;;  %1944 = vset.pattern.permute.xlu1 %v2337_v62 }
0x1396   :  { %v943_v10 = vrot.slane %v942_v9, 2 }
0x1397   :  { %vm957_vm12 = vcmp.lt.s32.totalorder %v955_v7, %v956_v8 }
0x1398   :  { %vm944_vm13 = vcmp.lt.s32.totalorder %v942_v9, %v943_v10  ;;  %v958_v46 = vsel %vm957_vm12, %v955_v7, %v956_v8  ;;  %v848_v7 = vpop.f32.mrf.mxu1 }
0x1399   :  { %v945_v15 = vsel %vm944_vm13, %v942_v9, %v943_v10  ;;  %v959_v16 = vrot.slane %v958_v46, 1 }
0x139a   :  { %v946_v56 = vrot.slane %v945_v15, 1 }
0x139b   :  { %vm960_vm14 = vcmp.lt.s32.totalorder %v958_v46, %v959_v16 }
0x139c   :  { %vm947_vm15 = vcmp.lt.s32.totalorder %v945_v15, %v946_v56  ;;  %v961_v20 = vsel %vm960_vm14, %v958_v46, %v959_v16 }
0x139d   :  { %1012 = vperm.xlu2 %1942, %v924_v49   ;;  %v948_v21 = vsel %vm947_vm15, %v945_v15, %v946_v56 }
0x139e   :  { %v2403_v32 = vsel %vm969_vm3, %v961_v20, %v948_v21  ;;  %v1088_v21 = vld [vmem:[#allocation1 + $0x7] ss:$9 sm:$0xff] }
0x13a5   :  { %1945 = vset.pattern.permute.xlu2 %v2332_v61 }
0x13e7   :  { %v995_v22 = vpop.permute.xlu2 %994 }
0x13e8   :  { %v1014_v27 = vadd.f32 %v995_v22, %v986_v24  ;;  %v1086_v22 = vld [vmem:[#allocation1 + $0x6] ss:$9 sm:$0xff] }
0x13ea   :  { %v1018_v35 = vsel %vm905_vm1, %v1014_v27, -inf }
0x13f7   :  { %v1013_v25 = vpop.permute.xlu2 %1012 }
0x13f8   :  { %v1017_v29 = vadd.f32 %v1013_v25, %v989_v26 }
0x13fa   :  { %v1028_v13 = vsel %vm907_vm2, %v1017_v29, -inf }
0x13fe   :  { %v1001_v30 = vpop.permute.xlu0 %1000 }
0x13ff   :  { %v1015_v33 = vadd.f32 %v1001_v30, %v987_v28  ;;  %v1007_v34 = vpop.permute.xlu1 %1006 }
0x1400   :  { %v1016_v36 = vadd.f32 %v1007_v34, %v988_v31 }
0x1401   :  { %v1019_v12 = vsel %vm907_vm2, %v1015_v33, -inf }
0x1402   :  { %v1020_v37 = vmax.f32 %v1018_v35, %v1019_v12  ;;  %v1027_v38 = vsel %vm905_vm1, %v1016_v36, -inf }
0x1403   :  { %v1029_v39 = vmax.f32 %v1027_v38, %v1028_v13  ;;  %v1090_v13 = vperm.slane %v1088_v21, 0 }
0x1404   :  { %v1021_v40 = vrot.slane %v1020_v37, 4 }
0x1405   :  { %v1030_v41 = vrot.slane %v1029_v39, 4 }
0x1406   :  { %v1022_v42 = vmax.f32 %v1020_v37, %v1021_v40 }
0x1407   :  { %v1031_v43 = vmax.f32 %v1029_v39, %v1030_v41 }
0x1408   :  { %v1023_v45 = vrot.slane %v1022_v42, 2 }
0x1409   :  { %v1032_v47 = vrot.slane %v1031_v43, 2 }
0x140a   :  { %v1024_v14 = vmax.f32 %v1022_v42, %v1023_v45 }
0x140b   :  { %v1033_v48 = vmax.f32 %v1031_v43, %v1032_v47  ;;  %v1095_v43 = vadd.f32 %v1090_v13, %v2373_v18 }
0x140c   :  { %v1025_v49 = vrot.slane %v1024_v14, 1 }
0x140d   :  { %v1034_v50 = vrot.slane %v1033_v48, 1 }
0x140e   :  { %v1026_v4 = vmax.f32 %v1024_v14, %v1025_v49  ;;  %v1096_v14 = vadd.f32 %v1090_v13, %v2343_v63 }
0x140f   :  { %v1035_v51 = vmax.f32 %v1033_v48, %v1034_v50 }
0x1410   :  { %vm1036_vm0 = vcmp.ge.f32.partialorder %v1014_v27, %v1026_v4  ;;  %vm1037_vm4 = vcmp.ge.f32.partialorder %v1015_v33, %v1026_v4  ;;  %1107 = vperm.xlu1 %1944, %v1026_v4   ;;  %1101 = vperm.xlu0 %1943, %v1026_v4   ;;  %v1089_v33 = vperm.slane %v1086_v22, 0 }
0x1411   :  { %v1040_v52 = vsel %vm1036_vm0, %v2332_v61, 13  ;;  %v1041_v53 = vsel %vm1037_vm4, %v2337_v62, 13  ;;  %vm1038_vm5 = vcmp.ge.f32.partialorder %v1016_v36, %v1035_v51  ;;  %vm1039_vm8 = vcmp.ge.f32.partialorder %v1017_v29, %v1035_v51  ;;  %1113 = vperm.xlu2 %1945, %v1035_v51  }
0x1412   :  { %v1044_v44 = vsel %vm905_vm1, %v1040_v52, 2147483647  ;;  %v1045_v54 = vsel %vm907_vm2, %v1041_v53, 2147483647  ;;  %v1042_v55 = vsel %vm1038_vm5, %v2332_v61, 13  ;;  %v1043_v57 = vsel %vm1039_vm8, %v2337_v62, 13 }
0x1413   :  { %vm1046_vm9 = vcmp.lt.s32.totalorder %v1044_v44, %v1045_v54  ;;  %v1057_v59 = vsel %vm905_vm1, %v1042_v55, 2147483647  ;;  %v1058_v1 = vsel %vm907_vm2, %v1043_v57, 2147483647  ;;  %v2425_v2 = vsel %vm969_vm3, %v1035_v51, %v1026_v4 }
0x1414   :  { %v1047_v3 = vsel %vm1046_vm9, %v1044_v44, %v1045_v54  ;;  %vm1059_vm6 = vcmp.lt.s32.totalorder %v1057_v59, %v1058_v1  ;;  %v1094_v34 = vadd.f32 %v1089_v33, %v2343_v63  ;;  %v1093_v36 = vadd.f32 %v1089_v33, %v2373_v18 }
0x1415   :  { %v1048_v5 = vrot.slane %v1047_v3, 4  ;;  %v1060_v6 = vsel %vm1059_vm6, %v1057_v59, %v1058_v1 }
0x1416   :  { %v1061_v8 = vrot.slane %v1060_v6, 4  ;;  %v819_v9 = vpop.f32.mrf.mxu3 }
0x1417   :  { %vm1049_vm10 = vcmp.lt.s32.totalorder %v1047_v3, %v1048_v5  ;;  %v849_v10 = vadd.f32 %v848_v7, %v819_v9 }
0x1418   :  { %v1050_v46 = vsel %vm1049_vm10, %v1047_v3, %v1048_v5  ;;  %vm1062_vm11 = vcmp.lt.s32.totalorder %v1060_v6, %v1061_v8  ;;  %1119 = vperm.xlu1 %1944, %v1035_v51   ;;  %1946 = vset.pattern.permute.xlu0 %v2337_v62 }
0x1419   :  { %v1051_v15 = vrot.slane %v1050_v46, 2  ;;  %v1063_v16 = vsel %vm1062_vm11, %v1060_v6, %v1061_v8  ;;  %v2429_v56 = vadd.f32 %v2348_v0, %v849_v10 }
0x141a   :  { %v1064_v20 = vrot.slane %v1063_v16, 2 }
0x141b   :  { %1295 = vst [vmem:[#allocation1] sm:$0xff] %v2429_v56  ;;  %vm1052_vm7 = vcmp.lt.s32.totalorder %v1050_v46, %v1051_v15 }
0x141c   :  { %v1053_v23 = vsel %vm1052_vm7, %v1050_v46, %v1051_v15  ;;  %vm1065_vm12 = vcmp.lt.s32.totalorder %v1063_v16, %v1064_v20 }
0x141d   :  { %v1054_v19 = vrot.slane %v1053_v23, 1  ;;  %v1066_v24 = vsel %vm1065_vm12, %v1063_v16, %v1064_v20 }
0x141e   :  { %v1067_v25 = vrot.slane %v1066_v24, 1 }
0x141f   :  { %vm1055_vm13 = vcmp.lt.s32.totalorder %v1053_v23, %v1054_v19 }
0x1420   :  { %1947 = vset.pattern.permute.xlu1 %v2332_v61  ;;  %v1056_v26 = vsel %vm1055_vm13, %v1053_v23, %v1054_v19  ;;  %vm1068_vm14 = vcmp.lt.s32.totalorder %v1066_v24, %v1067_v25 }
0x1421   :  { %v1069_v28 = vsel %vm1068_vm14, %v1066_v24, %v1067_v25 }
0x1422   :  { %v2433_v27 = vld [vmem:[#allocation1 + $0x2] ss:$9 sm:$0xff]  ;;  %v2439_v29 = vsel %vm969_vm3, %v1069_v28, %v1056_v26 }
0x1423   :  { %v2435_v0 = vld [vmem:[#allocation1 + $0x3] ss:$9 sm:$0xff] }
0x1424   :  { %1402 = vst [vmem:[#allocation1] sm:$0xff] %v2429_v56 }
0x142b   :  { %v2441_v30 = vld [vmem:[#allocation1 + $0x4] ss:$9 sm:$0xff] }
0x142c   :  { %v2443_v31 = vld [vmem:[#allocation1 + $0x5] ss:$9 sm:$0xff] }
0x142d   :  { %1509 = vst [vmem:[#allocation1] sm:$0xff] %v2429_v56 }
0x146b   :  { %v1114_v41 = vpop.permute.xlu2 %1113 }
0x146c   :  { %v1123_v47 = vadd.f32 %v1114_v41, %v1095_v43 }
0x146e   :  { %v1134_v51 = vsel %vm905_vm1, %v1123_v47, -inf }
0x1482   :  { %v1108_v35 = vpop.permute.xlu1 %1107  ;;  %v1102_v12 = vpop.permute.xlu0 %1101 }
0x1483   :  { %v1122_v37 = vadd.f32 %v1108_v35, %v1094_v34  ;;  %v1121_v38 = vadd.f32 %v1102_v12, %v1093_v36 }
0x1485   :  { %v1126_v39 = vsel %vm907_vm2, %v1122_v37, -inf  ;;  %v1125_v40 = vsel %vm905_vm1, %v1121_v38, -inf }
0x1486   :  { %v1127_v42 = vmax.f32 %v1125_v40, %v1126_v39  ;;  %v1193_v39 = vperm.slane %v2429_v56, 0 }
0x1488   :  { %v1128_v45 = vrot.slane %v1127_v42, 4  ;;  %v1197_v41 = vadd.f32 %v1193_v39, %v2373_v18 }
0x148a   :  { %v1129_v48 = vmax.f32 %v1127_v42, %v1128_v45  ;;  %v1120_v49 = vpop.permute.xlu1 %1119  ;;  %v1192_v42 = vrot.slane %v2429_v56, 1  ;;  %v1198_v45 = vadd.f32 %v1193_v39, %v2343_v63 }
0x148b   :  { %v1124_v50 = vadd.f32 %v1120_v49, %v1096_v14 }
0x148c   :  { %v1130_v4 = vrot.slane %v1129_v48, 2  ;;  %v1194_v14 = vperm.slane %v1192_v42, 0 }
0x148d   :  { %v1135_v52 = vsel %vm907_vm2, %v1124_v50, -inf }
0x148e   :  { %v1131_v53 = vmax.f32 %v1129_v48, %v1130_v4  ;;  %v1136_v44 = vmax.f32 %v1134_v51, %v1135_v52  ;;  %v1200_v52 = vadd.f32 %v1194_v14, %v2343_v63 }
0x1490   :  { %v1132_v54 = vrot.slane %v1131_v53, 1  ;;  %v1137_v55 = vrot.slane %v1136_v44, 4 }
0x1492   :  { %v1133_v57 = vmax.f32 %v1131_v53, %v1132_v54  ;;  %v1138_v59 = vmax.f32 %v1136_v44, %v1137_v55  ;;  %v1199_v54 = vadd.f32 %v1194_v14, %v2373_v18 }
0x1494   :  { %vm1143_vm15 = vcmp.ge.f32.partialorder %v1121_v38, %v1133_v57  ;;  %vm1144_vm0 = vcmp.ge.f32.partialorder %v1122_v37, %v1133_v57  ;;  %v1139_v1 = vrot.slane %v1138_v59, 2  ;;  %1211 = vperm.xlu0 %1946, %v1133_v57   ;;  %1205 = vperm.xlu2 %1945, %v1133_v57  }
0x1495   :  { %v1147_v3 = vsel %vm1143_vm15, %v2332_v61, 13  ;;  %v1148_v5 = vsel %vm1144_vm0, %v2337_v62, 13 }
0x1496   :  { %v1151_v6 = vsel %vm905_vm1, %v1147_v3, 2147483647  ;;  %v1152_v7 = vsel %vm907_vm2, %v1148_v5, 2147483647  ;;  %v1140_v8 = vmax.f32 %v1138_v59, %v1139_v1 }
0x1497   :  { %vm1153_vm4 = vcmp.lt.s32.totalorder %v1151_v6, %v1152_v7 }
0x1498   :  { %v1154_v9 = vsel %vm1153_vm4, %v1151_v6, %v1152_v7  ;;  %v1141_v10 = vrot.slane %v1140_v8, 1 }
0x1499   :  { %v1155_v46 = vrot.slane %v1154_v9, 4 }
0x149a   :  { %v1142_v15 = vmax.f32 %v1140_v8, %v1141_v10 }
0x149b   :  { %vm1156_vm5 = vcmp.lt.s32.totalorder %v1154_v9, %v1155_v46 }
0x149c   :  { %v1157_v16 = vsel %vm1156_vm5, %v1154_v9, %v1155_v46  ;;  %vm1145_vm8 = vcmp.ge.f32.partialorder %v1123_v47, %v1142_v15  ;;  %vm1146_vm9 = vcmp.ge.f32.partialorder %v1124_v50, %v1142_v15  ;;  %1948 = vset.pattern.permute.xlu2 %v2337_v62  ;;  %1217 = vperm.xlu1 %1947, %v1142_v15  }
0x149d   :  { %v1158_v20 = vrot.slane %v1157_v16, 2  ;;  %v1149_v21 = vsel %vm1145_vm8, %v2332_v61, 13  ;;  %v1150_v22 = vsel %vm1146_vm9, %v2337_v62, 13  ;;  %1949 = vset.pattern.permute.xlu0 %v2332_v61  ;;  %v2463_v23 = vsel %vm969_vm3, %v1142_v15, %v1133_v57 }
0x149e   :  { %v1164_v19 = vsel %vm905_vm1, %v1149_v21, 2147483647  ;;  %v1165_v24 = vsel %vm907_vm2, %v1150_v22, 2147483647 }
0x149f   :  { %vm1166_vm6 = vcmp.lt.s32.totalorder %v1164_v19, %v1165_v24  ;;  %vm1159_vm10 = vcmp.lt.s32.totalorder %v1157_v16, %v1158_v20 }
0x14a0   :  { %v1167_v25 = vsel %vm1166_vm6, %v1164_v19, %v1165_v24  ;;  %v1160_v28 = vsel %vm1159_vm10, %v1157_v16, %v1158_v20 }
0x14a1   :  { %v1168_v26 = vrot.slane %v1167_v25, 4  ;;  %v1161_v36 = vrot.slane %v1160_v28, 1 }
0x14a3   :  { %vm1169_vm11 = vcmp.lt.s32.totalorder %v1167_v25, %v1168_v26  ;;  %vm1162_vm12 = vcmp.lt.s32.totalorder %v1160_v28, %v1161_v36 }
0x14a4   :  { %v1170_v33 = vsel %vm1169_vm11, %v1167_v25, %v1168_v26  ;;  %1223 = vperm.xlu2 %1948, %v1142_v15   ;;  %v1163_v13 = vsel %vm1162_vm12, %v1160_v28, %v1161_v36 }
0x14a5   :  { %v1171_v34 = vrot.slane %v1170_v33, 2 }
0x14a7   :  { %vm1172_vm7 = vcmp.lt.s32.totalorder %v1170_v33, %v1171_v34 }
0x14a8   :  { %v1173_v35 = vsel %vm1172_vm7, %v1170_v33, %v1171_v34 }
0x14a9   :  { %v1174_v12 = vrot.slane %v1173_v35, 1 }
0x14ab   :  { %vm1175_vm13 = vcmp.lt.s32.totalorder %v1173_v35, %v1174_v12 }
0x14ac   :  { %v1176_v37 = vsel %vm1175_vm13, %v1173_v35, %v1174_v12 }
0x14ad   :  { %v2468_v38 = vsel %vm969_vm3, %v1176_v37, %v1163_v13 }
0x14ee   :  { %v1206_v40 = vpop.permute.xlu2 %1205 }
0x14ef   :  { %v1225_v43 = vadd.f32 %v1206_v40, %v1197_v41 }
0x14f1   :  { %v1229_v49 = vsel %vm905_vm1, %v1225_v43, -inf }
0x14fe   :  { %v1224_v4 = vpop.permute.xlu2 %1223 }
0x14ff   :  { %v1228_v44 = vadd.f32 %v1224_v4, %v1200_v52 }
0x1501   :  { %v1239_v1 = vsel %vm907_vm2, %v1228_v44, -inf }
0x1506   :  { %v1212_v47 = vpop.permute.xlu0 %1211 }
0x1507   :  { %v1226_v48 = vadd.f32 %v1212_v47, %v1198_v45 }
0x1509   :  { %v1230_v50 = vsel %vm907_vm2, %v1226_v48, -inf }
0x150a   :  { %v1231_v51 = vmax.f32 %v1229_v49, %v1230_v50  ;;  %v1300_v50 = vperm.slane %v2433_v27, 0 }
0x150c   :  { %v1232_v53 = vrot.slane %v1231_v51, 4 }
0x150e   :  { %v1233_v55 = vmax.f32 %v1231_v51, %v1232_v53  ;;  %v1218_v56 = vpop.permute.xlu1 %1217  ;;  %v1305_v51 = vadd.f32 %v1300_v50, %v2343_v63  ;;  %v1304_v53 = vadd.f32 %v1300_v50, %v2373_v18 }
0x150f   :  { %v1227_v57 = vadd.f32 %v1218_v56, %v1199_v54 }
0x1510   :  { %v1234_v59 = vrot.slane %v1233_v55, 2 }
0x1511   :  { %v1238_v3 = vsel %vm905_vm1, %v1227_v57, -inf }
0x1512   :  { %v1235_v5 = vmax.f32 %v1233_v55, %v1234_v59  ;;  %v1240_v6 = vmax.f32 %v1238_v3, %v1239_v1  ;;  %v1301_v3 = vperm.slane %v2435_v0, 0 }
0x1514   :  { %v1236_v7 = vrot.slane %v1235_v5, 1  ;;  %v1241_v8 = vrot.slane %v1240_v6, 4 }
0x1516   :  { %v1237_v9 = vmax.f32 %v1235_v5, %v1236_v7  ;;  %v1242_v10 = vmax.f32 %v1240_v6, %v1241_v8  ;;  %v1306_v7 = vadd.f32 %v1301_v3, %v2373_v18 }
0x1518   :  { %vm1247_vm14 = vcmp.ge.f32.partialorder %v1225_v43, %v1237_v9  ;;  %vm1248_vm15 = vcmp.ge.f32.partialorder %v1226_v48, %v1237_v9  ;;  %v1243_v46 = vrot.slane %v1242_v10, 2  ;;  %1318 = vperm.xlu2 %1948, %v1237_v9   ;;  %1312 = vperm.xlu1 %1947, %v1237_v9  }
0x1519   :  { %v1251_v15 = vsel %vm1247_vm14, %v2332_v61, 13  ;;  %v1252_v16 = vsel %vm1248_vm15, %v2337_v62, 13 }
0x151a   :  { %v1255_v20 = vsel %vm905_vm1, %v1251_v15, 2147483647  ;;  %v1256_v21 = vsel %vm907_vm2, %v1252_v16, 2147483647  ;;  %v1244_v22 = vmax.f32 %v1242_v10, %v1243_v46  ;;  %v1307_v10 = vadd.f32 %v1301_v3, %v2343_v63 }
0x151b   :  { %vm1257_vm0 = vcmp.lt.s32.totalorder %v1255_v20, %v1256_v21 }
0x151c   :  { %v1258_v19 = vsel %vm1257_vm0, %v1255_v20, %v1256_v21  ;;  %v1245_v24 = vrot.slane %v1244_v22, 1 }
0x151d   :  { %v1259_v25 = vrot.slane %v1258_v19, 4 }
0x151e   :  { %v1246_v26 = vmax.f32 %v1244_v22, %v1245_v24 }
0x151f   :  { %vm1260_vm4 = vcmp.lt.s32.totalorder %v1258_v19, %v1259_v25 }
0x1520   :  { %v1261_v28 = vsel %vm1260_vm4, %v1258_v19, %v1259_v25  ;;  %vm1249_vm5 = vcmp.ge.f32.partialorder %v1227_v57, %v1246_v26  ;;  %vm1250_vm8 = vcmp.ge.f32.partialorder %v1228_v44, %v1246_v26  ;;  %1950 = vset.pattern.permute.xlu1 %v2337_v62  ;;  %1324 = vperm.xlu0 %1949, %v1246_v26  }
0x1521   :  { %v1262_v33 = vrot.slane %v1261_v28, 2  ;;  %v1253_v34 = vsel %vm1249_vm5, %v2332_v61, 13  ;;  %v1254_v36 = vsel %vm1250_vm8, %v2337_v62, 13  ;;  %1951 = vset.pattern.permute.xlu2 %v2332_v61  ;;  %v2489_v35 = vsel %vm969_vm3, %v1246_v26, %v1237_v9 }
0x1522   :  { %v1268_v12 = vsel %vm905_vm1, %v1253_v34, 2147483647  ;;  %v1269_v13 = vsel %vm907_vm2, %v1254_v36, 2147483647 }
0x1523   :  { %vm1270_vm9 = vcmp.lt.s32.totalorder %v1268_v12, %v1269_v13  ;;  %vm1263_vm6 = vcmp.lt.s32.totalorder %v1261_v28, %v1262_v33 }
0x1524   :  { %v1271_v37 = vsel %vm1270_vm9, %v1268_v12, %v1269_v13  ;;  %v1264_v40 = vsel %vm1263_vm6, %v1261_v28, %v1262_v33 }
0x1525   :  { %v1272_v39 = vrot.slane %v1271_v37, 4  ;;  %v1265_v43 = vrot.slane %v1264_v40, 1 }
0x1527   :  { %vm1273_vm10 = vcmp.lt.s32.totalorder %v1271_v37, %v1272_v39  ;;  %vm1266_vm7 = vcmp.lt.s32.totalorder %v1264_v40, %v1265_v43 }
0x1528   :  { %v1274_v41 = vsel %vm1273_vm10, %v1271_v37, %v1272_v39  ;;  %1330 = vperm.xlu1 %1950, %v1246_v26   ;;  %1952 = vset.pattern.permute.xlu0 %v2337_v62  ;;  %v1267_v14 = vsel %vm1266_vm7, %v1264_v40, %v1265_v43 }
0x1529   :  { %v1275_v42 = vrot.slane %v1274_v41, 2 }
0x152b   :  { %vm1276_vm11 = vcmp.lt.s32.totalorder %v1274_v41, %v1275_v42 }
0x152c   :  { %v1277_v45 = vsel %vm1276_vm11, %v1274_v41, %v1275_v42  ;;  %v1856_v41 = vld [vmem:[%s2764_s1 + $0x2] sm:$0x3] }
0x152d   :  { %v1278_v47 = vrot.slane %v1277_v45, 1  ;;  %vm963_vm9 = vcmp.gt.f32.partialorder %v1856_v41, 0.5 }
0x152f   :  { %vm1279_vm12 = vcmp.lt.s32.totalorder %v1277_v45, %v1278_v47 }
0x1530   :  { %v1280_v48 = vsel %vm1279_vm12, %v1277_v45, %v1278_v47 }
0x1531   :  { %v2495_v49 = vsel %vm969_vm3, %v1280_v48, %v1267_v14 }
0x1572   :  { %v1319_v4 = vpop.permute.xlu2 %1318 }
0x1573   :  { %v1333_v52 = vadd.f32 %v1319_v4, %v1305_v51  ;;  %v2040_v4 = vmov 0  }
0x1574   :  { %v964_v51 = vsel %vm963_vm9, 1, %v2040_v4 }
0x1575   :  { %v1337_v55 = vsel %vm907_vm2, %v1333_v52, -inf }
0x158a   :  { %v1313_v44 = vpop.permute.xlu1 %1312 }
0x158b   :  { %v1332_v54 = vadd.f32 %v1313_v44, %v1304_v53  ;;  %v1861_v44 = vld [vmem:[%s2764_s1 + $0xc] sm:$0x3] }
0x158c   :  { %vm1496_vm11 = vcmp.gt.f32.partialorder %v1861_v44, 0.5 }
0x158d   :  { %v1336_v56 = vsel %vm905_vm1, %v1332_v54, -inf }
0x158e   :  { %v1338_v57 = vmax.f32 %v1336_v56, %v1337_v55 }
0x1590   :  { %v1339_v59 = vrot.slane %v1338_v57, 4 }
0x1592   :  { %v1340_v1 = vmax.f32 %v1338_v57, %v1339_v59  ;;  %v1325_v27 = vpop.permute.xlu0 %1324  ;;  %v1497_v59 = vsel %vm1496_vm11, 1, %v2040_v4 }
0x1593   :  { %v1334_v9 = vadd.f32 %v1325_v27, %v1306_v7 }
0x1594   :  { %v1341_v5 = vrot.slane %v1340_v1, 2 }
0x1595   :  { %v1345_v21 = vsel %vm905_vm1, %v1334_v9, -inf }
0x1596   :  { %v1342_v6 = vmax.f32 %v1340_v1, %v1341_v5 }
0x1598   :  { %v1343_v8 = vrot.slane %v1342_v6, 1 }
0x159a   :  { %v1344_v46 = vmax.f32 %v1342_v6, %v1343_v8  ;;  %v1331_v15 = vpop.permute.xlu1 %1330  ;;  %v1407_v6 = vperm.slane %v2441_v30, 0 }
0x159b   :  { %v1335_v16 = vadd.f32 %v1331_v15, %v1307_v10 }
0x159c   :  { %vm1354_vm13 = vcmp.ge.f32.partialorder %v1332_v54, %v1344_v46  ;;  %vm1355_vm14 = vcmp.ge.f32.partialorder %v1333_v52, %v1344_v46  ;;  %1425 = vperm.xlu1 %1950, %v1344_v46   ;;  %1419 = vperm.xlu2 %1951, %v1344_v46   ;;  %v1411_v7 = vadd.f32 %v1407_v6, %v2373_v18 }
0x159d   :  { %v1358_v20 = vsel %vm1354_vm13, %v2332_v61, 13  ;;  %v1359_v0 = vsel %vm1355_vm14, %v2337_v62, 13  ;;  %v1346_v22 = vsel %vm907_vm2, %v1335_v16, -inf }
0x159e   :  { %v1362_v19 = vsel %vm905_vm1, %v1358_v20, 2147483647  ;;  %v1363_v24 = vsel %vm907_vm2, %v1359_v0, 2147483647  ;;  %v1347_v25 = vmax.f32 %v1345_v21, %v1346_v22  ;;  %v1408_v22 = vperm.slane %v2443_v31, 0 }
0x159f   :  { %vm1364_vm15 = vcmp.lt.s32.totalorder %v1362_v19, %v1363_v24 }
0x15a0   :  { %v1365_v26 = vsel %vm1364_vm15, %v1362_v19, %v1363_v24  ;;  %v1348_v28 = vrot.slane %v1347_v25, 4 }
0x15a1   :  { %v1366_v33 = vrot.slane %v1365_v26, 4 }
0x15a2   :  { %v1349_v34 = vmax.f32 %v1347_v25, %v1348_v28  ;;  %v1413_v25 = vadd.f32 %v1408_v22, %v2373_v18 }
0x15a3   :  { %vm1367_vm0 = vcmp.lt.s32.totalorder %v1365_v26, %v1366_v33 }
0x15a4   :  { %v1350_v36 = vrot.slane %v1349_v34, 2  ;;  %1954 = vset.pattern.permute.xlu1 %v2332_v61  ;;  %v1368_v13 = vsel %vm1367_vm0, %v1365_v26, %v1366_v33  ;;  %v1414_v33 = vadd.f32 %v1408_v22, %v2343_v63 }
0x15a5   :  { %v1369_v40 = vrot.slane %v1368_v13, 2 }
0x15a6   :  { %v1351_v12 = vmax.f32 %v1349_v34, %v1350_v36 }
0x15a7   :  { %vm1370_vm6 = vcmp.lt.s32.totalorder %v1368_v13, %v1369_v40 }
0x15a8   :  { %v1352_v37 = vrot.slane %v1351_v12, 1  ;;  %v1371_v52 = vsel %vm1370_vm6, %v1368_v13, %v1369_v40 }
0x15a9   :  { %v1372_v55 = vrot.slane %v1371_v52, 1 }
0x15aa   :  { %v1353_v39 = vmax.f32 %v1351_v12, %v1352_v37 }
0x15ab   :  { %vm1373_vm12 = vcmp.lt.s32.totalorder %v1371_v52, %v1372_v55 }
0x15ac   :  { %vm1356_vm4 = vcmp.ge.f32.partialorder %v1334_v9, %v1353_v39  ;;  %vm1357_vm5 = vcmp.ge.f32.partialorder %v1335_v16, %v1353_v39  ;;  %1437 = vperm.xlu0 %1952, %v1353_v39   ;;  %1431 = vperm.xlu2 %1951, %v1353_v39   ;;  %v2518_v45 = vsel %vm969_vm3, %v1353_v39, %v1344_v46 }
0x15ad   :  { %v1360_v42 = vsel %vm1356_vm4, %v2332_v61, 13  ;;  %v1361_v43 = vsel %vm1357_vm5, %v2337_v62, 13  ;;  %v1374_v3 = vsel %vm1373_vm12, %v1371_v52, %v1372_v55  ;;  %v1412_v9 = vadd.f32 %v1407_v6, %v2343_v63 }
0x15ae   :  { %v1375_v47 = vsel %vm905_vm1, %v1360_v42, 2147483647  ;;  %v1376_v14 = vsel %vm907_vm2, %v1361_v43, 2147483647 }
0x15af   :  { %vm1377_vm8 = vcmp.lt.s32.totalorder %v1375_v47, %v1376_v14 }
0x15b0   :  { %v1378_v48 = vsel %vm1377_vm8, %v1375_v47, %v1376_v14  ;;  %v1890_v14 = vcvt.s32.f32 %v2403_v32  ;;  %v1858_v32 = vld [vmem:[%s2764_s1 + $0x6] sm:$0x3] }
0x15b1   :  { %v1379_v50 = vrot.slane %v1378_v48, 4 }
0x15b3   :  { %vm1380_vm10 = vcmp.lt.s32.totalorder %v1378_v48, %v1379_v50 }
0x15b4   :  { %v1381_v53 = vsel %vm1380_vm10, %v1378_v48, %v1379_v50  ;;  %1953 = vset.pattern.permute.xlu0 %v2040_v4  ;;  %1955 = vset.pattern.permute.xlu2 %v2337_v62  ;;  %vm1178_vm10 = vcmp.gt.f32.partialorder %v1858_v32, 0.5 }
0x15b5   :  { %v1382_v54 = vrot.slane %v1381_v53, 2  ;;  %966 = vperm.xlu0 %1953, %v964_v51  }
0x15b7   :  { %vm1383_vm7 = vcmp.lt.s32.totalorder %v1381_v53, %v1382_v54 }
0x15b8   :  { %v1384_v56 = vsel %vm1383_vm7, %v1381_v53, %v1382_v54 }
0x15b9   :  { %v1385_v57 = vrot.slane %v1384_v56, 1 }
0x15bb   :  { %vm1386_vm13 = vcmp.lt.s32.totalorder %v1384_v56, %v1385_v57 }
0x15bc   :  { %v1387_v1 = vsel %vm1386_vm13, %v1384_v56, %v1385_v57  ;;  %v1857_v56 = vld [vmem:[%s2764_s1 + $0x4] sm:$0x3] }
0x15bd   :  { %1499 = vperm.xlu0 %1953, %v1497_v59   ;;  %v2530_v5 = vsel %vm969_vm3, %v1387_v1, %v1374_v3  ;;  %vm1071_vm11 = vcmp.gt.f32.partialorder %v1857_v56, 0.5 }
0x15be   :  { %v1874_v56 = vcvt.s32.f32 %v2530_v5 }
0x15c5   :  { %1959 = vset.pattern.permute.xlu0 %v2337_v62 }
0x15f6   :  { %v1420_v27 = vpop.permute.xlu2 %1419 }
0x15f7   :  { %v1439_v8 = vadd.f32 %v1420_v27, %v1411_v7 }
0x15f9   :  { %v1443_v15 = vsel %vm905_vm1, %v1439_v8, -inf }
0x1606   :  { %v1432_v24 = vpop.permute.xlu2 %1431 }
0x1607   :  { %v1441_v28 = vadd.f32 %v1432_v24, %v1413_v25 }
0x1609   :  { %v1452_v13 = vsel %vm905_vm1, %v1441_v28, -inf }
0x160e   :  { %v1426_v10 = vpop.permute.xlu1 %1425 }
0x160f   :  { %v1440_v46 = vadd.f32 %v1426_v10, %v1412_v9  ;;  %v1072_v9 = vsel %vm1071_vm11, 1, %v2040_v4 }
0x1611   :  { %v1444_v16 = vsel %vm907_vm2, %v1440_v46, -inf }
0x1612   :  { %v1445_v20 = vmax.f32 %v1443_v15, %v1444_v16  ;;  %v1860_v15 = vld [vmem:[%s2764_s1 + $0xa] sm:$0x3]  ;;  %v1859_v16 = vld [vmem:[%s2764_s1 + $0x8] sm:$0x3] }
0x1613   :  { %vm1389_vm13 = vcmp.gt.f32.partialorder %v1860_v15, 0.5 }
0x1614   :  { %v1446_v0 = vrot.slane %v1445_v20, 4 }
0x1616   :  { %v1447_v21 = vmax.f32 %v1445_v20, %v1446_v0 }
0x1618   :  { %v1448_v19 = vrot.slane %v1447_v21, 2 }
0x161a   :  { %v1449_v30 = vmax.f32 %v1447_v21, %v1448_v19  ;;  %v1390_v19 = vsel %vm1389_vm13, 1, %v2040_v4 }
0x161c   :  { %v1450_v26 = vrot.slane %v1449_v30, 1 }
0x161e   :  { %v1451_v34 = vmax.f32 %v1449_v30, %v1450_v26  ;;  %v1438_v36 = vpop.permute.xlu0 %1437  ;;  %v1862_v26 = vld [vmem:[%s2764_s1 + $0xe] sm:$0x3] }
0x161f   :  { %v1442_v12 = vadd.f32 %v1438_v36, %v1414_v33  ;;  %v1511_v36 = vld [vmem:[#allocation1 + $0x6] ss:$9 sm:$0xff] }
0x1620   :  { %vm1461_vm14 = vcmp.ge.f32.partialorder %v1439_v8, %v1451_v34  ;;  %vm1462_vm15 = vcmp.ge.f32.partialorder %v1440_v46, %v1451_v34  ;;  %1532 = vperm.xlu2 %1955, %v1451_v34   ;;  %1526 = vperm.xlu1 %1954, %v1451_v34   ;;  %v1179_v8 = vsel %vm1178_vm10, 1, %v2040_v4 }
0x1621   :  { %v1465_v31 = vsel %vm1461_vm14, %v2332_v61, 13  ;;  %v1466_v37 = vsel %vm1462_vm15, %v2337_v62, 13  ;;  %v1453_v39 = vsel %vm907_vm2, %v1442_v12, -inf  ;;  %vm1282_vm14 = vcmp.gt.f32.partialorder %v1859_v16, 0.5 }
0x1622   :  { %v1469_v18 = vsel %vm905_vm1, %v1465_v31, 2147483647  ;;  %v1470_v40 = vsel %vm907_vm2, %v1466_v37, 2147483647  ;;  %v1454_v63 = vmax.f32 %v1452_v13, %v1453_v39  ;;  %v1283_v24 = vsel %vm1282_vm14, 1, %v2040_v4 }
0x1623   :  { %vm1471_vm0 = vcmp.lt.s32.totalorder %v1469_v18, %v1470_v40  ;;  %v1514_v13 = vperm.slane %v1511_v36, 0  ;;  %v2592_v31 = vld [vmem:[%s2767_s8 + $0x8] sm:$0xf] }
0x1624   :  { %v1472_v41 = vsel %vm1471_vm0, %v1469_v18, %v1470_v40  ;;  %v1455_v42 = vrot.slane %v1454_v63, 4  ;;  %v2598_v18 = vld [vmem:[%s2767_s8] sm:$0xff]  ;;  %s2042_s8 = smov 117  }
0x1625   :  { %v1473_v43 = vrot.slane %v1472_v41, 4  ;;  %v1519_v37 = vadd.f32 %v2592_v31, %v1514_v13  ;;  %v1518_v40 = vadd.f32 %v2598_v18, %v1514_v13 }
0x1626   :  { %v1456_v47 = vmax.f32 %v1454_v63, %v1455_v42  ;;  %v1882_v42 = vcvt.s32.f32 %v2468_v38 }
0x1627   :  { %v2548_v48 = vpop.permute.xlu0 %966  ;;  %vm1474_vm5 = vcmp.lt.s32.totalorder %v1472_v41, %v1473_v43 }
0x1628   :  { %v1457_v50 = vrot.slane %v1456_v47, 2  ;;  %vm968_vm4 = vcmp.eq.s32.totalorder %v2548_v48, 1  ;;  %v1475_v53 = vsel %vm1474_vm5, %v1472_v41, %v1473_v43  ;;  %v1878_v48 = vcvt.s32.f32 %v2495_v49 }
0x1629   :  { %v2553_v51 = vsel %vm968_vm4, %v1890_v14, 0.0  ;;  %v1476_v55 = vrot.slane %v1475_v53, 2 }
0x162a   :  { %v1458_v52 = vmax.f32 %v1456_v47, %v1457_v50 }
0x162b   :  { %vm1477_vm7 = vcmp.lt.s32.totalorder %v1475_v53, %v1476_v55 }
0x162c   :  { %v1459_v44 = vrot.slane %v1458_v52, 1  ;;  %v1478_v10 = vsel %vm1477_vm7, %v1475_v53, %v1476_v55  ;;  %v1513_v53 = vld [vmem:[#allocation1 + $0x7] ss:$9 sm:$0xff] }
0x162d   :  { %v1479_v0 = vrot.slane %v1478_v10, 1  ;;  %v1515_v55 = vperm.slane %v1513_v53, 0 }
0x162e   :  { %v1460_v54 = vmax.f32 %v1458_v52, %v1459_v44 }
0x162f   :  { %vm1480_vm0 = vcmp.lt.s32.totalorder %v1478_v10, %v1479_v0 }
0x1630   :  { %vm1463_vm8 = vcmp.ge.f32.partialorder %v1441_v28, %v1460_v54  ;;  %vm1464_vm9 = vcmp.ge.f32.partialorder %v1442_v12, %v1460_v54  ;;  %1544 = vperm.xlu2 %1955, %v1460_v54   ;;  %1538 = vperm.xlu1 %1954, %v1460_v54   ;;  %v2564_v1 = vsel %vm969_vm3, %v1460_v54, %v1451_v34 }
0x1631   :  { %v1467_v57 = vsel %vm1463_vm8, %v2332_v61, 13  ;;  %v1468_v59 = vsel %vm1464_vm9, %v2337_v62, 13  ;;  %v1481_v30 = vsel %vm1480_vm0, %v1478_v10, %v1479_v0  ;;  %vm1603_vm8 = vcmp.gt.f32.partialorder %v1862_v26, 0.5 }
0x1632   :  { %v1482_v3 = vsel %vm905_vm1, %v1467_v57, 2147483647  ;;  %v1483_v6 = vsel %vm907_vm2, %v1468_v59, 2147483647  ;;  %v1604_v33 = vsel %vm1603_vm8, 1, %v2040_v4  ;;  %v1886_v26 = vcvt.s32.f32 %v2439_v29  ;;  %v2629_v29 = vpop.permute.xlu0 %1499 }
0x1633   :  { %vm1484_vm6 = vcmp.lt.s32.totalorder %v1482_v3, %v1483_v6  ;;  %vm1501_vm0 = vcmp.eq.s32.totalorder %v2629_v29, 1 }
0x1634   :  { %v1485_v27 = vsel %vm1484_vm6, %v1482_v3, %v1483_v6  ;;  %v1521_v3 = vadd.f32 %v2592_v31, %v1515_v55 }
0x1635   :  { %v1486_v7 = vrot.slane %v1485_v27, 4 }
0x1637   :  { %vm1487_vm12 = vcmp.lt.s32.totalorder %v1485_v27, %v1486_v7 }
0x1638   :  { %v1488_v46 = vsel %vm1487_vm12, %v1485_v27, %v1486_v7  ;;  %1957 = vset.pattern.permute.xlu2 %v2040_v4  ;;  %1956 = vset.pattern.permute.xlu1 %v2040_v4  ;;  %v1520_v7 = vadd.f32 %v2598_v18, %v1515_v55 }
0x1639   :  { %v1489_v20 = vrot.slane %v1488_v46, 2  ;;  %1181 = vperm.xlu2 %1957, %v1179_v8   ;;  %1074 = vperm.xlu1 %1956, %v1072_v9  }
0x163b   :  { %vm1490_vm15 = vcmp.lt.s32.totalorder %v1488_v46, %v1489_v20 }
0x163c   :  { %v1491_v21 = vsel %vm1490_vm15, %v1488_v46, %v1489_v20 }
0x163d   :  { %v1492_v22 = vrot.slane %v1491_v21, 1 }
0x163f   :  { %vm1493_vm5 = vcmp.lt.s32.totalorder %v1491_v21, %v1492_v22 }
0x1640   :  { %v1494_v25 = vsel %vm1493_vm5, %v1491_v21, %v1492_v22 }
0x1641   :  { %1392 = vperm.xlu2 %1957, %v1390_v19   ;;  %1285 = vperm.xlu1 %1956, %v1283_v24   ;;  %v2584_v28 = vsel %vm969_vm3, %v1494_v25, %v1481_v30 }
0x1649   :  { %1606 = vperm.xlu1 %1956, %v1604_v33   ;;  %1958 = vset.pattern.permute.xlu2 %v2332_v61  ;;  %v976_v33 = vsel %vm968_vm4, %v2395_v58, %v2352_v17 }
0x1651   :  { %1960 = vset.pattern.permute.xlu1 %v2332_v61 }
0x167a   :  { %v1533_v34 = vpop.permute.xlu2 %1532 }
0x167b   :  { %v1547_v39 = vadd.f32 %v1533_v34, %v1519_v37 }
0x167d   :  { %v1551_v47 = vsel %vm907_vm2, %v1547_v39, -inf }
0x168a   :  { %v1545_v12 = vpop.permute.xlu2 %1544 }
0x168b   :  { %v1549_v27 = vadd.f32 %v1545_v12, %v1521_v3 }
0x168d   :  { %v1560_v46 = vsel %vm907_vm2, %v1549_v27, -inf }
0x1692   :  { %v1527_v63 = vpop.permute.xlu1 %1526 }
0x1693   :  { %v1546_v41 = vadd.f32 %v1527_v63, %v1518_v40  ;;  %v1182_v43 = vpop.permute.xlu2 %1181 }
0x1694   :  { %vm1183_vm9 = vcmp.eq.s32.totalorder %v1182_v43, 1 }
0x1695   :  { %v1550_v14 = vsel %vm905_vm1, %v1546_v41, -inf  ;;  %v2605_v50 = vsel %vm1183_vm9, %v1882_v42, 0.0 }
0x1696   :  { %v1552_v52 = vmax.f32 %v1550_v14, %v1551_v47 }
0x1698   :  { %v1553_v44 = vrot.slane %v1552_v52, 4 }
0x169a   :  { %v1554_v54 = vmax.f32 %v1552_v52, %v1553_v44 }
0x169b   :  { %v1393_v32 = vpop.permute.xlu2 %1392 }
0x169c   :  { %v1555_v57 = vrot.slane %v1554_v54, 2  ;;  %vm1394_vm6 = vcmp.eq.s32.totalorder %v1393_v32, 1 }
0x169d   :  { %v2609_v38 = vsel %vm1394_vm6, %v1874_v56, 0.0 }
0x169e   :  { %v1556_v59 = vmax.f32 %v1554_v54, %v1555_v57 }
0x16a0   :  { %v1557_v6 = vrot.slane %v1556_v59, 1 }
0x16a2   :  { %v1558_v8 = vmax.f32 %v1556_v59, %v1557_v6  ;;  %v1539_v9 = vpop.permute.xlu1 %1538 }
0x16a3   :  { %v1548_v10 = vadd.f32 %v1539_v9, %v1520_v7 }
0x16a4   :  { %vm1568_vm10 = vcmp.ge.f32.partialorder %v1546_v41, %v1558_v8  ;;  %vm1569_vm11 = vcmp.ge.f32.partialorder %v1547_v39, %v1558_v8 }
0x16a5   :  { %v1572_v5 = vsel %vm1568_vm10, %v2332_v61, 13  ;;  %v1573_v15 = vsel %vm1569_vm11, %v2337_v62, 13  ;;  %v1559_v16 = vsel %vm905_vm1, %v1548_v10, -inf }
0x16a6   :  { %v1576_v20 = vsel %vm905_vm1, %v1572_v5, 2147483647  ;;  %v1577_v0 = vsel %vm907_vm2, %v1573_v15, 2147483647  ;;  %v1561_v21 = vmax.f32 %v1559_v16, %v1560_v46  ;;  %v2041_v46 = vmov 11  }
0x16a7   :  { %vm1578_vm7 = vcmp.lt.s32.totalorder %v1576_v20, %v1577_v0 }
0x16a8   :  { %v1579_v22 = vsel %vm1578_vm7, %v1576_v20, %v1577_v0  ;;  %v1562_v19 = vrot.slane %v1561_v21, 4 }
0x16a9   :  { %v1580_v24 = vrot.slane %v1579_v22, 4 }
0x16aa   :  { %v1563_v30 = vmax.f32 %v1561_v21, %v1562_v19 }
0x16ab   :  { %v1075_v25 = vpop.permute.xlu1 %1074  ;;  %vm1581_vm13 = vcmp.lt.s32.totalorder %v1579_v22, %v1580_v24 }
0x16ac   :  { %v1564_v34 = vrot.slane %v1563_v30, 2  ;;  %vm1076_vm12 = vcmp.eq.s32.totalorder %v1075_v25, 1  ;;  %v1582_v39 = vsel %vm1581_vm13, %v1579_v22, %v1580_v24 }
0x16ad   :  { %v1083_v36 = vsel %vm1076_vm12, %v2425_v2, %v976_v33  ;;  %v2625_v12 = vsel %vm1076_vm12, %v1886_v26, 0.0  ;;  %v1583_v41 = vrot.slane %v1582_v39, 2 }
0x16ae   :  { %v1565_v13 = vmax.f32 %v1563_v30, %v1564_v34  ;;  %v1190_v37 = vsel %vm1183_vm9, %v2463_v23, %v1083_v36 }
0x16af   :  { %vm1584_vm8 = vcmp.lt.s32.totalorder %v1582_v39, %v1583_v41 }
0x16b0   :  { %v1566_v40 = vrot.slane %v1565_v13, 1 }
0x16b2   :  { %v1567_v63 = vmax.f32 %v1565_v13, %v1566_v40 }
0x16b3   :  { %v1286_v17 = vpop.permute.xlu1 %1285 }
0x16b4   :  { %vm1570_vm4 = vcmp.ge.f32.partialorder %v1548_v10, %v1567_v63  ;;  %vm1571_vm14 = vcmp.ge.f32.partialorder %v1549_v27, %v1567_v63  ;;  %vm1287_vm15 = vcmp.eq.s32.totalorder %v1286_v17, 1  ;;  %v1613_v55 = vsel %vm969_vm3, %v1567_v63, %v1558_v8 }
0x16b5   :  { %v1574_v58 = vsel %vm1570_vm4, %v2332_v61, 13  ;;  %v1575_v2 = vsel %vm1571_vm14, %v2337_v62, 13  ;;  %v1294_v42 = vsel %vm1287_vm15, %v2489_v35, %v1190_v37  ;;  %v2635_v43 = vsel %vm1287_vm15, %v1878_v48, 0.0 }
0x16b6   :  { %v1589_v23 = vsel %vm905_vm1, %v1574_v58, 2147483647  ;;  %v1590_v47 = vsel %vm907_vm2, %v1575_v2, 2147483647  ;;  %v1401_v49 = vsel %vm1394_vm6, %v2518_v45, %v1294_v42  ;;  %v1585_v35 = vsel %vm1584_vm8, %v1582_v39, %v1583_v41 }
0x16b7   :  { %vm1591_vm5 = vcmp.lt.s32.totalorder %v1589_v23, %v1590_v47  ;;  %v1508_v14 = vsel %vm1501_vm0, %v2564_v1, %v1401_v49  ;;  %v1586_v57 = vrot.slane %v1585_v35, 1 }
0x16b8   :  { %v1592_v52 = vsel %vm1591_vm5, %v1589_v23, %v1590_v47 }
0x16b9   :  { %v1593_v53 = vrot.slane %v1592_v52, 4  ;;  %vm1587_vm11 = vcmp.lt.s32.totalorder %v1585_v35, %v1586_v57 }
0x16ba   :  { %v1588_v6 = vsel %vm1587_vm11, %v1585_v35, %v1586_v57 }
0x16bb   :  { %vm1594_vm9 = vcmp.lt.s32.totalorder %v1592_v52, %v1593_v53  ;;  %v1607_v44 = vpop.permute.xlu1 %1606 }
0x16bc   :  { %v1595_v54 = vsel %vm1594_vm9, %v1592_v52, %v1593_v53  ;;  %vm1608_vm10 = vcmp.eq.s32.totalorder %v1607_v44, 1 }
0x16bd   :  { %v1596_v56 = vrot.slane %v1595_v54, 2  ;;  %v1615_v32 = vsel %vm1608_vm10, %v1613_v55, %v1508_v14 }
0x16be   :  { %v1616_v45 = vperm.slane %v1615_v32, 0  ;;  %v1629_v59 = vperm.slane %v1615_v32, 1 }
0x16bf   :  { %vm1597_vm6 = vcmp.lt.s32.totalorder %v1595_v54, %v1596_v56 }
0x16c0   :  { %v1598_v3 = vsel %vm1597_vm6, %v1595_v54, %v1596_v56  ;;  %1634 = vperm.xlu1 %1960, %v1629_v59   ;;  %1627 = vperm.xlu0 %1959, %v1616_v45  }
0x16c1   :  { %v1599_v1 = vrot.slane %v1598_v3, 1  ;;  %1621 = vperm.xlu2 %1958, %v1616_v45  }
0x16c3   :  { %vm1600_vm7 = vcmp.lt.s32.totalorder %v1598_v3, %v1599_v1 }
0x16c4   :  { %v1601_v27 = vsel %vm1600_vm7, %v1598_v3, %v1599_v1  ;;  %vm1720_vm7 = vcmask 91136  }
0x16c5   :  { %v1609_v7 = vsel %vm969_vm3, %v1601_v27, %v1588_v6  ;;  %v2673_v27 = vand.u32 127, %v876_v60  ;;  %v1698_v60 = vld [vmem:[%s2769_s2] sm:$0x3] }
0x16c6   :  { %v1866_v9 = vcvt.s32.f32 %v1609_v7 }
0x16c8   :  { %v2649_v8 = vsel %vm1608_vm10, %v1866_v9, 0.0  ;;  %1965 = vset.pattern.permute.xlu0 %v2040_v4  ;;  %1962 = vset.pattern.permute.xlu1 %v2041_v46 }
0x16c9   :  { %1961 = vset.pattern.permute.xlu2 %v2337_v62 }
0x16d1   :  { %1640 = vperm.xlu2 %1961, %v1629_v59  }
0x16d9   :  { %1963 = vset.pattern.permute.xlu2 %v2041_v46 }
0x171b   :  { %v1622_v10 = vpop.permute.xlu2 %1621 }
0x171c   :  { %v1642_v15 = vadd.f32 %v2598_v18, %v1622_v10 }
0x171e   :  { %v1646_v19 = vsel %vm905_vm1, %v1642_v15, -inf }
0x172b   :  { %v1641_v5 = vpop.permute.xlu2 %1640 }
0x172c   :  { %v1645_v16 = vadd.f32 %v2592_v31, %v1641_v5 }
0x172e   :  { %v1656_v24 = vsel %vm907_vm2, %v1645_v16, -inf }
0x1732   :  { %v1635_v20 = vpop.permute.xlu1 %1634  ;;  %v1628_v0 = vpop.permute.xlu0 %1627 }
0x1733   :  { %v1644_v21 = vadd.f32 %v2598_v18, %v1635_v20  ;;  %v1643_v22 = vadd.f32 %v2592_v31, %v1628_v0 }
0x1735   :  { %v1655_v30 = vsel %vm905_vm1, %v1644_v21, -inf  ;;  %v1647_v25 = vsel %vm907_vm2, %v1643_v22, -inf }
0x1736   :  { %v1657_v26 = vmax.f32 %v1655_v30, %v1656_v24  ;;  %v1648_v33 = vmax.f32 %v1646_v19, %v1647_v25  ;;  %v1870_v24 = vcvt.s32.f32 %v2584_v28 }
0x1738   :  { %v1658_v34 = vrot.slane %v1657_v26, 4  ;;  %v1649_v36 = vrot.slane %v1648_v33, 4  ;;  %v1871_v25 = vsel %vm1501_vm0, %v1870_v24, 0.0 }
0x173a   :  { %v1659_v13 = vmax.f32 %v1657_v26, %v1658_v34  ;;  %v1650_v37 = vmax.f32 %v1648_v33, %v1649_v36 }
0x173c   :  { %v1660_v39 = vrot.slane %v1659_v13, 2  ;;  %v1651_v40 = vrot.slane %v1650_v37, 2 }
0x173e   :  { %v1661_v63 = vmax.f32 %v1659_v13, %v1660_v39  ;;  %v1652_v18 = vmax.f32 %v1650_v37, %v1651_v40 }
0x1740   :  { %v1662_v41 = vrot.slane %v1661_v63, 1  ;;  %v1653_v31 = vrot.slane %v1652_v18, 1 }
0x1742   :  { %v1663_v48 = vmax.f32 %v1661_v63, %v1662_v41  ;;  %v1654_v17 = vmax.f32 %v1652_v18, %v1653_v31 }
0x1744   :  { %vm1666_vm12 = vcmp.ge.f32.partialorder %v1644_v21, %v1663_v48  ;;  %vm1667_vm13 = vcmp.ge.f32.partialorder %v1645_v16, %v1663_v48  ;;  %vm1664_vm4 = vcmp.ge.f32.partialorder %v1642_v15, %v1654_v17  ;;  %vm1665_vm14 = vcmp.ge.f32.partialorder %v1643_v22, %v1654_v17 }
0x1745   :  { %v1670_v58 = vsel %vm1666_vm12, %v2332_v61, 13  ;;  %v1671_v2 = vsel %vm1667_vm13, %v2337_v62, 13  ;;  %v1668_v42 = vsel %vm1664_vm4, %v2332_v61, 13  ;;  %v1669_v23 = vsel %vm1665_vm14, %v2337_v62, 13 }
0x1746   :  { %v1685_v47 = vsel %vm905_vm1, %v1670_v58, 2147483647  ;;  %v1686_v49 = vsel %vm907_vm2, %v1671_v2, 2147483647  ;;  %v1672_v14 = vsel %vm905_vm1, %v1668_v42, 2147483647 }
0x1747   :  { %vm1687_vm15 = vcmp.lt.s32.totalorder %v1685_v47, %v1686_v49  ;;  %v1673_v52 = vsel %vm907_vm2, %v1669_v23, 2147483647  ;;  %vm1706_vm12 = vcmask 1024  }
0x1748   :  { %v1688_v53 = vsel %vm1687_vm15, %v1685_v47, %v1686_v49  ;;  %vm1674_vm5 = vcmp.lt.s32.totalorder %v1672_v14, %v1673_v52 }
0x1749   :  { %v1689_v35 = vrot.slane %v1688_v53, 4  ;;  %v1675_v44 = vsel %vm1674_vm5, %v1672_v14, %v1673_v52 }
0x174a   :  { %v1676_v54 = vrot.slane %v1675_v44, 4 }
0x174b   :  { %vm1690_vm8 = vcmp.lt.s32.totalorder %v1688_v53, %v1689_v35 }
0x174c   :  { %vm1677_vm9 = vcmp.lt.s32.totalorder %v1675_v44, %v1676_v54  ;;  %v1691_v55 = vsel %vm1690_vm8, %v1688_v53, %v1689_v35 }
0x174d   :  { %v1678_v61 = vsel %vm1677_vm9, %v1675_v44, %v1676_v54  ;;  %v1692_v56 = vrot.slane %v1691_v55, 2 }
0x174e   :  { %v1679_v62 = vrot.slane %v1678_v61, 2 }
0x174f   :  { %vm1693_vm10 = vcmp.lt.s32.totalorder %v1691_v55, %v1692_v56 }
0x1750   :  { %vm1680_vm6 = vcmp.lt.s32.totalorder %v1678_v61, %v1679_v62  ;;  %v1694_v57 = vsel %vm1693_vm10, %v1691_v55, %v1692_v56 }
0x1751   :  { %v1681_v32 = vsel %vm1680_vm6, %v1678_v61, %v1679_v62  ;;  %v1695_v45 = vrot.slane %v1694_v57, 1 }
0x1752   :  { %v1682_v59 = vrot.slane %v1681_v32, 1 }
0x1753   :  { %vm1696_vm1 = vcmp.lt.s32.totalorder %v1694_v57, %v1695_v45 }
0x1754   :  { %vm1683_vm11 = vcmp.lt.s32.totalorder %v1681_v32, %v1682_v59  ;;  %v1697_v3 = vsel %vm1696_vm1, %v1694_v57, %v1695_v45 }
0x1755   :  { %v1684_v1 = vsel %vm1683_vm11, %v1681_v32, %v1682_v59  ;;  %1712 = vperm.xlu2 %1963, %v1697_v3  }
0x1756   :  { %1709 = vperm.xlu1 %1962, %v1684_v1   ;;  %v1702_v6 = vsel %vm969_vm3, %v1697_v3, %v1684_v1 }
0x175d   :  { %1964 = vset.pattern.permute.xlu2 %v2040_v4 }
0x175e   :  { %1703 = vrot.lane.b32.xlu1 %v1702_v6, %s2042_s8 }
0x175f   :  { %1966 = vset.pattern.permute.xlu1 %v2040_v4  ;;  %v2690_v4 = vadd.s32 4294967295, %v1698_v60 }
0x1761   :  { %vm1725_vm13 = vcmp.eq.s32.totalorder %v2690_v4, 6  ;;  %vm1741_vm15 = vcmp.eq.s32.totalorder %v2690_v4, 5  ;;  %vm1757_vm8 = vcmp.eq.s32.totalorder %v2690_v4, 4  ;;  %vm1773_vm6 = vcmp.eq.s32.totalorder %v2690_v4, 3 }
0x17af   :  { %v1713_v7 = vpop.permute.xlu2 %1712 }
0x17c8   :  { %v1710_v9 = vpop.permute.xlu1 %1709 }
0x17c9   :  { %v1714_v10 = vsel %vm969_vm3, %v1713_v7, %v1710_v9 }
0x17ca   :  { %vm1715_vm2 = vcmp.eq.s32.totalorder %v2673_v27, %v1714_v10 }
0x17cb   :  { %v1865_v46 = vsel %vm1715_vm2, 1.0, %v2035_v11  ;;  %vm1789_vm2 = vcmp.eq.s32.totalorder %v2690_v4, 2 }
0x17cc   :  { %v1719_v5 = vmul.f32 %v2649_v8, %v1865_v46 }
0x17ce   :  { %v1721_v15 = vsel %vm1720_vm7, %v1719_v5, 0.0 }
0x17cf   :  { %1722 = vadd.xlane.f32.xlu0 %v1721_v15 }
0x17d0   :  { %v2680_v16 = vpop.permute.xlu1 %1703 }
0x17d1   :  { %1864 = vst.msk [vmem:[%s2768_s9 + $0xe] sm:$0x3] %vm1706_vm12, %v2680_v16 }
0x1842   :  { %v1723_v20 = vpop.xlane.xlu0 %1722 }
0x1843   :  { %vm1894_vm3 = vcmp.lt.s32.totalorder %v1723_v20, 0  ;;  %v1895_v8 = vceil.f32 %v1723_v20  ;;  %v1896_v0 = vfloor.f32 %v1723_v20 }
0x1845   :  { %v1897_v21 = vsel %vm1894_vm3, %v1895_v8, %v1896_v0 }
0x1846   :  { %v1898_v22 = vcvt.f32.s32 %v1897_v21 }
0x1848   :  { %v1726_v19 = vsel %vm1725_vm13, %v2680_v16, %v1898_v22 }
0x1849   :  { %1730 = vperm.xlu2 %1964, %v1726_v19   ;;  %1868 = vst.msk [vmem:[%s2768_s9 + $0xc] sm:$0x3] %vm1706_vm12, %v1726_v19 }
0x18a3   :  { %v1731_v30 = vpop.permute.xlu2 %1730 }
0x18a4   :  { %vm1732_vm4 = vcmp.eq.s32.totalorder %v2673_v27, %v1731_v30 }
0x18a5   :  { %v1869_v26 = vsel %vm1732_vm4, 1.0, %v2035_v11  ;;  %vm1805_vm4 = vcmp.eq.s32.totalorder %v2690_v4, 1 }
0x18a6   :  { %v1736_v33 = vmul.f32 %v1871_v25, %v1869_v26 }
0x18a8   :  { %v1737_v34 = vsel %vm1720_vm7, %v1736_v33, 0.0 }
0x18a9   :  { %1738 = vadd.xlane.f32.xlu1 %v1737_v34 }
0x191c   :  { %v1739_v36 = vpop.xlane.xlu1 %1738 }
0x191d   :  { %vm1899_vm14 = vcmp.lt.s32.totalorder %v1739_v36, 0  ;;  %v1900_v13 = vceil.f32 %v1739_v36  ;;  %v1901_v37 = vfloor.f32 %v1739_v36 }
0x191f   :  { %v1902_v39 = vsel %vm1899_vm14, %v1900_v13, %v1901_v37 }
0x1920   :  { %v1903_v28 = vcvt.f32.s32 %v1902_v39 }
0x1922   :  { %v1742_v40 = vsel %vm1741_vm15, %v2680_v16, %v1903_v28 }
0x1923   :  { %1746 = vperm.xlu2 %1964, %v1742_v40   ;;  %1872 = vst.msk [vmem:[%s2768_s9 + $0xa] sm:$0x3] %vm1706_vm12, %v1742_v40 }
0x197d   :  { %v1747_v29 = vpop.permute.xlu2 %1746 }
0x197e   :  { %vm1748_vm0 = vcmp.eq.s32.totalorder %v2673_v27, %v1747_v29 }
0x197f   :  { %v1873_v63 = vsel %vm1748_vm0, 1.0, %v2035_v11  ;;  %vm1821_vm0 = vcmp.eq.s32.totalorder %v2690_v4, 0 }
0x1980   :  { %v1752_v18 = vmul.f32 %v2609_v38, %v1873_v63 }
0x1982   :  { %v1753_v41 = vsel %vm1720_vm7, %v1752_v18, 0.0 }
0x1983   :  { %1754 = vadd.xlane.f32.xlu2 %v1753_v41 }
0x19f6   :  { %v1755_v31 = vpop.xlane.xlu2 %1754 }
0x19f7   :  { %vm1904_vm5 = vcmp.lt.s32.totalorder %v1755_v31, 0  ;;  %v1905_v48 = vceil.f32 %v1755_v31  ;;  %v1906_v17 = vfloor.f32 %v1755_v31 }
0x19f9   :  { %v1907_v58 = vsel %vm1904_vm5, %v1905_v48, %v1906_v17 }
0x19fa   :  { %v1908_v2 = vcvt.f32.s32 %v1907_v58 }
0x19fc   :  { %v1758_v42 = vsel %vm1757_vm8, %v2680_v16, %v1908_v2 }
0x19fd   :  { %1762 = vperm.xlu0 %1965, %v1758_v42   ;;  %1876 = vst.msk [vmem:[%s2768_s9 + $0x8] sm:$0x3] %vm1706_vm12, %v1758_v42 }
0x1a6f   :  { %v1763_v38 = vpop.permute.xlu0 %1762 }
0x1a70   :  { %vm1764_vm9 = vcmp.eq.s32.totalorder %v2673_v27, %v1763_v38 }
0x1a71   :  { %v1877_v23 = vsel %vm1764_vm9, 1.0, %v2035_v11 }
0x1a72   :  { %v1768_v47 = vmul.f32 %v2635_v43, %v1877_v23 }
0x1a74   :  { %v1769_v49 = vsel %vm1720_vm7, %v1768_v47, 0.0 }
0x1a75   :  { %1770 = vadd.xlane.f32.xlu1 %v1769_v49 }
0x1ae8   :  { %v1771_v14 = vpop.xlane.xlu1 %1770 }
0x1ae9   :  { %vm1909_vm10 = vcmp.lt.s32.totalorder %v1771_v14, 0  ;;  %v1910_v52 = vceil.f32 %v1771_v14  ;;  %v1911_v53 = vfloor.f32 %v1771_v14 }
0x1aeb   :  { %v1912_v35 = vsel %vm1909_vm10, %v1910_v52, %v1911_v53 }
0x1aec   :  { %v1913_v44 = vcvt.f32.s32 %v1912_v35 }
0x1aee   :  { %v1774_v54 = vsel %vm1773_vm6, %v2680_v16, %v1913_v44 }
0x1aef   :  { %1778 = vperm.xlu2 %1964, %v1774_v54   ;;  %1880 = vst.msk [vmem:[%s2768_s9 + $0x6] sm:$0x3] %vm1706_vm12, %v1774_v54 }
0x1b49   :  { %v1779_v43 = vpop.permute.xlu2 %1778 }
0x1b4a   :  { %vm1780_vm1 = vcmp.eq.s32.totalorder %v2673_v27, %v1779_v43 }
0x1b4b   :  { %v1881_v55 = vsel %vm1780_vm1, 1.0, %v2035_v11 }
0x1b4c   :  { %v1784_v61 = vmul.f32 %v2605_v50, %v1881_v55 }
0x1b4e   :  { %v1785_v56 = vsel %vm1720_vm7, %v1784_v61, 0.0 }
0x1b4f   :  { %1786 = vadd.xlane.f32.xlu1 %v1785_v56 }
0x1bc2   :  { %v1787_v62 = vpop.xlane.xlu1 %1786 }
0x1bc3   :  { %vm1914_vm11 = vcmp.lt.s32.totalorder %v1787_v62, 0  ;;  %v1915_v57 = vceil.f32 %v1787_v62  ;;  %v1916_v32 = vfloor.f32 %v1787_v62 }
0x1bc5   :  { %v1917_v45 = vsel %vm1914_vm11, %v1915_v57, %v1916_v32 }
0x1bc6   :  { %v1918_v59 = vcvt.f32.s32 %v1917_v45 }
0x1bc8   :  { %v1790_v3 = vsel %vm1789_vm2, %v2680_v16, %v1918_v59 }
0x1bc9   :  { %1794 = vperm.xlu1 %1966, %v1790_v3   ;;  %1884 = vst.msk [vmem:[%s2768_s9 + $0x4] sm:$0x3] %vm1706_vm12, %v1790_v3 }
0x1c3b   :  { %v1795_v50 = vpop.permute.xlu1 %1794 }
0x1c3c   :  { %vm1796_vm3 = vcmp.eq.s32.totalorder %v2673_v27, %v1795_v50 }
0x1c3d   :  { %v1885_v1 = vsel %vm1796_vm3, 1.0, %v2035_v11 }
0x1c3e   :  { %v1800_v6 = vmul.f32 %v2625_v12, %v1885_v1 }
0x1c40   :  { %v1801_v7 = vsel %vm1720_vm7, %v1800_v6, 0.0 }
0x1c41   :  { %1802 = vadd.xlane.f32.xlu2 %v1801_v7 }
0x1cb4   :  { %v1803_v9 = vpop.xlane.xlu2 %1802 }
0x1cb5   :  { %vm1919_vm13 = vcmp.lt.s32.totalorder %v1803_v9, 0  ;;  %v1920_v10 = vceil.f32 %v1803_v9  ;;  %v1921_v46 = vfloor.f32 %v1803_v9 }
0x1cb7   :  { %v1922_v5 = vsel %vm1919_vm13, %v1920_v10, %v1921_v46 }
0x1cb8   :  { %v1923_v15 = vcvt.f32.s32 %v1922_v5 }
0x1cba   :  { %v1806_v60 = vsel %vm1805_vm4, %v2680_v16, %v1923_v15 }
0x1cbb   :  { %1810 = vperm.xlu0 %1965, %v1806_v60   ;;  %1888 = vst.msk [vmem:[%s2768_s9 + $0x2] sm:$0x3] %vm1706_vm12, %v1806_v60 }
0x1d2d   :  { %v1811_v12 = vpop.permute.xlu0 %1810 }
0x1d2e   :  { %vm1812_vm14 = vcmp.eq.s32.totalorder %v2673_v27, %v1811_v12 }
0x1d2f   :  { %v1889_v20 = vsel %vm1812_vm14, 1.0, %v2035_v11 }
0x1d30   :  { %v1816_v8 = vmul.f32 %v2553_v51, %v1889_v20 }
0x1d32   :  { %v1817_v0 = vsel %vm1720_vm7, %v1816_v8, 0.0 }
0x1d33   :  { %1818 = vadd.xlane.f32.xlu0 %v1817_v0 }
0x1da6   :  { %v1819_v21 = vpop.xlane.xlu0 %1818 }
0x1da7   :  { %vm1924_vm15 = vcmp.lt.s32.totalorder %v1819_v21, 0  ;;  %v1925_v22 = vceil.f32 %v1819_v21  ;;  %v1926_v19 = vfloor.f32 %v1819_v21 }
0x1da9   :  { %v1927_v24 = vsel %vm1924_vm15, %v1925_v22, %v1926_v19 }
0x1daa   :  { %v1928_v30 = vcvt.f32.s32 %v1927_v24 }
0x1dac   :  { %v1822_v25 = vsel %vm1821_vm0, %v2680_v16, %v1928_v30 }
0x1dad   :  { %1823 = vst.msk [vmem:[%s2768_s9] sm:$0x3] %vm1706_vm12, %v1822_v25 }

</bundles_post_ra>
